<compile_context>
chip_gen: v7x
topology: tpu7x:2x2x1
jax: 0.10.0
libtpu: 0.0.40
codegen_flags: <defaults>
</compile_context>

<pallas_src>
import jax
import jax.numpy as jnp
from jax import lax
from jax.experimental import pallas as pl
from jax.experimental.pallas import tpu as pltpu

# encoder: 640 -> 128 -> 64 -> 32 -> 16 ; decoder: 16 -> 32 -> 64 -> 128 -> 640
DIMS = [640, 128, 64, 32, 16, 32, 64, 128, 640]
NUM_BN_LAYERS = 7          # all Liner_Module blocks (4 encoder + 3 decoder)
EPS = 1e-5
FEAT_PAD = 128             # lane-dense padded width for the 16-wide feature output


def make_autoencoder_kernel(groups_per_block, group_size):
    """Build the fused forward kernel for a block of groups_per_block*group_size rows."""
    inv_g = 1.0 / float(group_size)
    block_rows = groups_per_block * group_size
    n_params = 3 * NUM_BN_LAYERS + 2

    def bn_relu(y, gamma, beta):
        # Segmented BatchNorm1d (training-mode batch stats per group) + ReLU.
        d = y.shape[-1]
        yg = y.reshape(groups_per_block, group_size, d)
        s1 = jnp.sum(yg, axis=1, keepdims=True)                  # (G, 1, d)
        s2 = jnp.sum(yg * yg, axis=1, keepdims=True)
        mean = s1 * inv_g
        var = jnp.maximum(s2 * inv_g - mean * mean, 0.0)         # biased var, clamped
        scale = gamma * lax.rsqrt(var + EPS)                     # rsqrt -> EUP slot
        shift = beta - mean * scale
        return jnp.maximum(yg * scale + shift, 0.0).reshape(block_rows, d)

    def kernel(*refs):
        # refs: [x] + 7*(W, gamma, beta) + (W_final, b_final) + [out, feat]
        x_ref = refs[0]
        param_refs = refs[1:1 + n_params]
        out_ref = refs[1 + n_params]
        feat_ref = refs[2 + n_params]

        # --- layer 0: 640 -> 128, native bf16 MXU path (W0 stored bf16) ---
        x = x_ref[...]
        w0 = param_refs[0][...]
        y = jnp.dot(x.astype(jnp.bfloat16), w0, preferred_element_type=jnp.float32)
        h = bn_relu(y, param_refs[1][...], param_refs[2][...])

        # --- layers 1..6: small f32 matmuls ---
        for layer in range(1, NUM_BN_LAYERS):
            w = param_refs[layer * 3 + 0][...]
            g = param_refs[layer * 3 + 1][...]
            bt = param_refs[layer * 3 + 2][...]
            y = jnp.dot(h, w, preferred_element_type=jnp.float32)
            h = bn_relu(y, g, bt)
            if layer == 3:   # end of encoder -> x_feature (lane-dense padded write)
                feat_ref[...] = jnp.zeros_like(feat_ref)
                feat_ref[:, :DIMS[4]] = h

        # --- final Linear 128 -> 640, native bf16 MXU path (W stored bf16) ---
        w_f = param_refs[3 * NUM_BN_LAYERS][...]
        b_f = param_refs[3 * NUM_BN_LAYERS + 1][...]
        out_ref[...] = jnp.dot(h.astype(jnp.bfloat16), w_f,
                               preferred_element_type=jnp.float32) + b_f

    return kernel


def init_params(key):
    """PyTorch-style params: 7 x (W, b, gamma, beta) + final (W, b).

    Linear weights are stored pre-transposed (in, out).  The two 640-wide weights
    are pre-quantized to bf16 values (held as f32 here) so kernel and reference
    agree on the stored weight values.
    """
    full = []
    for layer in range(NUM_BN_LAYERS + 1):
        d_in, d_out = DIMS[layer], DIMS[layer + 1]
        key, kw, kb = jax.random.split(key, 3)
        bound = 1.0 / (d_in ** 0.5)
        w = jax.random.uniform(kw, (d_in, d_out), jnp.float32, -bound, bound)
        b = jax.random.uniform(kb, (1, d_out), jnp.float32, -bound, bound)
        if layer in (0, NUM_BN_LAYERS):            # the two big 640-wide matrices
            w = w.astype(jnp.bfloat16).astype(jnp.float32)
        full += [w, b]
        if layer < NUM_BN_LAYERS:
            full += [jnp.ones((1, d_out), jnp.float32),    # gamma
                     jnp.zeros((1, d_out), jnp.float32)]   # beta
    return full


def to_kernel_params(full_params):
    """Kernel param list: drop pre-BN biases (dead compute), bf16-store big weights."""
    kp = []
    for layer in range(NUM_BN_LAYERS):
        w, _b, g, bt = full_params[layer * 4: layer * 4 + 4]
        if layer == 0:
            w = w.astype(jnp.bfloat16)   # exact: values are already bf16-quantized
        kp += [w, g, bt]
    w_f = full_params[NUM_BN_LAYERS * 4].astype(jnp.bfloat16)
    b_f = full_params[NUM_BN_LAYERS * 4 + 1]
    kp += [w_f, b_f]
    return kp


def autoencoder_forward(x, kernel_params, *, group_size=8, groups_per_block=8):
    """Run the autoencoder over N rows = n_blocks * groups_per_block * group_size.

    Each `group_size`-row group is an independent forward pass of the module
    (BN stats per group); `groups_per_block` groups are packed into each grid step
    to fill the MXU and amortize pipeline overhead.  Weights are DMAed once and
    stay VMEM-resident; x/out/feat blocks are pipelined over the grid.
    """
    n_rows, d_in = x.shape
    assert d_in == DIMS[0]
    block_rows = group_size * groups_per_block
    assert n_rows % block_rows == 0
    assert block_rows % 8 == 0            # f32 sublane tile alignment
    n_blocks = n_rows // block_rows
    # TODO(synk): on v5e/v6e (128 MiB VMEM) block_rows can be pushed to 4096+ with a
    # larger vmem_limit_bytes; keep <= ~2048 and >= 2 grid steps on v7x (64 MiB, 2 TCs).

    kernel = make_autoencoder_kernel(groups_per_block, group_size)

    x_spec = pl.BlockSpec((block_rows, DIMS[0]), lambda g: (g, 0))
    out_spec = pl.BlockSpec((block_rows, DIMS[-1]), lambda g: (g, 0))
    feat_spec = pl.BlockSpec((block_rows, FEAT_PAD), lambda g: (g, 0))
    # Constant block index -> weights fetched once, VMEM-resident across steps.
    w_specs = [pl.BlockSpec(p.shape, lambda g: (0, 0)) for p in kernel_params]

    out_shapes = (
        jax.ShapeDtypeStruct((n_rows, DIMS[-1]), jnp.float32),   # reconstruction
        jax.ShapeDtypeStruct((n_rows, FEAT_PAD), jnp.float32),   # padded x_feature
    )
    out, feat_pad = pl.pallas_call(
        kernel,
        out_shape=out_shapes,
        grid=(n_blocks,),
        in_specs=[x_spec] + w_specs,
        out_specs=(out_spec, feat_spec),
        compiler_params=pltpu.CompilerParams(
            dimension_semantics=("parallel",),   # v7x: shard blocks across 2 TCs
            vmem_limit_bytes=32 << 20,
        ),
    )(x, *kernel_params)
    return out, feat_pad[:, :DIMS[4]]


def reference_forward(x, full_params):
    """Pure-JAX reference for ONE group, matching PyTorch semantics.

    The two 640-wide matmuls use the same bf16-quantized weights and bf16-rounded
    activations as the kernel's native bf16 MXU path (an approximation w.r.t. true
    f32 PyTorch math, applied identically here so results agree tightly).
    """
    feat = None
    h = x
    for layer in range(NUM_BN_LAYERS):
        w, b, g, bt = full_params[layer * 4: layer * 4 + 4]
        hin = h.astype(jnp.bfloat16).astype(jnp.float32) if layer == 0 else h
        y = hin @ w + b
        mean = jnp.mean(y, axis=0, keepdims=True)
        var = jnp.mean(jnp.square(y - mean), axis=0, keepdims=True)
        h = jnp.maximum((y - mean) / jnp.sqrt(var + EPS) * g + bt, 0.0)
        if layer == 3:
            feat = h
    w_f = full_params[NUM_BN_LAYERS * 4]
    b_f = full_params[NUM_BN_LAYERS * 4 + 1]
    out = h.astype(jnp.bfloat16).astype(jnp.float32) @ w_f + b_f
    return out, feat


if __name__ == "__main__":
    key = jax.random.PRNGKey(0)
    key, kx = jax.random.split(key)

    group_size = 8          # BN batch of each independent forward pass
    groups_per_block = 8    # groups packed per grid step -> 64 rows/step
    n_blocks = 2            # >= 2 grid steps (keeps both v7x TCs busy)
    n_rows = n_blocks * groups_per_block * group_size    # 128 rows total

    x = jax.random.normal(kx, (n_rows, DIMS[0]), jnp.float32)
    full_params = init_params(key)
    kparams = to_kernel_params(full_params)

    out, feat = jax.block_until_ready(
        autoencoder_forward(x, kparams,
                            group_size=group_size,
                            groups_per_block=groups_per_block))

    # Reference: each 8-row group is an independent forward call of the module.
    ref_out_parts, ref_feat_parts = [], []
    for g in range(n_rows // group_size):
        o, f = reference_forward(x[g * group_size:(g + 1) * group_size], full_params)
        ref_out_parts.append(o)
        ref_feat_parts.append(f)
    ref_out = jnp.concatenate(ref_out_parts, axis=0)
    ref_feat = jnp.concatenate(ref_feat_parts, axis=0)

    assert out.shape == (n_rows, DIMS[-1]) and feat.shape == (n_rows, DIMS[4])
    assert jnp.allclose(out, ref_out, atol=5e-3, rtol=5e-3)
    assert jnp.allclose(feat, ref_feat, atol=5e-3, rtol=5e-3)
    print("KERNEL_OK")
</pallas_src>

<mosaic_0001>
module attributes {stable_mosaic.version = 11 : i64} {
  func.func @kernel(%arg0: i32, %arg1: memref<64x640xf32, #tpu.memory_space<vmem>>, %arg2: memref<640x128xbf16, #tpu.memory_space<vmem>>, %arg3: memref<1x128xf32, #tpu.memory_space<vmem>>, %arg4: memref<1x128xf32, #tpu.memory_space<vmem>>, %arg5: memref<128x64xf32, #tpu.memory_space<vmem>>, %arg6: memref<1x64xf32, #tpu.memory_space<vmem>>, %arg7: memref<1x64xf32, #tpu.memory_space<vmem>>, %arg8: memref<64x32xf32, #tpu.memory_space<vmem>>, %arg9: memref<1x32xf32, #tpu.memory_space<vmem>>, %arg10: memref<1x32xf32, #tpu.memory_space<vmem>>, %arg11: memref<32x16xf32, #tpu.memory_space<vmem>>, %arg12: memref<1x16xf32, #tpu.memory_space<vmem>>, %arg13: memref<1x16xf32, #tpu.memory_space<vmem>>, %arg14: memref<16x32xf32, #tpu.memory_space<vmem>>, %arg15: memref<1x32xf32, #tpu.memory_space<vmem>>, %arg16: memref<1x32xf32, #tpu.memory_space<vmem>>, %arg17: memref<32x64xf32, #tpu.memory_space<vmem>>, %arg18: memref<1x64xf32, #tpu.memory_space<vmem>>, %arg19: memref<1x64xf32, #tpu.memory_space<vmem>>, %arg20: memref<64x128xf32, #tpu.memory_space<vmem>>, %arg21: memref<1x128xf32, #tpu.memory_space<vmem>>, %arg22: memref<1x128xf32, #tpu.memory_space<vmem>>, %arg23: memref<128x640xbf16, #tpu.memory_space<vmem>>, %arg24: memref<1x640xf32, #tpu.memory_space<vmem>>, %arg25: memref<64x640xf32, #tpu.memory_space<vmem>>, %arg26: memref<64x128xf32, #tpu.memory_space<vmem>>) attributes {dimension_semantics = [#tpu.dimension_semantics<parallel>], iteration_bounds = array<i64: 2>, scalar_prefetch = 0 : i64, scratch_operands = 0 : i64, tpu.core_type = #tpu.core_type<tc>, window_params = [{transform_indices = @transform_0, window_bounds = array<i64: 64, 640>}, {pipeline_mode = #tpu.pipeline_mode<synchronous>, transform_indices = @transform_1, window_bounds = array<i64: 640, 128>}, {pipeline_mode = #tpu.pipeline_mode<synchronous>, transform_indices = @transform_2, window_bounds = array<i64: 1, 128>}, {pipeline_mode = #tpu.pipeline_mode<synchronous>, transform_indices = @transform_3, window_bounds = array<i64: 1, 128>}, {pipeline_mode = #tpu.pipeline_mode<synchronous>, transform_indices = @transform_4, window_bounds = array<i64: 128, 64>}, {pipeline_mode = #tpu.pipeline_mode<synchronous>, transform_indices = @transform_5, window_bounds = array<i64: 1, 64>}, {pipeline_mode = #tpu.pipeline_mode<synchronous>, transform_indices = @transform_6, window_bounds = array<i64: 1, 64>}, {pipeline_mode = #tpu.pipeline_mode<synchronous>, transform_indices = @transform_7, window_bounds = array<i64: 64, 32>}, {pipeline_mode = #tpu.pipeline_mode<synchronous>, transform_indices = @transform_8, window_bounds = array<i64: 1, 32>}, {pipeline_mode = #tpu.pipeline_mode<synchronous>, transform_indices = @transform_9, window_bounds = array<i64: 1, 32>}, {pipeline_mode = #tpu.pipeline_mode<synchronous>, transform_indices = @transform_10, window_bounds = array<i64: 32, 16>}, {pipeline_mode = #tpu.pipeline_mode<synchronous>, transform_indices = @transform_11, window_bounds = array<i64: 1, 16>}, {pipeline_mode = #tpu.pipeline_mode<synchronous>, transform_indices = @transform_12, window_bounds = array<i64: 1, 16>}, {pipeline_mode = #tpu.pipeline_mode<synchronous>, transform_indices = @transform_13, window_bounds = array<i64: 16, 32>}, {pipeline_mode = #tpu.pipeline_mode<synchronous>, transform_indices = @transform_14, window_bounds = array<i64: 1, 32>}, {pipeline_mode = #tpu.pipeline_mode<synchronous>, transform_indices = @transform_15, window_bounds = array<i64: 1, 32>}, {pipeline_mode = #tpu.pipeline_mode<synchronous>, transform_indices = @transform_16, window_bounds = array<i64: 32, 64>}, {pipeline_mode = #tpu.pipeline_mode<synchronous>, transform_indices = @transform_17, window_bounds = array<i64: 1, 64>}, {pipeline_mode = #tpu.pipeline_mode<synchronous>, transform_indices = @transform_18, window_bounds = array<i64: 1, 64>}, {pipeline_mode = #tpu.pipeline_mode<synchronous>, transform_indices = @transform_19, window_bounds = array<i64: 64, 128>}, {pipeline_mode = #tpu.pipeline_mode<synchronous>, transform_indices = @transform_20, window_bounds = array<i64: 1, 128>}, {pipeline_mode = #tpu.pipeline_mode<synchronous>, transform_indices = @transform_21, window_bounds = array<i64: 1, 128>}, {pipeline_mode = #tpu.pipeline_mode<synchronous>, transform_indices = @transform_22, window_bounds = array<i64: 128, 640>}, {pipeline_mode = #tpu.pipeline_mode<synchronous>, transform_indices = @transform_23, window_bounds = array<i64: 1, 640>}, {transform_indices = @transform_24, window_bounds = array<i64: 64, 640>}, {transform_indices = @transform_25, window_bounds = array<i64: 64, 128>}]} {
    %c0 = arith.constant 0 : index
    %c0_0 = arith.constant 0 : index
    %0 = vector.load %arg1[%c0, %c0_0] : memref<64x640xf32, #tpu.memory_space<vmem>>, vector<64x640xf32>
    %c0_1 = arith.constant 0 : index
    %c0_2 = arith.constant 0 : index
    %1 = vector.load %arg2[%c0_1, %c0_2] : memref<640x128xbf16, #tpu.memory_space<vmem>>, vector<640x128xbf16>
    %2 = arith.truncf %0 : vector<64x640xf32> to vector<64x640xbf16>
    %cst = arith.constant dense<0.000000e+00> : vector<64x128xf32>
    %3 = tpu.matmul %2, %1, %cst {dimension_numbers = #tpu.dot_dimension_numbers<[1], [0], [0], [1], [0, 0, 1, 1], [], []>} : vector<64x640xbf16>, vector<640x128xbf16>, vector<64x128xf32> -> vector<64x128xf32>
    %c0_3 = arith.constant 0 : index
    %c0_4 = arith.constant 0 : index
    %4 = vector.load %arg3[%c0_3, %c0_4] : memref<1x128xf32, #tpu.memory_space<vmem>>, vector<1x128xf32>
    %c0_5 = arith.constant 0 : index
    %c0_6 = arith.constant 0 : index
    %5 = vector.load %arg4[%c0_5, %c0_6] : memref<1x128xf32, #tpu.memory_space<vmem>>, vector<1x128xf32>
    %6 = vector.shape_cast %3 : vector<64x128xf32> to vector<8x8x128xf32>
    %cst_7 = arith.constant dense<0.000000e+00> : vector<8x128xf32>
    %7 = vector.multi_reduction <add>, %6, %cst_7 [1] : vector<8x8x128xf32> to vector<8x128xf32>
    %8 = vector.shape_cast %7 : vector<8x128xf32> to vector<8x1x128xf32>
    %9 = arith.mulf %6, %6 : vector<8x8x128xf32>
    %cst_8 = arith.constant dense<0.000000e+00> : vector<8x128xf32>
    %10 = vector.multi_reduction <add>, %9, %cst_8 [1] : vector<8x8x128xf32> to vector<8x128xf32>
    %11 = vector.shape_cast %10 : vector<8x128xf32> to vector<8x1x128xf32>
    %cst_9 = arith.constant 1.250000e-01 : f32
    %12 = vector.broadcast %cst_9 : f32 to vector<8x1x128xf32>
    %13 = arith.mulf %8, %12 : vector<8x1x128xf32>
    %cst_10 = arith.constant 1.250000e-01 : f32
    %14 = vector.broadcast %cst_10 : f32 to vector<8x1x128xf32>
    %15 = arith.mulf %11, %14 : vector<8x1x128xf32>
    %16 = arith.mulf %13, %13 : vector<8x1x128xf32>
    %17 = arith.subf %15, %16 : vector<8x1x128xf32>
    %cst_11 = arith.constant 0.000000e+00 : f32
    %18 = vector.broadcast %cst_11 : f32 to vector<8x1x128xf32>
    %19 = arith.maximumf %17, %18 : vector<8x1x128xf32>
    %cst_12 = arith.constant 9.99999974E-6 : f32
    %20 = vector.broadcast %cst_12 : f32 to vector<8x1x128xf32>
    %21 = arith.addf %19, %20 : vector<8x1x128xf32>
    %22 = math.rsqrt %21 : vector<8x1x128xf32>
    %23 = vector.shape_cast %4 : vector<1x128xf32> to vector<1x1x128xf32>
    %24 = vector.broadcast %23 : vector<1x1x128xf32> to vector<8x1x128xf32>
    %25 = arith.mulf %24, %22 : vector<8x1x128xf32>
    %26 = arith.mulf %13, %25 : vector<8x1x128xf32>
    %27 = vector.shape_cast %5 : vector<1x128xf32> to vector<1x1x128xf32>
    %28 = vector.broadcast %27 : vector<1x1x128xf32> to vector<8x1x128xf32>
    %29 = arith.subf %28, %26 : vector<8x1x128xf32>
    %30 = vector.broadcast %25 : vector<8x1x128xf32> to vector<8x8x128xf32>
    %31 = arith.mulf %6, %30 : vector<8x8x128xf32>
    %32 = vector.broadcast %29 : vector<8x1x128xf32> to vector<8x8x128xf32>
    %33 = arith.addf %31, %32 : vector<8x8x128xf32>
    %cst_13 = arith.constant 0.000000e+00 : f32
    %34 = vector.broadcast %cst_13 : f32 to vector<8x8x128xf32>
    %35 = arith.maximumf %33, %34 : vector<8x8x128xf32>
    %36 = vector.shape_cast %35 : vector<8x8x128xf32> to vector<64x128xf32>
    %c0_14 = arith.constant 0 : index
    %c0_15 = arith.constant 0 : index
    %37 = vector.load %arg5[%c0_14, %c0_15] : memref<128x64xf32, #tpu.memory_space<vmem>>, vector<128x64xf32>
    %c0_16 = arith.constant 0 : index
    %c0_17 = arith.constant 0 : index
    %38 = vector.load %arg6[%c0_16, %c0_17] : memref<1x64xf32, #tpu.memory_space<vmem>>, vector<1x64xf32>
    %c0_18 = arith.constant 0 : index
    %c0_19 = arith.constant 0 : index
    %39 = vector.load %arg7[%c0_18, %c0_19] : memref<1x64xf32, #tpu.memory_space<vmem>>, vector<1x64xf32>
    %cst_20 = arith.constant dense<0.000000e+00> : vector<64x64xf32>
    %40 = tpu.matmul %36, %37, %cst_20 {dimension_numbers = #tpu.dot_dimension_numbers<[1], [0], [0], [1], [0, 0, 1, 1], [], []>} : vector<64x128xf32>, vector<128x64xf32>, vector<64x64xf32> -> vector<64x64xf32>
    %41 = vector.shape_cast %40 : vector<64x64xf32> to vector<8x8x64xf32>
    %cst_21 = arith.constant dense<0.000000e+00> : vector<8x64xf32>
    %42 = vector.multi_reduction <add>, %41, %cst_21 [1] : vector<8x8x64xf32> to vector<8x64xf32>
    %43 = vector.shape_cast %42 : vector<8x64xf32> to vector<8x1x64xf32>
    %44 = arith.mulf %41, %41 : vector<8x8x64xf32>
    %cst_22 = arith.constant dense<0.000000e+00> : vector<8x64xf32>
    %45 = vector.multi_reduction <add>, %44, %cst_22 [1] : vector<8x8x64xf32> to vector<8x64xf32>
    %46 = vector.shape_cast %45 : vector<8x64xf32> to vector<8x1x64xf32>
    %cst_23 = arith.constant 1.250000e-01 : f32
    %47 = vector.broadcast %cst_23 : f32 to vector<8x1x64xf32>
    %48 = arith.mulf %43, %47 : vector<8x1x64xf32>
    %cst_24 = arith.constant 1.250000e-01 : f32
    %49 = vector.broadcast %cst_24 : f32 to vector<8x1x64xf32>
    %50 = arith.mulf %46, %49 : vector<8x1x64xf32>
    %51 = arith.mulf %48, %48 : vector<8x1x64xf32>
    %52 = arith.subf %50, %51 : vector<8x1x64xf32>
    %cst_25 = arith.constant 0.000000e+00 : f32
    %53 = vector.broadcast %cst_25 : f32 to vector<8x1x64xf32>
    %54 = arith.maximumf %52, %53 : vector<8x1x64xf32>
    %cst_26 = arith.constant 9.99999974E-6 : f32
    %55 = vector.broadcast %cst_26 : f32 to vector<8x1x64xf32>
    %56 = arith.addf %54, %55 : vector<8x1x64xf32>
    %57 = math.rsqrt %56 : vector<8x1x64xf32>
    %58 = vector.shape_cast %38 : vector<1x64xf32> to vector<1x1x64xf32>
    %59 = vector.broadcast %58 : vector<1x1x64xf32> to vector<8x1x64xf32>
    %60 = arith.mulf %59, %57 : vector<8x1x64xf32>
    %61 = arith.mulf %48, %60 : vector<8x1x64xf32>
    %62 = vector.shape_cast %39 : vector<1x64xf32> to vector<1x1x64xf32>
    %63 = vector.broadcast %62 : vector<1x1x64xf32> to vector<8x1x64xf32>
    %64 = arith.subf %63, %61 : vector<8x1x64xf32>
    %65 = vector.broadcast %60 : vector<8x1x64xf32> to vector<8x8x64xf32>
    %66 = arith.mulf %41, %65 : vector<8x8x64xf32>
    %67 = vector.broadcast %64 : vector<8x1x64xf32> to vector<8x8x64xf32>
    %68 = arith.addf %66, %67 : vector<8x8x64xf32>
    %cst_27 = arith.constant 0.000000e+00 : f32
    %69 = vector.broadcast %cst_27 : f32 to vector<8x8x64xf32>
    %70 = arith.maximumf %68, %69 : vector<8x8x64xf32>
    %71 = vector.shape_cast %70 : vector<8x8x64xf32> to vector<64x64xf32>
    %c0_28 = arith.constant 0 : index
    %c0_29 = arith.constant 0 : index
    %72 = vector.load %arg8[%c0_28, %c0_29] : memref<64x32xf32, #tpu.memory_space<vmem>>, vector<64x32xf32>
    %c0_30 = arith.constant 0 : index
    %c0_31 = arith.constant 0 : index
    %73 = vector.load %arg9[%c0_30, %c0_31] : memref<1x32xf32, #tpu.memory_space<vmem>>, vector<1x32xf32>
    %c0_32 = arith.constant 0 : index
    %c0_33 = arith.constant 0 : index
    %74 = vector.load %arg10[%c0_32, %c0_33] : memref<1x32xf32, #tpu.memory_space<vmem>>, vector<1x32xf32>
    %cst_34 = arith.constant dense<0.000000e+00> : vector<64x32xf32>
    %75 = tpu.matmul %71, %72, %cst_34 {dimension_numbers = #tpu.dot_dimension_numbers<[1], [0], [0], [1], [0, 0, 1, 1], [], []>} : vector<64x64xf32>, vector<64x32xf32>, vector<64x32xf32> -> vector<64x32xf32>
    %76 = vector.shape_cast %75 : vector<64x32xf32> to vector<8x8x32xf32>
    %cst_35 = arith.constant dense<0.000000e+00> : vector<8x32xf32>
    %77 = vector.multi_reduction <add>, %76, %cst_35 [1] : vector<8x8x32xf32> to vector<8x32xf32>
    %78 = vector.shape_cast %77 : vector<8x32xf32> to vector<8x1x32xf32>
    %79 = arith.mulf %76, %76 : vector<8x8x32xf32>
    %cst_36 = arith.constant dense<0.000000e+00> : vector<8x32xf32>
    %80 = vector.multi_reduction <add>, %79, %cst_36 [1] : vector<8x8x32xf32> to vector<8x32xf32>
    %81 = vector.shape_cast %80 : vector<8x32xf32> to vector<8x1x32xf32>
    %cst_37 = arith.constant 1.250000e-01 : f32
    %82 = vector.broadcast %cst_37 : f32 to vector<8x1x32xf32>
    %83 = arith.mulf %78, %82 : vector<8x1x32xf32>
    %cst_38 = arith.constant 1.250000e-01 : f32
    %84 = vector.broadcast %cst_38 : f32 to vector<8x1x32xf32>
    %85 = arith.mulf %81, %84 : vector<8x1x32xf32>
    %86 = arith.mulf %83, %83 : vector<8x1x32xf32>
    %87 = arith.subf %85, %86 : vector<8x1x32xf32>
    %cst_39 = arith.constant 0.000000e+00 : f32
    %88 = vector.broadcast %cst_39 : f32 to vector<8x1x32xf32>
    %89 = arith.maximumf %87, %88 : vector<8x1x32xf32>
    %cst_40 = arith.constant 9.99999974E-6 : f32
    %90 = vector.broadcast %cst_40 : f32 to vector<8x1x32xf32>
    %91 = arith.addf %89, %90 : vector<8x1x32xf32>
    %92 = math.rsqrt %91 : vector<8x1x32xf32>
    %93 = vector.shape_cast %73 : vector<1x32xf32> to vector<1x1x32xf32>
    %94 = vector.broadcast %93 : vector<1x1x32xf32> to vector<8x1x32xf32>
    %95 = arith.mulf %94, %92 : vector<8x1x32xf32>
    %96 = arith.mulf %83, %95 : vector<8x1x32xf32>
    %97 = vector.shape_cast %74 : vector<1x32xf32> to vector<1x1x32xf32>
    %98 = vector.broadcast %97 : vector<1x1x32xf32> to vector<8x1x32xf32>
    %99 = arith.subf %98, %96 : vector<8x1x32xf32>
    %100 = vector.broadcast %95 : vector<8x1x32xf32> to vector<8x8x32xf32>
    %101 = arith.mulf %76, %100 : vector<8x8x32xf32>
    %102 = vector.broadcast %99 : vector<8x1x32xf32> to vector<8x8x32xf32>
    %103 = arith.addf %101, %102 : vector<8x8x32xf32>
    %cst_41 = arith.constant 0.000000e+00 : f32
    %104 = vector.broadcast %cst_41 : f32 to vector<8x8x32xf32>
    %105 = arith.maximumf %103, %104 : vector<8x8x32xf32>
    %106 = vector.shape_cast %105 : vector<8x8x32xf32> to vector<64x32xf32>
    %c0_42 = arith.constant 0 : index
    %c0_43 = arith.constant 0 : index
    %107 = vector.load %arg11[%c0_42, %c0_43] : memref<32x16xf32, #tpu.memory_space<vmem>>, vector<32x16xf32>
    %c0_44 = arith.constant 0 : index
    %c0_45 = arith.constant 0 : index
    %108 = vector.load %arg12[%c0_44, %c0_45] : memref<1x16xf32, #tpu.memory_space<vmem>>, vector<1x16xf32>
    %c0_46 = arith.constant 0 : index
    %c0_47 = arith.constant 0 : index
    %109 = vector.load %arg13[%c0_46, %c0_47] : memref<1x16xf32, #tpu.memory_space<vmem>>, vector<1x16xf32>
    %cst_48 = arith.constant dense<0.000000e+00> : vector<64x16xf32>
    %110 = tpu.matmul %106, %107, %cst_48 {dimension_numbers = #tpu.dot_dimension_numbers<[1], [0], [0], [1], [0, 0, 1, 1], [], []>} : vector<64x32xf32>, vector<32x16xf32>, vector<64x16xf32> -> vector<64x16xf32>
    %111 = vector.shape_cast %110 : vector<64x16xf32> to vector<8x8x16xf32>
    %cst_49 = arith.constant dense<0.000000e+00> : vector<8x16xf32>
    %112 = vector.multi_reduction <add>, %111, %cst_49 [1] : vector<8x8x16xf32> to vector<8x16xf32>
    %113 = vector.shape_cast %112 : vector<8x16xf32> to vector<8x1x16xf32>
    %114 = arith.mulf %111, %111 : vector<8x8x16xf32>
    %cst_50 = arith.constant dense<0.000000e+00> : vector<8x16xf32>
    %115 = vector.multi_reduction <add>, %114, %cst_50 [1] : vector<8x8x16xf32> to vector<8x16xf32>
    %116 = vector.shape_cast %115 : vector<8x16xf32> to vector<8x1x16xf32>
    %cst_51 = arith.constant 1.250000e-01 : f32
    %117 = vector.broadcast %cst_51 : f32 to vector<8x1x16xf32>
    %118 = arith.mulf %113, %117 : vector<8x1x16xf32>
    %cst_52 = arith.constant 1.250000e-01 : f32
    %119 = vector.broadcast %cst_52 : f32 to vector<8x1x16xf32>
    %120 = arith.mulf %116, %119 : vector<8x1x16xf32>
    %121 = arith.mulf %118, %118 : vector<8x1x16xf32>
    %122 = arith.subf %120, %121 : vector<8x1x16xf32>
    %cst_53 = arith.constant 0.000000e+00 : f32
    %123 = vector.broadcast %cst_53 : f32 to vector<8x1x16xf32>
    %124 = arith.maximumf %122, %123 : vector<8x1x16xf32>
    %cst_54 = arith.constant 9.99999974E-6 : f32
    %125 = vector.broadcast %cst_54 : f32 to vector<8x1x16xf32>
    %126 = arith.addf %124, %125 : vector<8x1x16xf32>
    %127 = math.rsqrt %126 : vector<8x1x16xf32>
    %128 = vector.shape_cast %108 : vector<1x16xf32> to vector<1x1x16xf32>
    %129 = vector.broadcast %128 : vector<1x1x16xf32> to vector<8x1x16xf32>
    %130 = arith.mulf %129, %127 : vector<8x1x16xf32>
    %131 = arith.mulf %118, %130 : vector<8x1x16xf32>
    %132 = vector.shape_cast %109 : vector<1x16xf32> to vector<1x1x16xf32>
    %133 = vector.broadcast %132 : vector<1x1x16xf32> to vector<8x1x16xf32>
    %134 = arith.subf %133, %131 : vector<8x1x16xf32>
    %135 = vector.broadcast %130 : vector<8x1x16xf32> to vector<8x8x16xf32>
    %136 = arith.mulf %111, %135 : vector<8x8x16xf32>
    %137 = vector.broadcast %134 : vector<8x1x16xf32> to vector<8x8x16xf32>
    %138 = arith.addf %136, %137 : vector<8x8x16xf32>
    %cst_55 = arith.constant 0.000000e+00 : f32
    %139 = vector.broadcast %cst_55 : f32 to vector<8x8x16xf32>
    %140 = arith.maximumf %138, %139 : vector<8x8x16xf32>
    %141 = vector.shape_cast %140 : vector<8x8x16xf32> to vector<64x16xf32>
    %cst_56 = arith.constant 0.000000e+00 : f32
    %142 = vector.broadcast %cst_56 : f32 to vector<64x128xf32>
    %c0_57 = arith.constant 0 : index
    %c0_58 = arith.constant 0 : index
    %143 = vector.load %arg26[%c0_57, %c0_58] : memref<64x128xf32, #tpu.memory_space<vmem>>, vector<64x128xf32>
    tpu.vector_store %arg26[%c0_57, %c0_58], %142 {strides = array<i32>} : memref<64x128xf32, #tpu.memory_space<vmem>>, vector<64x128xf32>,
    %c0_59 = arith.constant 0 : index
    %c0_60 = arith.constant 0 : index
    %144 = vector.load %arg26[%c0_59, %c0_60] : memref<64x128xf32, #tpu.memory_space<vmem>>, vector<64x16xf32>
    tpu.vector_store %arg26[%c0_59, %c0_60], %141 {strides = array<i32>} : memref<64x128xf32, #tpu.memory_space<vmem>>, vector<64x16xf32>,
    %c0_61 = arith.constant 0 : index
    %c0_62 = arith.constant 0 : index
    %145 = vector.load %arg14[%c0_61, %c0_62] : memref<16x32xf32, #tpu.memory_space<vmem>>, vector<16x32xf32>
    %c0_63 = arith.constant 0 : index
    %c0_64 = arith.constant 0 : index
    %146 = vector.load %arg15[%c0_63, %c0_64] : memref<1x32xf32, #tpu.memory_space<vmem>>, vector<1x32xf32>
    %c0_65 = arith.constant 0 : index
    %c0_66 = arith.constant 0 : index
    %147 = vector.load %arg16[%c0_65, %c0_66] : memref<1x32xf32, #tpu.memory_space<vmem>>, vector<1x32xf32>
    %cst_67 = arith.constant dense<0.000000e+00> : vector<64x32xf32>
    %148 = tpu.matmul %141, %145, %cst_67 {dimension_numbers = #tpu.dot_dimension_numbers<[1], [0], [0], [1], [0, 0, 1, 1], [], []>} : vector<64x16xf32>, vector<16x32xf32>, vector<64x32xf32> -> vector<64x32xf32>
    %149 = vector.shape_cast %148 : vector<64x32xf32> to vector<8x8x32xf32>
    %cst_68 = arith.constant dense<0.000000e+00> : vector<8x32xf32>
    %150 = vector.multi_reduction <add>, %149, %cst_68 [1] : vector<8x8x32xf32> to vector<8x32xf32>
    %151 = vector.shape_cast %150 : vector<8x32xf32> to vector<8x1x32xf32>
    %152 = arith.mulf %149, %149 : vector<8x8x32xf32>
    %cst_69 = arith.constant dense<0.000000e+00> : vector<8x32xf32>
    %153 = vector.multi_reduction <add>, %152, %cst_69 [1] : vector<8x8x32xf32> to vector<8x32xf32>
    %154 = vector.shape_cast %153 : vector<8x32xf32> to vector<8x1x32xf32>
    %cst_70 = arith.constant 1.250000e-01 : f32
    %155 = vector.broadcast %cst_70 : f32 to vector<8x1x32xf32>
    %156 = arith.mulf %151, %155 : vector<8x1x32xf32>
    %cst_71 = arith.constant 1.250000e-01 : f32
    %157 = vector.broadcast %cst_71 : f32 to vector<8x1x32xf32>
    %158 = arith.mulf %154, %157 : vector<8x1x32xf32>
    %159 = arith.mulf %156, %156 : vector<8x1x32xf32>
    %160 = arith.subf %158, %159 : vector<8x1x32xf32>
    %cst_72 = arith.constant 0.000000e+00 : f32
    %161 = vector.broadcast %cst_72 : f32 to vector<8x1x32xf32>
    %162 = arith.maximumf %160, %161 : vector<8x1x32xf32>
    %cst_73 = arith.constant 9.99999974E-6 : f32
    %163 = vector.broadcast %cst_73 : f32 to vector<8x1x32xf32>
    %164 = arith.addf %162, %163 : vector<8x1x32xf32>
    %165 = math.rsqrt %164 : vector<8x1x32xf32>
    %166 = vector.shape_cast %146 : vector<1x32xf32> to vector<1x1x32xf32>
    %167 = vector.broadcast %166 : vector<1x1x32xf32> to vector<8x1x32xf32>
    %168 = arith.mulf %167, %165 : vector<8x1x32xf32>
    %169 = arith.mulf %156, %168 : vector<8x1x32xf32>
    %170 = vector.shape_cast %147 : vector<1x32xf32> to vector<1x1x32xf32>
    %171 = vector.broadcast %170 : vector<1x1x32xf32> to vector<8x1x32xf32>
    %172 = arith.subf %171, %169 : vector<8x1x32xf32>
    %173 = vector.broadcast %168 : vector<8x1x32xf32> to vector<8x8x32xf32>
    %174 = arith.mulf %149, %173 : vector<8x8x32xf32>
    %175 = vector.broadcast %172 : vector<8x1x32xf32> to vector<8x8x32xf32>
    %176 = arith.addf %174, %175 : vector<8x8x32xf32>
    %cst_74 = arith.constant 0.000000e+00 : f32
    %177 = vector.broadcast %cst_74 : f32 to vector<8x8x32xf32>
    %178 = arith.maximumf %176, %177 : vector<8x8x32xf32>
    %179 = vector.shape_cast %178 : vector<8x8x32xf32> to vector<64x32xf32>
    %c0_75 = arith.constant 0 : index
    %c0_76 = arith.constant 0 : index
    %180 = vector.load %arg17[%c0_75, %c0_76] : memref<32x64xf32, #tpu.memory_space<vmem>>, vector<32x64xf32>
    %c0_77 = arith.constant 0 : index
    %c0_78 = arith.constant 0 : index
    %181 = vector.load %arg18[%c0_77, %c0_78] : memref<1x64xf32, #tpu.memory_space<vmem>>, vector<1x64xf32>
    %c0_79 = arith.constant 0 : index
    %c0_80 = arith.constant 0 : index
    %182 = vector.load %arg19[%c0_79, %c0_80] : memref<1x64xf32, #tpu.memory_space<vmem>>, vector<1x64xf32>
    %cst_81 = arith.constant dense<0.000000e+00> : vector<64x64xf32>
    %183 = tpu.matmul %179, %180, %cst_81 {dimension_numbers = #tpu.dot_dimension_numbers<[1], [0], [0], [1], [0, 0, 1, 1], [], []>} : vector<64x32xf32>, vector<32x64xf32>, vector<64x64xf32> -> vector<64x64xf32>
    %184 = vector.shape_cast %183 : vector<64x64xf32> to vector<8x8x64xf32>
    %cst_82 = arith.constant dense<0.000000e+00> : vector<8x64xf32>
    %185 = vector.multi_reduction <add>, %184, %cst_82 [1] : vector<8x8x64xf32> to vector<8x64xf32>
    %186 = vector.shape_cast %185 : vector<8x64xf32> to vector<8x1x64xf32>
    %187 = arith.mulf %184, %184 : vector<8x8x64xf32>
    %cst_83 = arith.constant dense<0.000000e+00> : vector<8x64xf32>
    %188 = vector.multi_reduction <add>, %187, %cst_83 [1] : vector<8x8x64xf32> to vector<8x64xf32>
    %189 = vector.shape_cast %188 : vector<8x64xf32> to vector<8x1x64xf32>
    %cst_84 = arith.constant 1.250000e-01 : f32
    %190 = vector.broadcast %cst_84 : f32 to vector<8x1x64xf32>
    %191 = arith.mulf %186, %190 : vector<8x1x64xf32>
    %cst_85 = arith.constant 1.250000e-01 : f32
    %192 = vector.broadcast %cst_85 : f32 to vector<8x1x64xf32>
    %193 = arith.mulf %189, %192 : vector<8x1x64xf32>
    %194 = arith.mulf %191, %191 : vector<8x1x64xf32>
    %195 = arith.subf %193, %194 : vector<8x1x64xf32>
    %cst_86 = arith.constant 0.000000e+00 : f32
    %196 = vector.broadcast %cst_86 : f32 to vector<8x1x64xf32>
    %197 = arith.maximumf %195, %196 : vector<8x1x64xf32>
    %cst_87 = arith.constant 9.99999974E-6 : f32
    %198 = vector.broadcast %cst_87 : f32 to vector<8x1x64xf32>
    %199 = arith.addf %197, %198 : vector<8x1x64xf32>
    %200 = math.rsqrt %199 : vector<8x1x64xf32>
    %201 = vector.shape_cast %181 : vector<1x64xf32> to vector<1x1x64xf32>
    %202 = vector.broadcast %201 : vector<1x1x64xf32> to vector<8x1x64xf32>
    %203 = arith.mulf %202, %200 : vector<8x1x64xf32>
    %204 = arith.mulf %191, %203 : vector<8x1x64xf32>
    %205 = vector.shape_cast %182 : vector<1x64xf32> to vector<1x1x64xf32>
    %206 = vector.broadcast %205 : vector<1x1x64xf32> to vector<8x1x64xf32>
    %207 = arith.subf %206, %204 : vector<8x1x64xf32>
    %208 = vector.broadcast %203 : vector<8x1x64xf32> to vector<8x8x64xf32>
    %209 = arith.mulf %184, %208 : vector<8x8x64xf32>
    %210 = vector.broadcast %207 : vector<8x1x64xf32> to vector<8x8x64xf32>
    %211 = arith.addf %209, %210 : vector<8x8x64xf32>
    %cst_88 = arith.constant 0.000000e+00 : f32
    %212 = vector.broadcast %cst_88 : f32 to vector<8x8x64xf32>
    %213 = arith.maximumf %211, %212 : vector<8x8x64xf32>
    %214 = vector.shape_cast %213 : vector<8x8x64xf32> to vector<64x64xf32>
    %c0_89 = arith.constant 0 : index
    %c0_90 = arith.constant 0 : index
    %215 = vector.load %arg20[%c0_89, %c0_90] : memref<64x128xf32, #tpu.memory_space<vmem>>, vector<64x128xf32>
    %c0_91 = arith.constant 0 : index
    %c0_92 = arith.constant 0 : index
    %216 = vector.load %arg21[%c0_91, %c0_92] : memref<1x128xf32, #tpu.memory_space<vmem>>, vector<1x128xf32>
    %c0_93 = arith.constant 0 : index
    %c0_94 = arith.constant 0 : index
    %217 = vector.load %arg22[%c0_93, %c0_94] : memref<1x128xf32, #tpu.memory_space<vmem>>, vector<1x128xf32>
    %cst_95 = arith.constant dense<0.000000e+00> : vector<64x128xf32>
    %218 = tpu.matmul %214, %215, %cst_95 {dimension_numbers = #tpu.dot_dimension_numbers<[1], [0], [0], [1], [0, 0, 1, 1], [], []>} : vector<64x64xf32>, vector<64x128xf32>, vector<64x128xf32> -> vector<64x128xf32>
    %219 = vector.shape_cast %218 : vector<64x128xf32> to vector<8x8x128xf32>
    %cst_96 = arith.constant dense<0.000000e+00> : vector<8x128xf32>
    %220 = vector.multi_reduction <add>, %219, %cst_96 [1] : vector<8x8x128xf32> to vector<8x128xf32>
    %221 = vector.shape_cast %220 : vector<8x128xf32> to vector<8x1x128xf32>
    %222 = arith.mulf %219, %219 : vector<8x8x128xf32>
    %cst_97 = arith.constant dense<0.000000e+00> : vector<8x128xf32>
    %223 = vector.multi_reduction <add>, %222, %cst_97 [1] : vector<8x8x128xf32> to vector<8x128xf32>
    %224 = vector.shape_cast %223 : vector<8x128xf32> to vector<8x1x128xf32>
    %cst_98 = arith.constant 1.250000e-01 : f32
    %225 = vector.broadcast %cst_98 : f32 to vector<8x1x128xf32>
    %226 = arith.mulf %221, %225 : vector<8x1x128xf32>
    %cst_99 = arith.constant 1.250000e-01 : f32
    %227 = vector.broadcast %cst_99 : f32 to vector<8x1x128xf32>
    %228 = arith.mulf %224, %227 : vector<8x1x128xf32>
    %229 = arith.mulf %226, %226 : vector<8x1x128xf32>
    %230 = arith.subf %228, %229 : vector<8x1x128xf32>
    %cst_100 = arith.constant 0.000000e+00 : f32
    %231 = vector.broadcast %cst_100 : f32 to vector<8x1x128xf32>
    %232 = arith.maximumf %230, %231 : vector<8x1x128xf32>
    %cst_101 = arith.constant 9.99999974E-6 : f32
    %233 = vector.broadcast %cst_101 : f32 to vector<8x1x128xf32>
    %234 = arith.addf %232, %233 : vector<8x1x128xf32>
    %235 = math.rsqrt %234 : vector<8x1x128xf32>
    %236 = vector.shape_cast %216 : vector<1x128xf32> to vector<1x1x128xf32>
    %237 = vector.broadcast %236 : vector<1x1x128xf32> to vector<8x1x128xf32>
    %238 = arith.mulf %237, %235 : vector<8x1x128xf32>
    %239 = arith.mulf %226, %238 : vector<8x1x128xf32>
    %240 = vector.shape_cast %217 : vector<1x128xf32> to vector<1x1x128xf32>
    %241 = vector.broadcast %240 : vector<1x1x128xf32> to vector<8x1x128xf32>
    %242 = arith.subf %241, %239 : vector<8x1x128xf32>
    %243 = vector.broadcast %238 : vector<8x1x128xf32> to vector<8x8x128xf32>
    %244 = arith.mulf %219, %243 : vector<8x8x128xf32>
    %245 = vector.broadcast %242 : vector<8x1x128xf32> to vector<8x8x128xf32>
    %246 = arith.addf %244, %245 : vector<8x8x128xf32>
    %cst_102 = arith.constant 0.000000e+00 : f32
    %247 = vector.broadcast %cst_102 : f32 to vector<8x8x128xf32>
    %248 = arith.maximumf %246, %247 : vector<8x8x128xf32>
    %249 = vector.shape_cast %248 : vector<8x8x128xf32> to vector<64x128xf32>
    %c0_103 = arith.constant 0 : index
    %c0_104 = arith.constant 0 : index
    %250 = vector.load %arg23[%c0_103, %c0_104] : memref<128x640xbf16, #tpu.memory_space<vmem>>, vector<128x640xbf16>
    %c0_105 = arith.constant 0 : index
    %c0_106 = arith.constant 0 : index
    %251 = vector.load %arg24[%c0_105, %c0_106] : memref<1x640xf32, #tpu.memory_space<vmem>>, vector<1x640xf32>
    %252 = arith.truncf %249 : vector<64x128xf32> to vector<64x128xbf16>
    %cst_107 = arith.constant dense<0.000000e+00> : vector<64x640xf32>
    %253 = tpu.matmul %252, %250, %cst_107 {dimension_numbers = #tpu.dot_dimension_numbers<[1], [0], [0], [1], [0, 0, 1, 1], [], []>} : vector<64x128xbf16>, vector<128x640xbf16>, vector<64x640xf32> -> vector<64x640xf32>
    %254 = vector.broadcast %251 : vector<1x640xf32> to vector<64x640xf32>
    %255 = arith.addf %253, %254 : vector<64x640xf32>
    %c0_108 = arith.constant 0 : index
    %c0_109 = arith.constant 0 : index
    %256 = vector.load %arg25[%c0_108, %c0_109] : memref<64x640xf32, #tpu.memory_space<vmem>>, vector<64x640xf32>
    tpu.vector_store %arg25[%c0_108, %c0_109], %255 {strides = array<i32>} : memref<64x640xf32, #tpu.memory_space<vmem>>, vector<64x640xf32>,
    return
  }
  func.func @transform_0(%arg0: i32) -> (i32, i32) {
    %c0_i32 = arith.constant 0 : i32
    %c0_i32_0 = arith.constant 0 : i32
    return %arg0, %c0_i32 : i32, i32
  }
  func.func @transform_1(%arg0: i32) -> (i32, i32) {
    %c0_i32 = arith.constant 0 : i32
    %c0_i32_0 = arith.constant 0 : i32
    %c0_i32_1 = arith.constant 0 : i32
    return %c0_i32, %c0_i32_0 : i32, i32
  }
  func.func @transform_2(%arg0: i32) -> (i32, i32) {
    %c0_i32 = arith.constant 0 : i32
    %c0_i32_0 = arith.constant 0 : i32
    %c0_i32_1 = arith.constant 0 : i32
    return %c0_i32, %c0_i32_0 : i32, i32
  }
  func.func @transform_3(%arg0: i32) -> (i32, i32) {
    %c0_i32 = arith.constant 0 : i32
    %c0_i32_0 = arith.constant 0 : i32
    %c0_i32_1 = arith.constant 0 : i32
    return %c0_i32, %c0_i32_0 : i32, i32
  }
  func.func @transform_4(%arg0: i32) -> (i32, i32) {
    %c0_i32 = arith.constant 0 : i32
    %c0_i32_0 = arith.constant 0 : i32
    %c0_i32_1 = arith.constant 0 : i32
    return %c0_i32, %c0_i32_0 : i32, i32
  }
  func.func @transform_5(%arg0: i32) -> (i32, i32) {
    %c0_i32 = arith.constant 0 : i32
    %c0_i32_0 = arith.constant 0 : i32
    %c0_i32_1 = arith.constant 0 : i32
    return %c0_i32, %c0_i32_0 : i32, i32
  }
  func.func @transform_6(%arg0: i32) -> (i32, i32) {
    %c0_i32 = arith.constant 0 : i32
    %c0_i32_0 = arith.constant 0 : i32
    %c0_i32_1 = arith.constant 0 : i32
    return %c0_i32, %c0_i32_0 : i32, i32
  }
  func.func @transform_7(%arg0: i32) -> (i32, i32) {
    %c0_i32 = arith.constant 0 : i32
    %c0_i32_0 = arith.constant 0 : i32
    %c0_i32_1 = arith.constant 0 : i32
    return %c0_i32, %c0_i32_0 : i32, i32
  }
  func.func @transform_8(%arg0: i32) -> (i32, i32) {
    %c0_i32 = arith.constant 0 : i32
    %c0_i32_0 = arith.constant 0 : i32
    %c0_i32_1 = arith.constant 0 : i32
    return %c0_i32, %c0_i32_0 : i32, i32
  }
  func.func @transform_9(%arg0: i32) -> (i32, i32) {
    %c0_i32 = arith.constant 0 : i32
    %c0_i32_0 = arith.constant 0 : i32
    %c0_i32_1 = arith.constant 0 : i32
    return %c0_i32, %c0_i32_0 : i32, i32
  }
  func.func @transform_10(%arg0: i32) -> (i32, i32) {
    %c0_i32 = arith.constant 0 : i32
    %c0_i32_0 = arith.constant 0 : i32
    %c0_i32_1 = arith.constant 0 : i32
    return %c0_i32, %c0_i32_0 : i32, i32
  }
  func.func @transform_11(%arg0: i32) -> (i32, i32) {
    %c0_i32 = arith.constant 0 : i32
    %c0_i32_0 = arith.constant 0 : i32
    %c0_i32_1 = arith.constant 0 : i32
    return %c0_i32, %c0_i32_0 : i32, i32
  }
  func.func @transform_12(%arg0: i32) -> (i32, i32) {
    %c0_i32 = arith.constant 0 : i32
    %c0_i32_0 = arith.constant 0 : i32
    %c0_i32_1 = arith.constant 0 : i32
    return %c0_i32, %c0_i32_0 : i32, i32
  }
  func.func @transform_13(%arg0: i32) -> (i32, i32) {
    %c0_i32 = arith.constant 0 : i32
    %c0_i32_0 = arith.constant 0 : i32
    %c0_i32_1 = arith.constant 0 : i32
    return %c0_i32, %c0_i32_0 : i32, i32
  }
  func.func @transform_14(%arg0: i32) -> (i32, i32) {
    %c0_i32 = arith.constant 0 : i32
    %c0_i32_0 = arith.constant 0 : i32
    %c0_i32_1 = arith.constant 0 : i32
    return %c0_i32, %c0_i32_0 : i32, i32
  }
  func.func @transform_15(%arg0: i32) -> (i32, i32) {
    %c0_i32 = arith.constant 0 : i32
    %c0_i32_0 = arith.constant 0 : i32
    %c0_i32_1 = arith.constant 0 : i32
    return %c0_i32, %c0_i32_0 : i32, i32
  }
  func.func @transform_16(%arg0: i32) -> (i32, i32) {
    %c0_i32 = arith.constant 0 : i32
    %c0_i32_0 = arith.constant 0 : i32
    %c0_i32_1 = arith.constant 0 : i32
    return %c0_i32, %c0_i32_0 : i32, i32
  }
  func.func @transform_17(%arg0: i32) -> (i32, i32) {
    %c0_i32 = arith.constant 0 : i32
    %c0_i32_0 = arith.constant 0 : i32
    %c0_i32_1 = arith.constant 0 : i32
    return %c0_i32, %c0_i32_0 : i32, i32
  }
  func.func @transform_18(%arg0: i32) -> (i32, i32) {
    %c0_i32 = arith.constant 0 : i32
    %c0_i32_0 = arith.constant 0 : i32
    %c0_i32_1 = arith.constant 0 : i32
    return %c0_i32, %c0_i32_0 : i32, i32
  }
  func.func @transform_19(%arg0: i32) -> (i32, i32) {
    %c0_i32 = arith.constant 0 : i32
    %c0_i32_0 = arith.constant 0 : i32
    %c0_i32_1 = arith.constant 0 : i32
    return %c0_i32, %c0_i32_0 : i32, i32
  }
  func.func @transform_20(%arg0: i32) -> (i32, i32) {
    %c0_i32 = arith.constant 0 : i32
    %c0_i32_0 = arith.constant 0 : i32
    %c0_i32_1 = arith.constant 0 : i32
    return %c0_i32, %c0_i32_0 : i32, i32
  }
  func.func @transform_21(%arg0: i32) -> (i32, i32) {
    %c0_i32 = arith.constant 0 : i32
    %c0_i32_0 = arith.constant 0 : i32
    %c0_i32_1 = arith.constant 0 : i32
    return %c0_i32, %c0_i32_0 : i32, i32
  }
  func.func @transform_22(%arg0: i32) -> (i32, i32) {
    %c0_i32 = arith.constant 0 : i32
    %c0_i32_0 = arith.constant 0 : i32
    %c0_i32_1 = arith.constant 0 : i32
    return %c0_i32, %c0_i32_0 : i32, i32
  }
  func.func @transform_23(%arg0: i32) -> (i32, i32) {
    %c0_i32 = arith.constant 0 : i32
    %c0_i32_0 = arith.constant 0 : i32
    %c0_i32_1 = arith.constant 0 : i32
    return %c0_i32, %c0_i32_0 : i32, i32
  }
  func.func @transform_24(%arg0: i32) -> (i32, i32) {
    %c0_i32 = arith.constant 0 : i32
    %c0_i32_0 = arith.constant 0 : i32
    return %arg0, %c0_i32 : i32, i32
  }
  func.func @transform_25(%arg0: i32) -> (i32, i32) {
    %c0_i32 = arith.constant 0 : i32
    %c0_i32_0 = arith.constant 0 : i32
    return %arg0, %c0_i32 : i32, i32
  }
}

</mosaic_0001>

<bundles_post_ra>
// kernel: tpu_custom_call.1
= control target key start
LH: loop header
LB: loop body
LE: loop exit
PB: predicated region body
PF: predicated region fallthrough
CT: control target
= control target key end

     0   :  { %s8591_s0 = inlined_call_operand.hbm [shape: f32[128,640], index: 0, kind: input, shape index: {}]   ;;  %s8592_s1 = inlined_call_operand.vmem [shape: bf16[640,128], index: 1, kind: input, shape index: {}]   ;;  %s8593_s2 = inlined_call_operand.vmem [shape: f32[1,128], index: 2, kind: input, shape index: {}]   ;;  %s8594_s3 = inlined_call_operand.vmem [shape: f32[1,128], index: 3, kind: input, shape index: {}]   ;;  %s8595_s4 = inlined_call_operand.vmem [shape: f32[128,64], index: 4, kind: input, shape index: {}]   ;;  %s8596_s5 = inlined_call_operand.vmem [shape: f32[1,64], index: 5, kind: input, shape index: {}]   ;;  %s8597_s6 = inlined_call_operand.vmem [shape: f32[1,64], index: 6, kind: input, shape index: {}]   ;;  %s8598_s7 = inlined_call_operand.vmem [shape: f32[64,32], index: 7, kind: input, shape index: {}]   ;;  %s8599_s8 = inlined_call_operand.vmem [shape: f32[1,32], index: 8, kind: input, shape index: {}]   ;;  %s8600_s9 = inlined_call_operand.hbm [shape: f32[1,32], index: 9, kind: input, shape index: {}]   ;;  %s8601_s10 = inlined_call_operand.vmem [shape: f32[32,16], index: 10, kind: input, shape index: {}]   ;;  %s8602_s11 = inlined_call_operand.hbm [shape: f32[1,16], index: 11, kind: input, shape index: {}]   ;;  %s8603_s12 = inlined_call_operand.hbm [shape: f32[1,16], index: 12, kind: input, shape index: {}]   ;;  %s8604_s13 = inlined_call_operand.hbm [shape: f32[16,32], index: 13, kind: input, shape index: {}]   ;;  %s8605_s14 = inlined_call_operand.hbm [shape: f32[1,32], index: 14, kind: input, shape index: {}]   ;;  %s8606_s15 = inlined_call_operand.hbm [shape: f32[1,32], index: 15, kind: input, shape index: {}]   ;;  %s8607_s16 = inlined_call_operand.hbm [shape: f32[32,64], index: 16, kind: input, shape index: {}]   ;;  %s8608_s17 = inlined_call_operand.vmem [shape: f32[1,64], index: 17, kind: input, shape index: {}]   ;;  %s8609_s18 = inlined_call_operand.vmem [shape: f32[1,64], index: 18, kind: input, shape index: {}]   ;;  %s8610_s19 = inlined_call_operand.vmem [shape: f32[64,128], index: 19, kind: input, shape index: {}]   ;;  %s8611_s20 = inlined_call_operand.vmem [shape: f32[1,128], index: 20, kind: input, shape index: {}]   ;;  %s8612_s21 = inlined_call_operand.vmem [shape: f32[1,128], index: 21, kind: input, shape index: {}]   ;;  %s8613_s22 = inlined_call_operand.hbm [shape: bf16[128,640], index: 22, kind: input, shape index: {}]   ;;  %s8614_s23 = inlined_call_operand.vmem [shape: f32[1,640], index: 23, kind: input, shape index: {}]   ;;  %s8615_s24 = inlined_call_operand.hbm [shape: f32[128,640], index: 24, kind: output, shape index: {0}]   ;;  %s8616_s25 = inlined_call_operand.hbm [shape: f32[128,128], index: 25, kind: output, shape index: {1}]  }
   0x1   :  { %8632 = sst [smem:[#allocation27_spill]] %s8591_s0 }
   0x2   :  { %8633 = sst [smem:[#allocation28_spill]] %s8592_s1 }
   0x3   :  { %8634 = sst [smem:[#allocation29_spill]] %s8593_s2 }
   0x4   :  { %8635 = sst [smem:[#allocation30_spill]] %s8594_s3 }
   0x5   :  { %8636 = sst [smem:[#allocation31_spill]] %s8595_s4 }
   0x6   :  { %8637 = sst [smem:[#allocation32_spill]] %s8596_s5 }
   0x7   :  { %8638 = sst [smem:[#allocation33_spill]] %s8597_s6 }
   0x8   :  { %8639 = sst [smem:[#allocation34_spill]] %s8598_s7 }
   0x9   :  { %8640 = sst [smem:[#allocation35_spill]] %s8599_s8 }
   0xa   :  { %8641 = sst [smem:[#allocation36_spill]] %s8600_s9 }
   0xb   :  { %8642 = sst [smem:[#allocation37_spill]] %s8602_s11 }
   0xc   :  { %8643 = sst [smem:[#allocation38_spill]] %s8603_s12 }
   0xd   :  { %8644 = sst [smem:[#allocation39_spill]] %s8604_s13 }
   0xe   :  { %8645 = sst [smem:[#allocation40_spill]] %s8605_s14 }
   0xf   :  { %8646 = sst [smem:[#allocation41_spill]] %s8609_s18 }
  0x10   :  { %8647 = sst [smem:[#allocation42_spill]] %s8611_s20 }
  0x11   :  { %8648 = sst [smem:[#allocation43_spill]] %s8612_s21 }
  0x12   :  { %8649 = sst [smem:[#allocation44_spill]] %s8614_s23 }
  0x13   :  { %8650 = sst [smem:[#allocation45_spill]] %s8615_s24 }
  0x14   :  { %8651 = sst [smem:[#allocation46_spill]] %s8616_s25 }
  0x15   :  { %31 = vsyncpa [#allocation3], 0 }
  0x16   :  { %33 = vsyncpa [#allocation3 + $0x1], 0 }
  0x17   :  { %34 = vsyncpa [#allocation6], 0 }
  0x18   :  { %35 = vsyncpa [#allocation9], 0 }
  0x19   :  { %36 = vsyncpa [#allocation12], 0 }
  0x1a   :  { %37 = vsyncpa [#allocation15], 0 }
  0x1b   :  { %38 = vsyncpa [#allocation4], 0 }
  0x1c   :  { %40 = vsyncpa [#allocation4 + $0x1], 0 }
  0x1d   :  { %41 = vsyncpa [#allocation19], 0 }
  0x1e   :  { %43 = vsyncpa [#allocation19 + $0x1], 0  ;;  %s6782_s29 = smov 0   ;;  %s6784_s2 = smov 0  }
  0x1f   :  { %s6786_s6 = smov 0   ;;  %s6788_s30 = smov 0  }
  0x20 LB: > { %s6629_s7 = smov [#allocation5]   ;;  %s6803_s26 = sadd.s32 4294967295, %s6627_s30   ;;  %s6627_s30 = sphi %s6788_s30, %s8699_s30   ;;  %s6623_s6 = sphi %s6786_s6, %s8698_s6   ;;  %s6619_s2 = sphi %s6784_s2, %s8697_s2   ;;  %s6615_s29 = sphi %s6782_s29, %s8696_s29  }
  0x21   : > { %s652_s3 = sshll.u32 %s6629_s7, 4  ;;  %p5269_p0 = scmp.ge.s32.totalorder %s6627_s30, 1  ;;  %s6808_s3 = int_to_ptr.vmem [resolvable:$true] %s652_s3 }
  0x22   : > { %p8625_p1 = scmp.eq.s32.totalorder %s6803_s26, 0  ;;  %p615_p2 = scmp.lt.s32.totalorder %s6627_s30, 3 }
  0x23   : > { %s6630_s8 = smov [#allocation8]   ;;  %s6631_s4 = smov [#allocation11]  }
  0x24   : > { %p6810_p3 = pnand %p5269_p0, %p615_p2  ;;  %s677_s27 = sshll.u32 %s6630_s8, 4  ;;  %s6817_s27 = int_to_ptr.vmem [resolvable:$true] %s677_s27 }
  0x25   : > { %s701_s28 = sshll.u32 %s6631_s4, 4  ;;  %s8654_s7 = sld [smem:[#allocation36_spill]]  ;;  %s6825_s28 = int_to_ptr.vmem [resolvable:$true] %s701_s28 }
  0x26   : > { %s8652_s1 = scalar_select %p6810_p3, 1, 0 }
  0x27   : > { %p5945_p5 = pneg %p6810_p3 }
  0x29   : > { %p6821_p6 = pnand %p5945_p5, %p8625_p1 }
  0x2b   : > { %s6259_s24 = scalar_lea.hbm %s8654_s7, 16  ;;  %p6835_p8 = pneg %p6821_p6 }
  0x2c   : > { %p6260_p7 = scmp.ne.s32.totalorder %s8654_s7, %s6259_s24  ;;  %p6266_p11 = scmp.lt.u32.totalorder %s6259_s24, %s8654_s7 }
  0x2e   : > { %p6262_p9 = pnand %p6835_p8, %p6260_p7 }
  0x30   : > { %p6263_p10 = pneg %p6262_p9 }
  0x32   : > { %p6268_p12 = pnand %p6266_p11, %p6263_p10 }
  0x34   : > { %6271 = shalt.err (!%p6268_p12)
}
  0x35   : > { %s6272_s23 = scalar_lea.vmem %s6808_s3, 16  ;;  %s6279_s25 = scalar_lea.vmem %s6808_s3, 32 }
  0x36   : > { %p6273_p13 = scmp.ne.s32.totalorder %s6808_s3, %s6272_s23  ;;  %p6280_p5 = scmp.lt.s32.totalorder %s6808_s3, %s6808_s3 }
  0x37   : > { %p6281_p7 = scmp.lt.s32.totalorder %s6279_s25, %s6272_s23 }
  0x38   : > { %p6275_p0 = pnand %p6273_p13, %p6835_p8 }
  0x39   : > { %p6282_p9 = por %p6281_p7, %p6280_p5 }
  0x3a   : > { %p6276_p2 = pneg %p6275_p0 }
  0x3c   : > { %p6283_p4 = pnand %p6282_p9, %p6276_p2 }
  0x3e   : > { %6286 = shalt.err (!%p6283_p4)
}
  0x3f   : > { %5948 = dma.hbm_to_vmem [thread:$0]  (!%p6821_p6), %s8654_s7, 16, %s6808_s3, [#allocation6]  }
  0x40   : > { %s8656_s12 = sld [smem:[#allocation38_spill]] }
  0x46   : > { %s6287_s4 = scalar_lea.hbm %s8656_s12, 16 }
  0x47   : > { %p6288_p10 = scmp.ne.s32.totalorder %s8656_s12, %s6287_s4  ;;  %p6294_p4 = scmp.lt.u32.totalorder %s6287_s4, %s8656_s12 }
  0x49   : > { %p6290_p11 = pnand %p6288_p10, %p6835_p8 }
  0x4b   : > { %p6291_p12 = pneg %p6290_p11 }
  0x4d   : > { %p6296_p13 = pnand %p6294_p4, %p6291_p12 }
  0x4f   : > { %6299 = shalt.err (!%p6296_p13)
}
  0x50   : > { %s6300_s3 = scalar_lea.vmem %s6817_s27, 16  ;;  %s6307_s18 = scalar_lea.vmem %s6817_s27, 32 }
  0x51   : > { %p6301_p0 = scmp.ne.s32.totalorder %s6817_s27, %s6300_s3  ;;  %p6308_p7 = scmp.lt.s32.totalorder %s6817_s27, %s6817_s27 }
  0x52   : > { %p6309_p9 = scmp.lt.s32.totalorder %s6307_s18, %s6300_s3 }
  0x53   : > { %p6303_p2 = pnand %p6301_p0, %p6835_p8 }
  0x54   : > { %p6310_p10 = por %p6309_p9, %p6308_p7 }
  0x55   : > { %p6304_p5 = pneg %p6303_p2 }
  0x57   : > { %p6311_p11 = pnand %p6310_p10, %p6304_p5 }
  0x59   : > { %6314 = shalt.err (!%p6311_p11)
}
  0x5a   : > { %5954 = dma.hbm_to_vmem [thread:$0]  (!%p6821_p6), %s8656_s12, 16, %s6817_s27, [#allocation9]  }
  0x5b   : > { %s8657_s14 = sld [smem:[#allocation40_spill]] }
  0x61   : > { %s6315_s0 = scalar_lea.hbm %s8657_s14, 16 }
  0x62   : > { %p6316_p12 = scmp.ne.s32.totalorder %s8657_s14, %s6315_s0  ;;  %p6322_p0 = scmp.lt.u32.totalorder %s6315_s0, %s8657_s14 }
  0x64   : > { %p6318_p4 = pnand %p6316_p12, %p6835_p8 }
  0x66   : > { %p6319_p13 = pneg %p6318_p4 }
  0x68   : > { %p6324_p2 = pnand %p6322_p0, %p6319_p13 }
  0x6a   : > { %6327 = shalt.err (!%p6324_p2)
}
  0x6b   : > { %s6328_s27 = scalar_lea.vmem %s6825_s28, 16  ;;  %s6335_s18 = scalar_lea.vmem %s6825_s28, 32 }
  0x6c   : > { %p6329_p5 = scmp.ne.s32.totalorder %s6825_s28, %s6328_s27  ;;  %p6336_p10 = scmp.lt.s32.totalorder %s6825_s28, %s6825_s28 }
  0x6d   : > { %p6337_p11 = scmp.lt.s32.totalorder %s6335_s18, %s6328_s27 }
  0x6e   : > { %p6331_p7 = pnand %p6329_p5, %p6835_p8 }
  0x6f   : > { %p6338_p12 = por %p6337_p11, %p6336_p10 }
  0x70   : > { %p6332_p9 = pneg %p6331_p7 }
  0x72   : > { %p6339_p4 = pnand %p6338_p12, %p6332_p9 }
  0x74   : > { %6342 = shalt.err (!%p6339_p4)
}
  0x75   : > { %5960 = dma.hbm_to_vmem [thread:$0]  (!%p6821_p6), %s8657_s14, 16, %s6825_s28, [#allocation12]  }
  0x76   : > { %s6632_s24 = smov [#allocation14]   ;;  %s6633_s0 = smov [#allocation7]  }
  0x77   : > { %s722_s5 = sshll.u32 %s6632_s24, 4  ;;  %s666_s4 = sshll.u32 %s6633_s0, 4  ;;  %s723_s5 = int_to_ptr.vmem [resolvable:$true] %s722_s5  ;;  %s667_s4 = int_to_ptr.vmem [resolvable:$true] %s666_s4 }
  0x78   : > { %s6343_s3 = scalar_lea.hbm %s8607_s16, 512 }
  0x79   : > { %p6344_p13 = scmp.ne.s32.totalorder %s8607_s16, %s6343_s3  ;;  %p6350_p5 = scmp.lt.u32.totalorder %s6343_s3, %s8607_s16 }
  0x7b   : > { %p6346_p0 = pnand %p6344_p13, %p6835_p8 }
  0x7d   : > { %p6347_p2 = pneg %p6346_p0 }
  0x7f   : > { %p6352_p7 = pnand %p6350_p5, %p6347_p2 }
  0x81   : > { %6355 = shalt.err (!%p6352_p7)
}
  0x82   : > { %s6356_s28 = scalar_lea.vmem %s723_s5, 512  ;;  %p6364_p12 = scmp.lt.s32.totalorder %s723_s5, %s723_s5 }
  0x83   : > { %p6357_p9 = scmp.ne.s32.totalorder %s723_s5, %s6356_s28  ;;  %p6365_p4 = scmp.lt.s32.totalorder %s6356_s28, %s6356_s28 }
  0x85   : > { %p6359_p10 = pnand %p6357_p9, %p6835_p8  ;;  %p6366_p1 = por %p6365_p4, %p6364_p12 }
  0x87   : > { %p6360_p11 = pneg %p6359_p10 }
  0x89   : > { %p6367_p3 = pnand %p6366_p1, %p6360_p11 }
  0x8b   : > { %6370 = shalt.err (!%p6367_p3)
}
  0x8c   : > { %s8627_s21 = smov 128   ;;  %s8628_s24 = smov 8  }
  0x8d   : > { %5966 = dma.hbm_to_vmem [thread:$0]  (!%p6821_p6), %s8607_s16, 512, %s723_s5, [#allocation15], %s8627_s21, %s8627_s21, %s8628_s24  }
  0x8e   : > { %s8658_s11 = sld [smem:[#allocation37_spill]] }
  0x94   : > { %s6371_s3 = scalar_lea.hbm %s8658_s11, 16 }
  0x95   : > { %p6372_p1 = scmp.ne.s32.totalorder %s8658_s11, %s6371_s3  ;;  %p6378_p0 = scmp.lt.u32.totalorder %s6371_s3, %s8658_s11 }
  0x97   : > { %p6374_p3 = pnand %p6372_p1, %p6835_p8 }
  0x99   : > { %p6375_p13 = pneg %p6374_p3 }
  0x9b   : > { %p6380_p2 = pnand %p6378_p0, %p6375_p13 }
  0x9d   : > { %6383 = shalt.err (!%p6380_p2)
}
  0x9e   : > { %s6384_s7 = scalar_lea.vmem %s667_s4, 16  ;;  %s6391_s5 = scalar_lea.vmem %s667_s4, 32 }
  0x9f   : > { %p6385_p5 = scmp.ne.s32.totalorder %s667_s4, %s6384_s7  ;;  %p6392_p10 = scmp.lt.s32.totalorder %s667_s4, %s667_s4 }
  0xa0   : > { %p6393_p11 = scmp.lt.s32.totalorder %s6391_s5, %s6384_s7 }
  0xa1   : > { %p6387_p7 = pnand %p6385_p5, %p6835_p8 }
  0xa2   : > { %p6394_p12 = por %p6393_p11, %p6392_p10 }
  0xa3   : > { %p6388_p9 = pneg %p6387_p7 }
  0xa5   : > { %p6395_p4 = pnand %p6394_p12, %p6388_p9 }
  0xa7   : > { %6398 = shalt.err (!%p6395_p4)
}
  0xa8   : > { %5951 = dma.hbm_to_vmem [thread:$0]  (!%p6821_p6), %s8658_s11, 16, %s667_s4, [#allocation6]  }
  0xa9   : > { %s6636_s25 = smov [#allocation10]   ;;  %s6637_s27 = smov [#allocation13]  }
  0xaa   : > { %s687_s3 = sshll.u32 %s6636_s25, 4  ;;  %s712_s18 = sshll.u32 %s6637_s27, 4  ;;  %s688_s3 = int_to_ptr.vmem [resolvable:$true] %s687_s3  ;;  %s713_s18 = int_to_ptr.vmem [resolvable:$true] %s712_s18 }
  0xab   : > { %s8659_s13 = sld [smem:[#allocation39_spill]] }
  0xb1   : > { %s6399_s21 = scalar_lea.hbm %s8659_s13, 256 }
  0xb2   : > { %p6400_p1 = scmp.ne.s32.totalorder %s8659_s13, %s6399_s21  ;;  %p6406_p0 = scmp.lt.u32.totalorder %s6399_s21, %s8659_s13 }
  0xb4   : > { %p6402_p3 = pnand %p6400_p1, %p6835_p8 }
  0xb6   : > { %p6403_p13 = pneg %p6402_p3 }
  0xb8   : > { %p6408_p2 = pnand %p6406_p0, %p6403_p13 }
  0xba   : > { %6411 = shalt.err (!%p6408_p2)
}
  0xbb   : > { %s6412_s4 = scalar_lea.vmem %s688_s3, 256  ;;  %p6420_p10 = scmp.lt.s32.totalorder %s688_s3, %s688_s3 }
  0xbc   : > { %p6413_p5 = scmp.ne.s32.totalorder %s688_s3, %s6412_s4  ;;  %p6421_p11 = scmp.lt.s32.totalorder %s6412_s4, %s6412_s4 }
  0xbe   : > { %p6415_p7 = pnand %p6413_p5, %p6835_p8  ;;  %p6422_p12 = por %p6421_p11, %p6420_p10 }
  0xc0   : > { %p6416_p9 = pneg %p6415_p7 }
  0xc2   : > { %p6423_p4 = pnand %p6422_p12, %p6416_p9 }
  0xc4   : > { %6426 = shalt.err (!%p6423_p4)
}
  0xc5   : > { %s8660_s23 = smov 8   ;;  %s8661_s25 = smov 128  }
  0xc6   : > { %5957 = dma.hbm_to_vmem [thread:$0]  (!%p6821_p6), %s8659_s13, 256, %s688_s3, [#allocation9], %s8661_s25, %s8661_s25, %s8660_s23  }
  0xc7   : > { %s6427_s28 = scalar_lea.hbm %s8606_s15, 16 }
  0xc8   : > { %p6428_p1 = scmp.ne.s32.totalorder %s8606_s15, %s6427_s28  ;;  %p6434_p0 = scmp.lt.u32.totalorder %s6427_s28, %s8606_s15 }
  0xca   : > { %p6430_p3 = pnand %p6428_p1, %p6835_p8 }
  0xcc   : > { %p6431_p13 = pneg %p6430_p3 }
  0xce   : > { %p6436_p2 = pnand %p6434_p0, %p6431_p13 }
  0xd0   : > { %6439 = shalt.err (!%p6436_p2)
}
  0xd1   : > { %s6440_s24 = scalar_lea.vmem %s713_s18, 16  ;;  %s6447_s3 = scalar_lea.vmem %s713_s18, 32 }
  0xd2   : > { %p6441_p5 = scmp.ne.s32.totalorder %s713_s18, %s6440_s24  ;;  %p6448_p10 = scmp.lt.s32.totalorder %s713_s18, %s713_s18 }
  0xd3   : > { %p6449_p11 = scmp.lt.s32.totalorder %s6447_s3, %s6440_s24 }
  0xd4   : > { %p6443_p7 = pnand %p6441_p5, %p6835_p8 }
  0xd5   : > { %p6450_p12 = por %p6449_p11, %p6448_p10 }
  0xd6   : > { %p6444_p9 = pneg %p6443_p7 }
  0xd8   : > { %p6451_p4 = pnand %p6450_p12, %p6444_p9 }
  0xda   : > { %6454 = shalt.err (!%p6451_p4)
}
  0xdb   : > { %5963 = dma.hbm_to_vmem [thread:$0]  (!%p6821_p6), %s8606_s15, 16, %s713_s18, [#allocation12]  }
  0xdc   : > { %s6638_s21 = smov [#allocation16]   ;;  %s6455_s7 = scalar_lea.hbm %s8613_s22, 5120 }
  0xdd   : > { %s750_s27 = sshll.u32 %s6638_s21, 4  ;;  %p6456_p1 = scmp.ne.s32.totalorder %s8613_s22, %s6455_s7  ;;  %s751_s27 = int_to_ptr.vmem [resolvable:$true] %s750_s27 }
  0xde   : > { %p6462_p0 = scmp.lt.u32.totalorder %s6455_s7, %s8613_s22 }
  0xdf   : > { %p6458_p3 = pnand %p6456_p1, %p6835_p8 }
  0xe1   : > { %p6459_p13 = pneg %p6458_p3 }
  0xe3   : > { %p6464_p2 = pnand %p6462_p0, %p6459_p13 }
  0xe5   : > { %6467 = shalt.err (!%p6464_p2)
}
  0xe6   : > { %s6468_s18 = scalar_lea.vmem %s751_s27, 5120  ;;  %p6476_p10 = scmp.lt.s32.totalorder %s751_s27, %s751_s27 }
  0xe7   : > { %p6469_p5 = scmp.ne.s32.totalorder %s751_s27, %s6468_s18  ;;  %p6477_p11 = scmp.lt.s32.totalorder %s6468_s18, %s6468_s18 }
  0xe9   : > { %p6471_p7 = pnand %p6469_p5, %p6835_p8  ;;  %p6478_p12 = por %p6477_p11, %p6476_p10 }
  0xeb   : > { %p6472_p9 = pneg %p6471_p7 }
  0xed   : > { %p6479_p4 = pnand %p6478_p12, %p6472_p9 }
  0xef   : > { %6482 = shalt.err (!%p6479_p4)
}
  0xf0   : > { %s6639_s3 = smov 320   ;;  %s6640_s8 = smov 20  }
  0xf1   : > { %5969 = dma.hbm_to_vmem [thread:$0]  (!%p6821_p6), %s8613_s22, 5120, %s751_s27, [#allocation15], %s6639_s3, %s6639_s3, %s6640_s8  }
  0xf2   : > { %s5268_s21 = sadd.s32 4294967294, %s6627_s30   ;;  %s7003_s20 = sadd.s32 1, %s6627_s30  }
  0xf3   : > { %s53_s28 = ssub.s32 %s6627_s30, %s7003_s20  ;;  %s56_s7 = sadd.s32 1, %s6623_s6 }
  0xf4   : > { %p54_p8 = scmp.eq.s32.totalorder %s53_s28, 0  ;;  %p63_p1 = scmp.ne.s32.totalorder %s6623_s6, %s6619_s2 }
  0xf5   : > { %p64_p3 = scmp.eq.s32.totalorder %s6627_s30, 0  ;;  %p69_p13 = scmp.ne.s32.totalorder %s6619_s2, %s6615_s29 }
  0xf6   : > { %s7014_s5 = scalar_select %p54_p8, %s6623_s6, %s56_s7  }
  0xf7   : > { %p65_p0 = por %p64_p3, %p63_p1  ;;  %p8662_p2 = scmp.eq.s32.totalorder %s6803_s26, 0 }
  0xf8   : > { %p576_p6 = scmp.eq.s32.totalorder %s6803_s26, 1  ;;  %p582_p7 = scmp.eq.s32.totalorder %s5268_s21, 1 }
  0xf9   : > { %p7018_p5 = por %p8662_p2, %p69_p13  ;;  %p5989_p9 = scmp.lt.s32.totalorder %s6627_s30, 2 }
  0xfa   : > { %s767_s27 = sand.u32 1, %s6623_s6   ;;  %p7025_p10 = por %p576_p6, %p63_p1 }
  0xfb   : > { %p7029_p11 = por %p582_p7, %p69_p13  ;;  %s5903_s24 = smul.u32 320, %s767_s27 }
  0xfc   : > { %s8664_s0 = scalar_select %p7025_p10, 1, 0 }
  0xfd   : > { %s8665_s4 = scalar_select %p7029_p11, 1, 0 }
  0xfe   : > { %s5904_s18 = smul.u32 5120, %s6627_s30  ;;  %p7034_p12 = pnand %p5989_p9, %p65_p0 }
  0xff   : > { %s8667_s25 = sld [smem:[#allocation27_spill]]  ;;  %s771_s28 = scalar_lea.vmem [#allocation2], %s5903_s24 }
 0x100   : > { %s779_s7 = sshll.u32 %s771_s28, 4  ;;  %s7045_s11 = scalar_lea.sflag [#allocation3], %s767_s27  ;;  %s7043_s7 = int_to_ptr.vmem [resolvable:$true] %s779_s7 }
 0x101   : > { %p6485_p8 = pneg %p7034_p12 }
 0x105   : > { %s7041_s21 = scalar_lea.hbm %s8667_s25, %s5904_s18  ;;  %s6488_s23 = scalar_lea.hbm %s8667_s25, 10240 }
 0x106   : > { %s6483_s12 = scalar_lea.hbm %s7041_s21, 5120  ;;  %p6489_p13 = scmp.lt.u32.totalorder %s7041_s21, %s8667_s25 }
 0x107   : > { %p6484_p4 = scmp.ne.s32.totalorder %s7041_s21, %s6483_s12  ;;  %p6490_p0 = scmp.lt.u32.totalorder %s6488_s23, %s6483_s12 }
 0x108   : > { %p6492_p6 = scmp.lt.u32.totalorder %s6483_s12, %s7041_s21 }
 0x109   : > { %p6486_p1 = pnand %p6485_p8, %p6484_p4  ;;  %p6491_p2 = por %p6490_p0, %p6489_p13 }
 0x10b   : > { %p6487_p3 = pneg %p6486_p1  ;;  %p6493_p7 = por %p6492_p6, %p6491_p2 }
 0x10d   : > { %p6494_p9 = pnand %p6493_p7, %p6487_p3 }
 0x10f   : > { %6497 = shalt.err (!%p6494_p9)
}
 0x110   : > { %s6498_s27 = scalar_lea.vmem %s7043_s7, 5120  ;;  %s6641_s24 = smov [#allocation2]  }
 0x111   : > { %p6499_p4 = scmp.ne.s32.totalorder %s7043_s7, %s6498_s27  ;;  %s6503_s28 = sshll.u32 %s6641_s24, 4  ;;  %s6504_s28 = int_to_ptr.vmem [resolvable:$false] %s6503_s28 }
 0x112   : > { %s6505_s13 = scalar_lea.vmem %s6504_s28, 10240  ;;  %p6506_p10 = scmp.lt.s32.totalorder %s7043_s7, %s6504_s28 }
 0x113   : > { %p6501_p1 = pnand %p6499_p4, %p6485_p8  ;;  %p6507_p13 = scmp.lt.s32.totalorder %s6505_s13, %s6498_s27 }
 0x115   : > { %p6502_p11 = pneg %p6501_p1  ;;  %p6508_p0 = por %p6507_p13, %p6506_p10 }
 0x117   : > { %p6509_p2 = pnand %p6508_p0, %p6502_p11 }
 0x119   : > { %6512 = shalt.err (!%p6509_p2)
}
 0x11a   : > { %s6642_s12 = smov 640   ;;  %s6643_s14 = smov 40  }
 0x11b   : > { %5973 = dma.hbm_to_vmem [thread:$0]  (!%p7034_p12), %s7041_s21, 5120, %s7043_s7, %s7045_s11, %s6642_s12, %s6642_s12, %s6643_s14  }
 0x11c   : > { %p8668_p8 = scmp.ne.s32.totalorder %s8652_s1, 0 }
 0x11d   : > { %s7076_s18 = sand.u32 (!%p8668_p8), 1, %s6619_s2  }
 0x11e   : > { %791 = sbr.rel (%p8668_p8) target bundleno = 2521 (0x9d9), region = 116  ;;  %s794_s23 = scalar_lea.sflag (!%p8668_p8), [#allocation3], %s7076_s18 }
 0x11f   : > { %s8630_s8 = smul.u32 (!%p8668_p8), 320, %s7076_s18 }
 0x121   : > { %s7082_s27 = scalar_lea.vmem (!%p8668_p8), [#allocation2], %s8630_s8 }
 0x125   : > { %6586 = dma.done.wait (%p7018_p5), %s794_s23, 5120  }
 0x126   : > { %6588 = vsyncadd (%p7018_p5), %s794_s23, 4294962176  ;;  %p8669_p10 = scmp.eq.s32.totalorder %s6803_s26, 0 }
 0x128   : > { %6590 = dma.done.wait (%p8669_p10), [#allocation6], 32   ;;  %p8670_p11 = pmov %p8669_p10 }
 0x129   : > { %p8671_p12 = pmov %p8669_p10 }
 0x12a   : > { %6592 = vsyncadd (%p8670_p11), [#allocation6], 4294967264 }
 0x12b   : > { %6594 = dma.done.wait (%p8671_p12), [#allocation9], 272   ;;  %p8672_p3 = pmov %p8669_p10 }
 0x12d   : > { %6596 = vsyncadd (%p8672_p3), [#allocation9], 4294967024  ;;  %p8673_p6 = pmov %p8672_p3 }
 0x12e   : > { %p8674_p7 = pmov %p8672_p3 }
 0x12f   : > { %6598 = dma.done.wait (%p8673_p6), [#allocation12], 32  }
 0x130   : > { %6600 = vsyncadd (%p8674_p7), [#allocation12], 4294967264  ;;  %p8675_p5 = pmov %p8672_p3 }
 0x131   : > { %p8676_p9 = pmov %p8672_p3 }
 0x132   : > { %6602 = dma.done.wait (%p8675_p5), [#allocation15], 5632  }
 0x133   : > { %6604 = vsyncadd (%p8676_p9), [#allocation15], 4294961664  ;;  %s8677_s9 = sld [smem:[#allocation28_spill]]  ;;  %v906_v32 = vld [vmem:[%s7082_s27 + $0x8] sm:$0xff]  ;;  %v911_v33 = vld [vmem:[%s7082_s27 + $0x30] sm:$0xff]  ;;  %s8678_s24 = sld [smem:[#allocation31_spill]] }
 0x134   : > { %v908_v34 = vld [vmem:[%s7082_s27 + $0x18] sm:$0xff]  ;;  %v1026_v35 = vpack.c.bf16 %v911_v33, %v906_v32  ;;  %v913_v36 = vld [vmem:[%s7082_s27 + $0x40] sm:$0xff]  ;;  %v910_v38 = vld [vmem:[%s7082_s27 + $0x28] sm:$0xff]  ;;  %s8679_s7 = sld [smem:[#allocation29_spill]]  ;;  %s8680_s12 = sld [smem:[#allocation30_spill]]  ;;  %vm1909_vm0 = vcmask 523264  }
 0x135   : > { %v905_v37 = vld [vmem:[%s7082_s27] sm:$0xff]  ;;  %v1028_v39 = vpack.c.bf16 %v913_v36, %v908_v34  ;;  %v907_v41 = vld [vmem:[%s7082_s27 + $0x10] sm:$0xff]  ;;  %v912_v42 = vld [vmem:[%s7082_s27 + $0x38] sm:$0xff]  ;;  %s8681_s11 = sld [smem:[#allocation34_spill]]  ;;  %s8682_s13 = sld [smem:[#allocation32_spill]]  ;;  %vm2369_vm1 = vcmask 261120  }
 0x136   : > { %v1025_v40 = vpack.c.bf16 %v910_v38, %v905_v37  ;;  %1317 = vmatprep.mubr.bf16.mxu0 %v1026_v35  ;;  %v1027_v43 = vpack.c.bf16 %v912_v42, %v907_v41  ;;  %v916_v46 = vld [vmem:[%s7082_s27 + $0x58] sm:$0xff]  ;;  %v921_v47 = vld [vmem:[%s7082_s27 + $0x80] sm:$0xff]  ;;  %v918_v48 = vld [vmem:[%s7082_s27 + $0x68] sm:$0xff]  ;;  %s8683_s23 = sld [smem:[#allocation33_spill]]  ;;  %s5291_s1 = sshll.u32 %s7076_s18, 6  ;;  %vm2825_vm2 = vcmask 130048  }
 0x137   : > { %1382 = vmatprep.mubr.bf16.mxu1 %v1028_v39  ;;  %v923_v49 = vld [vmem:[%s7082_s27 + $0x90] sm:$0xff]  ;;  %v1031_v50 = vpack.c.bf16 %v921_v47, %v916_v46  ;;  %v920_v53 = vld [vmem:[%s7082_s27 + $0x78] sm:$0xff]  ;;  %v917_v54 = vld [vmem:[%s7082_s27 + $0x60] sm:$0xff]  ;;  %s7803_s3 = scalar_lea.vmem [#allocation18], %s5291_s1  ;;  %s8685_s28 = sld [smem:[#allocation41_spill]] }
 0x138   : > { %v1033_v51 = vpack.c.bf16 %v923_v49, %v918_v48  ;;  %v915_v52 = vld [vmem:[%s7082_s27 + $0x50] sm:$0xff]  ;;  %v922_v55 = vld [vmem:[%s7082_s27 + $0x88] sm:$0xff]  ;;  %v928_v62 = vld [vmem:[%s7082_s27 + $0xb8] sm:$0xff]  ;;  %s8686_s14 = sld [smem:[#allocation42_spill]]  ;;  %s8687_s1 = sld [smem:[#allocation43_spill]] }
 0x139   : > { %v6051_v0 = vld [vmem:[%s8677_s9 + $0x40] sm:$0xff]   ;;  %v6055_v4 = vld [vmem:[%s8677_s9 + $0x48] sm:$0xff]   ;;  %v6059_v8 = vld [vmem:[%s8677_s9 + $0x50] sm:$0xff]   ;;  %v1030_v56 = vpack.c.bf16 %v920_v53, %v915_v52  ;;  %v1032_v58 = vpack.c.bf16 %v922_v55, %v917_v54  ;;  %s5420_s21 = sshll.u32 %s6803_s26, 10  ;;  %p8689_p1 = scmp.ne.s32.totalorder %s8664_s0, 0 }
 0x13a   : > { %v6052_v1 = vld [vmem:[%s8677_s9 + $0xc0] sm:$0xff]   ;;  %5421 = vmatprep.subr.bf16.mxu0 %v6051_v0  ;;  %v6056_v5 = vld [vmem:[%s8677_s9 + $0xc8] sm:$0xff]   ;;  %v6060_v9 = vld [vmem:[%s8677_s9 + $0xd0] sm:$0xff]  }
 0x13b   : > { %v6053_v2 = vld [vmem:[%s8677_s9] sm:$0xff]   ;;  %5461 = vmatprep.subr.bf16.mxu1 %v6052_v1  ;;  %v6057_v6 = vld [vmem:[%s8677_s9 + $0x8] sm:$0xff]   ;;  %v6061_v10 = vld [vmem:[%s8677_s9 + $0x10] sm:$0xff]  }
 0x13c   : > { %v6054_v3 = vld [vmem:[%s8677_s9 + $0x80] sm:$0xff]   ;;  %5422 = vmatpush3.bf16.msra.mxu0 %v6053_v2  ;;  %v6058_v7 = vld [vmem:[%s8677_s9 + $0x88] sm:$0xff]   ;;  %v6062_v11 = vld [vmem:[%s8677_s9 + $0x90] sm:$0xff]  }
 0x13d   : > { %5462 = vmatpush3.bf16.msra.mxu1 %v6054_v3  ;;  %5423 = vmatprep.subr.bf16.mxu0 %v6055_v4  ;;  %v6063_v12 = vld [vmem:[%s8677_s9 + $0x58] sm:$0xff]   ;;  %v6067_v16 = vld [vmem:[%s8677_s9 + $0x60] sm:$0xff]   ;;  %v6071_v20 = vld [vmem:[%s8677_s9 + $0x68] sm:$0xff]  }
 0x13e   : > { %5463 = vmatprep.subr.bf16.mxu1 %v6056_v5  ;;  %v6064_v13 = vld [vmem:[%s8677_s9 + $0xd8] sm:$0xff]   ;;  %v6068_v17 = vld [vmem:[%s8677_s9 + $0xe0] sm:$0xff]   ;;  %v6072_v21 = vld [vmem:[%s8677_s9 + $0xe8] sm:$0xff]  }
 0x13f   : > { %v6065_v14 = vld [vmem:[%s8677_s9 + $0x18] sm:$0xff]   ;;  %v6069_v18 = vld [vmem:[%s8677_s9 + $0x20] sm:$0xff]   ;;  %v6073_v22 = vld [vmem:[%s8677_s9 + $0x28] sm:$0xff]  }
 0x140   : > { %5424 = vmatpush3.bf16.msra.mxu0 %v6057_v6  ;;  %v6066_v15 = vld [vmem:[%s8677_s9 + $0x98] sm:$0xff]   ;;  %v6070_v19 = vld [vmem:[%s8677_s9 + $0xa0] sm:$0xff]   ;;  %v6074_v23 = vld [vmem:[%s8677_s9 + $0xa8] sm:$0xff]  }
 0x141   : > { %5464 = vmatpush3.bf16.msra.mxu1 %v6058_v7  ;;  %5425 = vmatprep.subr.bf16.mxu0 %v6059_v8  ;;  %v6075_v24 = vld [vmem:[%s8677_s9 + $0x70] sm:$0xff]   ;;  %v6079_v28 = vld [vmem:[%s8677_s9 + $0x78] sm:$0xff]   ;;  %v6083_v44 = vld [vmem:[%s8677_s9 + $0x100] sm:$0xff]  }
 0x142   : > { %5465 = vmatprep.subr.bf16.mxu1 %v6060_v9  ;;  %v6076_v25 = vld [vmem:[%s8677_s9 + $0xf0] sm:$0xff]   ;;  %v6080_v29 = vld [vmem:[%s8677_s9 + $0xf8] sm:$0xff]   ;;  %v6084_v45 = vld [vmem:[%s8677_s9 + $0x108] sm:$0xff]  }
 0x143   : > { %v6077_v26 = vld [vmem:[%s8677_s9 + $0x30] sm:$0xff]   ;;  %v6081_v30 = vld [vmem:[%s8677_s9 + $0x38] sm:$0xff]   ;;  %v926_v59 = vld [vmem:[%s7082_s27 + $0xa8] sm:$0xff] }
 0x144   : > { %5426 = vmatpush3.bf16.msra.mxu0 %v6061_v10  ;;  %v6078_v27 = vld [vmem:[%s8677_s9 + $0xb0] sm:$0xff]   ;;  %v6082_v31 = vld [vmem:[%s8677_s9 + $0xb8] sm:$0xff]   ;;  %v933_v63 = vld [vmem:[%s7082_s27 + $0xe0] sm:$0xff] }
 0x145   : > { %5466 = vmatpush3.bf16.msra.mxu1 %v6062_v11  ;;  %5427 = vmatprep.subr.bf16.mxu0 %v6063_v12  ;;  %v6085_v57 = vld [vmem:[%s8677_s9 + $0x110] sm:$0xff]   ;;  %v6086_v0 = vld [vmem:[%s8677_s9 + $0x118] sm:$0xff]   ;;  %v1038_v1 = vpack.c.bf16 %v933_v63, %v928_v62  ;;  %v925_v2 = vld [vmem:[%s7082_s27 + $0xa0] sm:$0xff] }
 0x146   : > { %5467 = vmatprep.subr.bf16.mxu1 %v6064_v13  ;;  %v931_v60 = vld [vmem:[%s7082_s27 + $0xd0] sm:$0xff]  ;;  %v930_v3 = vld [vmem:[%s7082_s27 + $0xc8] sm:$0xff]  ;;  %v932_v5 = vld [vmem:[%s7082_s27 + $0xd8] sm:$0xff] }
 0x147   : > { %v1036_v61 = vpack.c.bf16 %v931_v60, %v926_v59  ;;  %v927_v4 = vld [vmem:[%s7082_s27 + $0xb0] sm:$0xff]  ;;  %v936_v6 = vld [vmem:[%s7082_s27 + $0xf8] sm:$0xff]  ;;  %v941_v7 = vld [vmem:[%s7082_s27 + $0x120] sm:$0xff]  ;;  %v1035_v11 = vpack.c.bf16 %v930_v3, %v925_v2 }
 0x148   : > { %5428 = vmatpush3.bf16.msra.mxu0 %v6065_v14  ;;  %v6087_v8 = vld [vmem:[%s8677_s9 + $0x120] sm:$0xff]   ;;  %v938_v9 = vld [vmem:[%s7082_s27 + $0x108] sm:$0xff]  ;;  %v943_v10 = vld [vmem:[%s7082_s27 + $0x130] sm:$0xff]  ;;  %v1037_v12 = vpack.c.bf16 %v932_v5, %v927_v4  ;;  %v1041_v13 = vpack.c.bf16 %v941_v7, %v936_v6 }
 0x149   : > { %5468 = vmatpush3.bf16.msra.mxu1 %v6066_v15  ;;  %5429 = vmatprep.subr.bf16.mxu0 %v6067_v16  ;;  %v1043_v14 = vpack.c.bf16 %v943_v10, %v938_v9  ;;  %v6088_v15 = vld [vmem:[%s8677_s9 + $0x128] sm:$0xff]   ;;  %v935_v16 = vld [vmem:[%s7082_s27 + $0xf0] sm:$0xff]  ;;  %v944_v34 = vld [vmem:[%s7082_s27 + $0x138] sm:$0xff] }
 0x14a   : > { %5469 = vmatprep.subr.bf16.mxu1 %v6068_v17  ;;  %v940_v17 = vld [vmem:[%s7082_s27 + $0x118] sm:$0xff]  ;;  %v939_v33 = vld [vmem:[%s7082_s27 + $0x110] sm:$0xff]  ;;  %v1786_v36 = vld [vmem:[%s8678_s24] sm:$0xff] }
 0x14b   : > { %v1044_v35 = vpack.c.bf16 %v944_v34, %v939_v33  ;;  %v1787_v37 = vld [vmem:[%s8678_s24 + $0x8] sm:$0xff]  ;;  %v1788_v39 = vld [vmem:[%s8678_s24 + $0x10] sm:$0xff]  ;;  %v1790_v42 = vld [vmem:[%s8678_s24 + $0x20] sm:$0xff] }
 0x14c   : > { %5430 = vmatpush3.bf16.msra.mxu0 %v6069_v18  ;;  %v937_v18 = vld [vmem:[%s7082_s27 + $0x100] sm:$0xff]  ;;  %v5819_v38 = vpack.c.bf16 %v1787_v37, %v1786_v36  ;;  %v1793_v46 = vld [vmem:[%s8678_s24 + $0x38] sm:$0xff]  ;;  %v1795_v49 = vld [vmem:[%s8678_s24 + $0x48] sm:$0xff] }
 0x14d   : > { %5470 = vmatpush3.bf16.msra.mxu1 %v6070_v19  ;;  %5431 = vmatprep.subr.bf16.mxu0 %v6071_v20  ;;  %v942_v19 = vld [vmem:[%s7082_s27 + $0x128] sm:$0xff]  ;;  %v909_v20 = vld [vmem:[%s7082_s27 + $0x20] sm:$0xff]  ;;  %v1797_v52 = vld [vmem:[%s8678_s24 + $0x58] sm:$0xff] }
 0x14e   : > { %5471 = vmatprep.subr.bf16.mxu1 %v6072_v21  ;;  %v6089_v21 = vld [vmem:[%s8677_s9 + $0x130] sm:$0xff]   ;;  %v1794_v48 = vld [vmem:[%s8678_s24 + $0x40] sm:$0xff]  ;;  %v1799_v55 = vld [vmem:[%s8678_s24 + $0x68] sm:$0xff] }
 0x14f   : > { %v1798_v53 = vld [vmem:[%s8678_s24 + $0x60] sm:$0xff] }
 0x150   : > { %5432 = vmatpush3.bf16.msra.mxu0 %v6073_v22  ;;  %v914_v22 = vld [vmem:[%s7082_s27 + $0x48] sm:$0xff] }
 0x151   : > { %5472 = vmatpush3.bf16.msra.mxu1 %v6074_v23  ;;  %5433 = vmatprep.subr.bf16.mxu0 %v6075_v24  ;;  %v1040_v23 = vpack.c.bf16 %v940_v17, %v935_v16  ;;  %v1042_v24 = vpack.c.bf16 %v942_v19, %v937_v18 }
 0x152   : > { %5473 = vmatprep.subr.bf16.mxu1 %v6076_v25  ;;  %v6090_v25 = vld [vmem:[%s8677_s9 + $0x138] sm:$0xff]  }
 0x154   : > { %5434 = vmatpush3.bf16.msra.mxu0 %v6077_v26  ;;  %v1029_v26 = vpack.c.bf16 %v914_v22, %v909_v20 }
 0x155   : > { %5474 = vmatpush3.bf16.msra.mxu1 %v6078_v27  ;;  %5435 = vmatprep.subr.bf16.mxu0 %v6079_v28  ;;  %v919_v27 = vld [vmem:[%s7082_s27 + $0x70] sm:$0xff]  ;;  %v924_v28 = vld [vmem:[%s7082_s27 + $0x98] sm:$0xff] }
 0x156   : > { %5475 = vmatprep.subr.bf16.mxu1 %v6080_v29  ;;  %v929_v29 = vld [vmem:[%s7082_s27 + $0xc0] sm:$0xff] }
 0x158   : > { %5436 = vmatpush3.bf16.msra.mxu0 %v6081_v30  ;;  %v934_v30 = vld [vmem:[%s7082_s27 + $0xe8] sm:$0xff]  ;;  %s8684_s27 = sld [smem:[#allocation35_spill]] }
 0x159   : > { %5476 = vmatpush3.bf16.msra.mxu1 %v6082_v31  ;;  %5615 = vmatprep.subr.bf16.mxu0 %v6083_v44  ;;  %v1034_v31 = vpack.c.bf16 %v924_v28, %v919_v27  ;;  %v1039_v32 = vpack.c.bf16 %v934_v30, %v929_v29 }
 0x15a   : > { %5820 = vmatprep.subr.bf16.mxu1 %v5819_v38 }
 0x15b   : > { %1318 = vmatmul.mubr.bf16.vlgmr.msra.gmra.mrb[0].mxu0 %v1025_v40  ;;  %v1789_v40 = vld [vmem:[%s8678_s24 + $0x18] sm:$0xff] }
 0x15c   : > { %1383 = vmatmul.mubr.bf16.vlgmr.msra.gmra.mrb[0].mxu1 %v1027_v43  ;;  %5616 = vmatpush3.bf16.msra.mxu0 %v6083_v44  ;;  %v5823_v41 = vpack.c.bf16 %v1789_v40, %v1788_v39  ;;  %v1791_v43 = vld [vmem:[%s8678_s24 + $0x28] sm:$0xff] }
 0x15d   : > { %5617 = vmatprep.subr.bf16.mxu0 %v6084_v45  ;;  %1325 = vmatprep.mubr.bf16.mxu0 %v1031_v50  ;;  %v5827_v44 = vpack.c.bf16 %v1791_v43, %v1790_v42  ;;  %v5835_v50 = vpack.c.bf16 %v1795_v49, %v1794_v48 }
 0x15e   : > { %1390 = vmatprep.mubr.bf16.mxu1 %v1033_v51  ;;  %5822 = vmatpush3.bf16.msra.mxu1 %v5819_v38  ;;  %v1796_v51 = vld [vmem:[%s8678_s24 + $0x50] sm:$0xff] }
 0x15f   : > { %5824 = vmatprep.subr.bf16.mxu1 %v5823_v41  ;;  %v5839_v54 = vpack.c.bf16 %v1797_v52, %v1796_v51 }
 0x160   : > { %5618 = vmatpush3.bf16.msra.mxu0 %v6084_v45  ;;  %v1792_v45 = vld [vmem:[%s8678_s24 + $0x30] sm:$0xff] }
 0x161   : > { %5619 = vmatprep.subr.bf16.mxu0 %v6085_v57  ;;  %v5831_v47 = vpack.c.bf16 %v1793_v46, %v1792_v45 }
 0x162   : > { %5826 = vmatpush3.bf16.msra.mxu1 %v5823_v41 }
 0x163   : > { %1326 = vmatmul.mubr.bf16.gmra.mrb[4].mxu0 %v1030_v56  ;;  %5828 = vmatprep.subr.bf16.mxu1 %v5827_v44  ;;  %v5843_v56 = vpack.c.bf16 %v1799_v55, %v1798_v53 }
 0x164   : > { %1391 = vmatmul.mubr.bf16.gmra.mrb[4].mxu1 %v1032_v58  ;;  %1333 = vmatprep.mubr.bf16.mxu0 %v1036_v61  ;;  %v1801_v58 = vld [vmem:[%s8678_s24 + $0x78] sm:$0xff] }
 0x165   : > { %5620 = vmatpush3.bf16.msra.mxu0 %v6085_v57  ;;  %1398 = vmatprep.mubr.bf16.mxu1 %v1038_v1  ;;  %v1800_v57 = vld [vmem:[%s8678_s24 + $0x70] sm:$0xff] }
 0x166   : > { %5621 = vmatprep.subr.bf16.mxu0 %v6086_v0  ;;  %5830 = vmatpush3.bf16.msra.mxu1 %v5827_v44  ;;  %v5847_v59 = vpack.c.bf16 %v1801_v58, %v1800_v57 }
 0x167   : > { %5832 = vmatprep.subr.bf16.mxu1 %v5831_v47 }
 0x169   : > { %5622 = vmatpush3.bf16.msra.mxu0 %v6086_v0 }
 0x16a   : > { %5623 = vmatprep.subr.bf16.mxu0 %v6087_v8  ;;  %5834 = vmatpush3.bf16.msra.mxu1 %v5831_v47 }
 0x16b   : > { %1334 = vmatmul.mubr.bf16.gmra.mrb[8].mxu0 %v1035_v11  ;;  %5836 = vmatprep.subr.bf16.mxu1 %v5835_v50 }
 0x16c   : > { %1399 = vmatmul.mubr.bf16.gmra.mrb[8].mxu1 %v1037_v12  ;;  %1341 = vmatprep.mubr.bf16.mxu0 %v1041_v13 }
 0x16d   : > { %5624 = vmatpush3.bf16.msra.mxu0 %v6087_v8  ;;  %1406 = vmatprep.mubr.bf16.mxu1 %v1043_v14 }
 0x16e   : > { %5625 = vmatprep.subr.bf16.mxu0 %v6088_v15  ;;  %5838 = vmatpush3.bf16.msra.mxu1 %v5835_v50 }
 0x16f   : > { %5840 = vmatprep.subr.bf16.mxu1 %v5839_v54 }
 0x171   : > { %5626 = vmatpush3.bf16.msra.mxu0 %v6088_v15 }
 0x172   : > { %5627 = vmatprep.subr.bf16.mxu0 %v6089_v21  ;;  %5842 = vmatpush3.bf16.msra.mxu1 %v5839_v54 }
 0x173   : > { %1342 = vmatmul.mubr.bf16.gmra.mrb[12].mxu0 %v1040_v23  ;;  %5844 = vmatprep.subr.bf16.mxu1 %v5843_v56 }
 0x174   : > { %1407 = vmatmul.mubr.bf16.gmra.mrb[12].mxu1 %v1042_v24  ;;  %5631 = vmatprep.mubr.bf16.mxu0 %v1029_v26 }
 0x175   : > { %5628 = vmatpush3.bf16.msra.mxu0 %v6089_v21 }
 0x176   : > { %5629 = vmatprep.subr.bf16.mxu0 %v6090_v25  ;;  %5846 = vmatpush3.bf16.msra.mxu1 %v5843_v56 }
 0x177   : > { %5848 = vmatprep.subr.bf16.mxu1 %v5847_v59 }
 0x179   : > { %5630 = vmatpush3.bf16.msra.mxu0 %v6090_v25 }
 0x17a   : > { %5850 = vmatpush3.bf16.msra.mxu1 %v5847_v59 }
 0x17c   : > { %5632 = vmatmul.mubr.bf16.vlgmr.msra.gmra.mrb[16].mxu0 %v1034_v31 }
 0x17d   : > { %5635 = vmatprep.mubr.bf16.mxu0 %v1039_v32 }
 0x184   : > { %5636 = vmatmul.mubr.bf16.gmra.mrb[20].mxu0 %v1044_v35 }
 0x22e   : > { %v5437_v60 = vpop.f32.mrb[0].mxu0 }
 0x22f   : > { %v5477_v61 = vpop.f32.mrb[0].mxu1  ;;  %v5438_v62 = vpop.f32.mrb[1].mxu0 }
 0x230   : > { %v5439_v63 = vadd.f32 %v5438_v62, %v5437_v60  ;;  %v5478_v0 = vpop.f32.mrb[1].mxu1  ;;  %v5440_v1 = vpop.f32.mrb[2].mxu0 }
 0x231   : > { %v5479_v2 = vadd.f32 %v5478_v0, %v5477_v61  ;;  %v5480_v3 = vpop.f32.mrb[2].mxu1  ;;  %v5441_v4 = vpop.f32.mrb[3].mxu0 }
 0x232   : > { %v5442_v5 = vadd.f32 %v5441_v4, %v5440_v1  ;;  %v5481_v6 = vpop.f32.mrb[3].mxu1 }
 0x233   : > { %v5482_v7 = vadd.f32 %v5481_v6, %v5480_v3  ;;  %v1385_v8 = vadd.f32 %v5479_v2, %v5439_v63 }
 0x235   : > { %v1388_v9 = vadd.f32 %v5482_v7, %v5442_v5 }
 0x236   : > { %v5443_v10 = vpop.f32.mrb[4].mxu0 }
 0x237   : > { %v5483_v11 = vpop.f32.mrb[4].mxu1  ;;  %v5444_v12 = vpop.f32.mrb[5].mxu0 }
 0x238   : > { %v5445_v13 = vadd.f32 %v5444_v12, %v5443_v10  ;;  %v5484_v14 = vpop.f32.mrb[5].mxu1  ;;  %v5446_v15 = vpop.f32.mrb[6].mxu0 }
 0x239   : > { %v5485_v16 = vadd.f32 %v5484_v14, %v5483_v11  ;;  %v5486_v17 = vpop.f32.mrb[6].mxu1  ;;  %v5447_v18 = vpop.f32.mrb[7].mxu0 }
 0x23a   : > { %v5448_v19 = vadd.f32 %v5447_v18, %v5446_v15  ;;  %v5487_v20 = vpop.f32.mrb[7].mxu1 }
 0x23b   : > { %v5488_v21 = vadd.f32 %v5487_v20, %v5486_v17  ;;  %v1393_v22 = vadd.f32 %v5485_v16, %v5445_v13 }
 0x23d   : > { %v1396_v23 = vadd.f32 %v5488_v21, %v5448_v19 }
 0x23e   : > { %v5449_v24 = vpop.f32.mrb[8].mxu0 }
 0x23f   : > { %v5489_v25 = vpop.f32.mrb[8].mxu1  ;;  %v5450_v26 = vpop.f32.mrb[9].mxu0 }
 0x240   : > { %v5451_v27 = vadd.f32 %v5450_v26, %v5449_v24  ;;  %v5490_v28 = vpop.f32.mrb[9].mxu1  ;;  %v5452_v29 = vpop.f32.mrb[10].mxu0 }
 0x241   : > { %v5491_v30 = vadd.f32 %v5490_v28, %v5489_v25  ;;  %v5492_v31 = vpop.f32.mrb[10].mxu1  ;;  %v5453_v32 = vpop.f32.mrb[11].mxu0 }
 0x242   : > { %v5454_v33 = vadd.f32 %v5453_v32, %v5452_v29  ;;  %v5493_v34 = vpop.f32.mrb[11].mxu1 }
 0x243   : > { %v5494_v35 = vadd.f32 %v5493_v34, %v5492_v31  ;;  %v7312_v36 = vadd.f32 %v5491_v30, %v5451_v27 }
 0x245   : > { %v7314_v37 = vadd.f32 %v5494_v35, %v5454_v33 }
 0x246   : > { %v5455_v38 = vpop.f32.mrb[12].mxu0 }
 0x247   : > { %v5495_v39 = vpop.f32.mrb[12].mxu1  ;;  %v5456_v40 = vpop.f32.mrb[13].mxu0 }
 0x248   : > { %v5457_v41 = vadd.f32 %v5456_v40, %v5455_v38  ;;  %v5496_v42 = vpop.f32.mrb[13].mxu1  ;;  %v5458_v43 = vpop.f32.mrb[14].mxu0 }
 0x249   : > { %v5497_v44 = vadd.f32 %v5496_v42, %v5495_v39  ;;  %v5498_v45 = vpop.f32.mrb[14].mxu1  ;;  %v5459_v46 = vpop.f32.mrb[15].mxu0 }
 0x24a   : > { %v5460_v47 = vadd.f32 %v5459_v46, %v5458_v43  ;;  %v5499_v48 = vpop.f32.mrb[15].mxu1 }
 0x24b   : > { %v5500_v49 = vadd.f32 %v5499_v48, %v5498_v45  ;;  %v1409_v50 = vadd.f32 %v5497_v44, %v5457_v41 }
 0x24d   : > { %v7316_v51 = vadd.f32 %v5500_v49, %v5460_v47 }
 0x24f   : > { %v5633_v52 = vpop.f32.mrb[16].mxu0 }
 0x250   : > { %v7318_v53 = vadd.f32 %v5633_v52, %v1393_v22  ;;  %v1449_v54 = vpop.f32.mrb[17].mxu0 }
 0x251   : > { %v7320_v55 = vadd.f32 %v1449_v54, %v1385_v8  ;;  %v5634_v56 = vpop.f32.mrb[18].mxu0 }
 0x252   : > { %v1494_v57 = vrot.slane %v7318_v53, 4  ;;  %v1532_v58 = vmul.f32 %v7318_v53, %v7318_v53  ;;  %v7325_v59 = vadd.f32 %v5634_v56, %v1396_v23  ;;  %v1452_v60 = vpop.f32.mrb[19].mxu0 }
 0x253   : > { %v1482_v61 = vrot.slane %v7320_v55, 4  ;;  %v1530_v62 = vmul.f32 %v7320_v55, %v7320_v55  ;;  %v7330_v63 = vadd.f32 %v1452_v60, %v1388_v9 }
 0x254   : > { %v1495_v0 = vadd.f32 %v1494_v57, %v7318_v53  ;;  %v1550_v1 = vrot.slane %v1532_v58, 4  ;;  %v1500_v2 = vrot.slane %v7325_v59, 4  ;;  %v1533_v3 = vmul.f32 %v7325_v59, %v7325_v59 }
 0x255   : > { %v1483_v4 = vadd.f32 %v1482_v61, %v7320_v55  ;;  %v1538_v5 = vrot.slane %v1530_v62, 4  ;;  %v1488_v6 = vrot.slane %v7330_v63, 4  ;;  %v1531_v7 = vmul.f32 %v7330_v63, %v7330_v63 }
 0x256   : > { %v1496_v8 = vrot.slane %v1495_v0, 2  ;;  %v1551_v10 = vadd.f32 %v1550_v1, %v1532_v58  ;;  %v1501_v9 = vadd.f32 %v1500_v2, %v7325_v59  ;;  %v1556_v11 = vrot.slane %v1533_v3, 4 }
 0x257   : > { %v1484_v12 = vrot.slane %v1483_v4, 2  ;;  %v1539_v13 = vadd.f32 %v1538_v5, %v1530_v62  ;;  %v1489_v14 = vadd.f32 %v1488_v6, %v7330_v63  ;;  %v1544_v15 = vrot.slane %v1531_v7, 4  ;;  %v5637_v16 = vpop.f32.mrb[20].mxu0 }
 0x258   : > { %v1497_v17 = vadd.f32 %v1496_v8, %v1495_v0  ;;  %v1552_v18 = vrot.slane %v1551_v10, 2  ;;  %v1502_v19 = vrot.slane %v1501_v9, 2  ;;  %v1557_v20 = vadd.f32 %v1556_v11, %v1533_v3  ;;  %v1465_v21 = vpop.f32.mrb[21].mxu0 }
 0x259   : > { %v1485_v22 = vadd.f32 %v1484_v12, %v1483_v4  ;;  %v1540_v23 = vrot.slane %v1539_v13, 2  ;;  %v1490_v24 = vrot.slane %v1489_v14, 2  ;;  %v1545_v25 = vadd.f32 %v1544_v15, %v1531_v7  ;;  %v5638_v26 = vpop.f32.mrb[22].mxu0 }
 0x25a   : > { %v1498_v27 = vrot.slane %v1497_v17, 1  ;;  %v1553_v28 = vadd.f32 %v1552_v18, %v1551_v10  ;;  %v1503_v29 = vadd.f32 %v1502_v19, %v1501_v9  ;;  %v1558_v30 = vrot.slane %v1557_v20, 2  ;;  %v1468_v31 = vpop.f32.mrb[23].mxu0 }
 0x25b   : > { %v1486_v32 = vrot.slane %v1485_v22, 1  ;;  %v1541_v33 = vadd.f32 %v1540_v23, %v1539_v13  ;;  %v1491_v34 = vadd.f32 %v1490_v24, %v1489_v14  ;;  %v1546_v35 = vrot.slane %v1545_v25, 2 }
 0x25c   : > { %v1554_v38 = vrot.slane %v1553_v28, 1  ;;  %v1504_v39 = vrot.slane %v1503_v29, 1  ;;  %v1559_v40 = vadd.f32 %v1558_v30, %v1557_v20  ;;  %v7342_v41 = vadd.f32 %v1498_v27, %v1497_v17 }
 0x25d   : > { %v1542_v42 = vrot.slane %v1541_v33, 1  ;;  %v1492_v43 = vrot.slane %v1491_v34, 1  ;;  %v1547_v44 = vadd.f32 %v1546_v35, %v1545_v25  ;;  %v1487_v46 = vadd.f32 %v1486_v32, %v1485_v22 }
 0x25e   : > { %v1555_v45 = vadd.f32 %v1554_v38, %v1553_v28  ;;  %v1560_v47 = vrot.slane %v1559_v40, 1  ;;  %v7344_v48 = vadd.f32 %v5637_v16, %v1409_v50  ;;  %v7347_v56 = vadd.f32 %v1465_v21, %v7312_v36 }
 0x25f   : > { %v1543_v49 = vadd.f32 %v1542_v42, %v1541_v33  ;;  %v1493_v52 = vadd.f32 %v1492_v43, %v1491_v34  ;;  %v1548_v54 = vrot.slane %v1547_v44, 1  ;;  %v7351_v58 = vadd.f32 %v1504_v39, %v1503_v29 }
 0x260   : > { %v7349_v57 = vmul.f32 0.125, %v1555_v45  ;;  %v1518_v60 = vrot.slane %v7344_v48, 4  ;;  %v1536_v61 = vmul.f32 %v7344_v48, %v7344_v48  ;;  %v1561_v62 = vadd.f32 %v1560_v47, %v1559_v40 }
 0x261   : > { %v1549_v0 = vadd.f32 %v1548_v54, %v1547_v44  ;;  %v7356_v1 = vmul.f32 0.125, %v1493_v52  ;;  %v1506_v50 = vrot.slane %v7347_v56, 4  ;;  %v7359_v2 = vmul.f32 0.125, %v1543_v49 }
 0x262   : > { %v1519_v36 = vadd.f32 %v1518_v60, %v7344_v48  ;;  %v1574_v3 = vrot.slane %v1536_v61, 4  ;;  %v1534_v4 = vmul.f32 %v7347_v56, %v7347_v56  ;;  %v7368_v8 = vadd.f32 %v5638_v26, %v7316_v51 }
 0x263   : > { %v1595_v5 = vmul.f32 0.125, %v1549_v0  ;;  %v1603_v6 = vmul.f32 %v7356_v1, %v7356_v1  ;;  %v1507_v7 = vadd.f32 %v1506_v50, %v7347_v56  ;;  %v7371_v12 = vadd.f32 %v1468_v31, %v7314_v37 }
 0x264   : > { %v1520_v10 = vrot.slane %v1519_v36, 2  ;;  %v1575_v9 = vadd.f32 %v1574_v3, %v1536_v61  ;;  %v1562_v11 = vrot.slane %v1534_v4, 4  ;;  %v1524_v15 = vrot.slane %v7368_v8, 4 }
 0x265   : > { %v1611_v13 = vsub.f32 %v1595_v5, %v1603_v6  ;;  %v1508_v14 = vrot.slane %v1507_v7, 2  ;;  %v1537_v16 = vmul.f32 %v7368_v8, %v7368_v8  ;;  %v1512_v20 = vrot.slane %v7371_v12, 4 }
 0x266   : > { %v1521_v17 = vadd.f32 %v1520_v10, %v1519_v36  ;;  %v1576_v18 = vrot.slane %v1575_v9, 2  ;;  %v1563_v19 = vadd.f32 %v1562_v11, %v1534_v4  ;;  %v1525_v22 = vadd.f32 %v1524_v15, %v7368_v8 }
 0x267   : > { %v1619_v51 = vmax.f32 %v1611_v13, 0.0  ;;  %v1509_v21 = vadd.f32 %v1508_v14, %v1507_v7  ;;  %v1580_v23 = vrot.slane %v1537_v16, 4  ;;  %v1513_v26 = vadd.f32 %v1512_v20, %v7371_v12 }
 0x268   : > { %v1522_v24 = vrot.slane %v1521_v17, 1  ;;  %v1577_v37 = vadd.f32 %v1576_v18, %v1575_v9  ;;  %v1564_v25 = vrot.slane %v1563_v19, 2  ;;  %v1526_v29 = vrot.slane %v1525_v22, 2 }
 0x269   : > { %v1627_v27 = vadd.f32 1e-05, %v1619_v51  ;;  %v1510_v28 = vrot.slane %v1509_v21, 1  ;;  %v1581_v30 = vadd.f32 %v1580_v23, %v1537_v16  ;;  %v1597_v31 = vmul.f32 0.125, %v1561_v62 }
 0x26a   : > { %v1578_v32 = vrot.slane %v1577_v37, 1  ;;  %v1565_v33 = vadd.f32 %v1564_v25, %v1563_v19  ;;  %v1514_v34 = vrot.slane %v1513_v26, 2  ;;  %v1523_v35 = vadd.f32 %v1522_v24, %v1521_v17 }
 0x26b   : > { %6147 = vrsqrt.f32 %v1627_v27  ;;  %v1527_v38 = vadd.f32 %v1526_v29, %v1525_v22  ;;  %v1582_v39 = vrot.slane %v1581_v30, 2  ;;  %v1511_v40 = vadd.f32 %v1510_v28, %v1509_v21 }
 0x26c   : > { %v1566_v42 = vrot.slane %v1565_v33, 1  ;;  %v1515_v43 = vadd.f32 %v1514_v34, %v1513_v26  ;;  %v1535_v44 = vmul.f32 %v7371_v12, %v7371_v12  ;;  %v7381_v49 = vmul.f32 0.125, %v1487_v46 }
 0x26d   : > { %v1528_v45 = vrot.slane %v1527_v38, 1  ;;  %v1583_v47 = vadd.f32 %v1582_v39, %v1581_v30  ;;  %v7384_v52 = vmul.f32 0.125, %v7342_v41  ;;  %v1579_v54 = vadd.f32 %v1578_v32, %v1577_v37  ;;  %v7412_v37 = vld [vmem:[%s8679_s7] sm:$0x1]  ;;  %s5087_s7 = sshll.u32 %s7803_s3, 4  ;;  %s8415_s7 = int_to_ptr.vmem [resolvable:$true] %s5087_s7 }
 0x26e   : > { %v1567_v60 = vadd.f32 %v1566_v42, %v1565_v33  ;;  %v1516_v61 = vrot.slane %v1515_v43, 1  ;;  %v1568_v62 = vrot.slane %v1535_v44, 4  ;;  %v1602_v36 = vmul.f32 %v7381_v49, %v7381_v49 }
 0x26f   : > { %v1529_v0 = vadd.f32 %v1528_v45, %v1527_v38  ;;  %v1584_v50 = vrot.slane %v1583_v47, 1  ;;  %v1604_v3 = vmul.f32 %v7384_v52, %v7384_v52  ;;  %v7391_v46 = vmul.f32 0.125, %v7351_v58 }
 0x270   : > { %v1598_v4 = vmul.f32 0.125, %v1567_v60  ;;  %v1517_v5 = vadd.f32 %v1516_v61, %v1515_v43  ;;  %v1569_v6 = vadd.f32 %v1568_v62, %v1535_v44  ;;  %v1610_v7 = vsub.f32 %v7359_v2, %v1602_v36  ;;  %v7425_v60 = vld [vmem:[%s8680_s12] sm:$0x1]  ;;  %s8688_s12 = sld [smem:[#allocation46_spill]] }
 0x271   : > { %v1585_v41 = vadd.f32 %v1584_v50, %v1583_v47  ;;  %v1612_v10 = vsub.f32 %v7349_v57, %v1604_v3  ;;  %v7395_v9 = vmul.f32 0.125, %v1511_v40  ;;  %v1600_v11 = vmul.f32 0.125, %v1579_v54 }
 0x272   : > { %v1570_v13 = vrot.slane %v1569_v6, 2  ;;  %v1605_v14 = vmul.f32 %v7391_v46, %v7391_v46  ;;  %v7399_v15 = vmul.f32 0.125, %v1523_v35  ;;  %v1618_v16 = vmax.f32 %v1610_v7, 0.0 }
 0x273   : > { %v1620_v17 = vmax.f32 %v1612_v10, 0.0  ;;  %v1606_v58 = vmul.f32 %v7395_v9, %v7395_v9  ;;  %v7403_v18 = vmul.f32 0.125, %v1517_v5  ;;  %v1601_v19 = vmul.f32 0.125, %v1585_v41 }
 0x274   : > { %v1571_v2 = vadd.f32 %v1570_v13, %v1569_v6  ;;  %v1613_v20 = vsub.f32 %v1597_v31, %v1605_v14  ;;  %v1608_v57 = vmul.f32 %v7399_v15, %v7399_v15  ;;  %v1626_v21 = vadd.f32 1e-05, %v1618_v16 }
 0x275   : > { %v6148_v51 = vpop.eup %6147  ;;  %v1628_v22 = vadd.f32 1e-05, %v1620_v17  ;;  %v1614_v23 = vsub.f32 %v1598_v4, %v1606_v58  ;;  %v7407_v24 = vmul.f32 0.125, %v1529_v0  ;;  %v1674_v25 = vlaneseq }
 0x276   : > { %v1572_v26 = vrot.slane %v1571_v2, 1  ;;  %v1621_v27 = vmax.f32 %v1613_v20, 0.0  ;;  %v1616_v28 = vsub.f32 %v1600_v11, %v1608_v57  ;;  %v1643_v29 = vmul.f32 %v6148_v51, %v7412_v37 }
 0x277   : > { %6149 = vrsqrt.f32 %v1626_v21  ;;  %v1622_v30 = vmax.f32 %v1614_v23, 0.0  ;;  %v1609_v31 = vmul.f32 %v7407_v24, %v7407_v24  ;;  %v1607_v33 = vmul.f32 %v7403_v18, %v7403_v18 }
 0x278   : > { %v1573_v32 = vadd.f32 %v1572_v26, %v1571_v2  ;;  %6151 = vrsqrt.f32 %v1628_v22  ;;  %v1629_v34 = vadd.f32 1e-05, %v1621_v27  ;;  %v1624_v38 = vmax.f32 %v1616_v28, 0.0 }
 0x279   : > { %v1630_v35 = vadd.f32 1e-05, %v1622_v30  ;;  %v1617_v39 = vsub.f32 %v1601_v19, %v1609_v31  ;;  %v7419_v40 = vshrl.u32 %v1674_v25, 7  ;;  %v1651_v43 = vmul.f32 %v1643_v29, %v7356_v1 }
 0x27a   : > { %v1599_v42 = vmul.f32 0.125, %v1573_v32  ;;  %6153 = vrsqrt.f32 %v1629_v34  ;;  %v1632_v44 = vadd.f32 1e-05, %v1624_v38 }
 0x27b   : > { %v1625_v45 = vmax.f32 %v1617_v39, 0.0  ;;  %6155 = vrsqrt.f32 %v1630_v35  ;;  %v1659_v62 = vsub.f32 %v7425_v60, %v1651_v43  ;;  %v7429_v0 = vsub.s32 0, %v7419_v40 }
 0x27c   : > { %v1615_v47 = vsub.f32 %v1599_v42, %v1607_v33  ;;  %6157 = vrsqrt.f32 %v1632_v44 }
 0x27d   : > { %v1633_v54 = vadd.f32 1e-05, %v1625_v45  ;;  %v1681_v36 = vrot.slane %v1643_v29, %v7429_v0  ;;  %v1737_v5 = vrot.slane %v1659_v62, %v7429_v0 }
 0x27e   : > { %v1623_v61 = vmax.f32 %v1615_v47, 0.0 }
 0x27f   : > { %6159 = vrsqrt.f32 %v1633_v54  ;;  %v1715_v11 = vmul.f32 %v1681_v36, %v7330_v63 }
 0x280   : > { %v1631_v1 = vadd.f32 1e-05, %v1623_v61 }
 0x281   : > { %v6150_v50 = vpop.eup %6149  ;;  %v1771_v2 = vadd.f32 %v1737_v5, %v1715_v11 }
 0x282   : > { %v6152_v3 = vpop.eup %6151  ;;  %v1642_v4 = vmul.f32 %v6150_v50, %v7412_v37  ;;  %6161 = vrsqrt.f32 %v1631_v1 }
 0x283   : > { %v1644_v6 = vmul.f32 %v6152_v3, %v7412_v37  ;;  %v1779_v30 = vmax.f32 %v1771_v2, 0.0  ;;  %v2237_v2 = vld [vmem:[%s8681_s11 + $0x38] sm:$0xff] }
 0x284   : > { %v1650_v41 = vmul.f32 %v1642_v4, %v7381_v49  ;;  %v1677_v7 = vrot.slane %v1642_v4, %v7429_v0  ;;  %v6154_v10 = vpop.eup %6153 }
 0x285   : > { %v1652_v13 = vmul.f32 %v1644_v6, %v7384_v52  ;;  %v1685_v14 = vrot.slane %v1644_v6, %v7429_v0  ;;  %v6156_v16 = vpop.eup %6155  ;;  %v1645_v58 = vmul.f32 %v6154_v10, %v7412_v37 }
 0x286   : > { %v1658_v17 = vsub.f32 %v7425_v60, %v1650_v41  ;;  %v6158_v19 = vpop.eup %6157  ;;  %v1714_v20 = vmul.f32 %v1677_v7, %v7320_v55  ;;  %v1646_v57 = vmul.f32 %v6156_v16, %v7412_v37  ;;  %v2234_v16 = vld [vmem:[%s8681_s11 + $0x20] sm:$0xff] }
 0x287   : > { %v1660_v49 = vsub.f32 %v7425_v60, %v1652_v13  ;;  %v1653_v63 = vmul.f32 %v1645_v58, %v7391_v46  ;;  %v1689_v52 = vrot.slane %v1645_v58, %v7429_v0  ;;  %v1648_v21 = vmul.f32 %v6158_v19, %v7412_v37  ;;  %v2233_v13 = vld [vmem:[%s8681_s11 + $0x18] sm:$0xff]  ;;  %v2236_v19 = vld [vmem:[%s8681_s11 + $0x30] sm:$0xff] }
 0x288   : > { %v1733_v51 = vrot.slane %v1658_v17, %v7429_v0  ;;  %v1716_v23 = vmul.f32 %v1685_v14, %v7318_v53  ;;  %v1654_v26 = vmul.f32 %v1646_v57, %v7395_v9  ;;  %v1693_v55 = vrot.slane %v1646_v57, %v7429_v0  ;;  %v2235_v17 = vld [vmem:[%s8681_s11 + $0x28] sm:$0xff] }
 0x289   : > { %v6160_v22 = vpop.eup %6159  ;;  %v1741_v25 = vrot.slane %v1660_v49, %v7429_v0  ;;  %v1661_v28 = vsub.f32 %v7425_v60, %v1653_v63  ;;  %v1656_v29 = vmul.f32 %v1648_v21, %v7399_v15  ;;  %v1717_v31 = vmul.f32 %v1689_v52, %v7325_v59 }
 0x28a   : > { %v1770_v27 = vadd.f32 %v1733_v51, %v1714_v20  ;;  %v1662_v32 = vsub.f32 %v7425_v60, %v1654_v26  ;;  %v1649_v9 = vmul.f32 %v6160_v22, %v7412_v37  ;;  %v1718_v38 = vmul.f32 %v1693_v55, %v7347_v56 }
 0x28b   : > { %v1772_v46 = vadd.f32 %v1741_v25, %v1716_v23  ;;  %v1745_v53 = vrot.slane %v1661_v28, %v7429_v0  ;;  %v1664_v35 = vsub.f32 %v7425_v60, %v1656_v29  ;;  %v1701_v59 = vrot.slane %v1648_v21, %v7429_v0 }
 0x28c   : > { %v6162_v33 = vpop.eup %6161  ;;  %v1778_v34 = vmax.f32 %v1770_v27, 0.0  ;;  %v1749_v39 = vrot.slane %v1662_v32, %v7429_v0  ;;  %v1657_v44 = vmul.f32 %v1649_v9, %v7407_v24  ;;  %v1705_v50 = vrot.slane %v1649_v9, %v7429_v0 }
 0x28d   : > { %v1647_v15 = vmul.f32 %v6162_v33, %v7412_v37  ;;  %v1780_v42 = vmax.f32 %v1772_v46, 0.0  ;;  %v1773_v43 = vadd.f32 %v1745_v53, %v1717_v31  ;;  %v1757_v56 = vrot.slane %v1664_v35, %v7429_v0 }
 0x28e   : > { %5671 = vmatprep.mubr.f32.mxu1 %v1778_v34  ;;  %v1774_v45 = vadd.f32 %v1749_v39, %v1718_v38  ;;  %v1665_v61 = vsub.f32 %v7425_v60, %v1657_v44  ;;  %v1720_v36 = vmul.f32 %v1701_v59, %v7344_v48  ;;  %v1721_v6 = vmul.f32 %v1705_v50, %v7368_v8  ;;  %v2230_v48 = vld [vmem:[%s8681_s11] sm:$0xff]  ;;  %v2232_v8 = vld [vmem:[%s8681_s11 + $0x10] sm:$0xff] }
 0x28f   : > { %5672 = vmatmul.mubr.f32.vlgmr.msra.gmra.mrb[16].mxu1 %v1779_v30  ;;  %v1655_v47 = vmul.f32 %v1647_v15, %v7403_v18  ;;  %v1697_v54 = vrot.slane %v1647_v15, %v7429_v0  ;;  %v1781_v62 = vmax.f32 %v1773_v43, 0.0  ;;  %v5855_v14 = vpack.c.bf16 %v2233_v13, %v2232_v8 }
 0x290   : > { %5674 = vmatprep.mubr.f32.mxu1 %v1780_v42  ;;  %v1782_v37 = vmax.f32 %v1774_v45, 0.0  ;;  %v1761_v3 = vrot.slane %v1665_v61, %v7429_v0  ;;  %v1776_v4 = vadd.f32 %v1757_v56, %v1720_v36  ;;  %v5859_v58 = vpack.c.bf16 %v2235_v17, %v2234_v16 }
 0x291   : > { %v1663_v1 = vsub.f32 %v7425_v60, %v1655_v47  ;;  %v1719_v24 = vmul.f32 %v1697_v54, %v7371_v12  ;;  %v2231_v12 = vld [vmem:[%s8681_s11 + $0x8] sm:$0xff]  ;;  %v5863_v20 = vpack.c.bf16 %v2237_v2, %v2236_v19 }
 0x292   : > { %v1777_v7 = vadd.f32 %v1761_v3, %v1721_v6  ;;  %v1784_v10 = vmax.f32 %v1776_v4, 0.0  ;;  %v5851_v11 = vpack.c.bf16 %v2231_v12, %v2230_v48 }
 0x293   : > { %5675 = vmatmul.mubr.f32.gmra.mrb[18].mxu1 %v1781_v62  ;;  %v1753_v18 = vrot.slane %v1663_v1, %v7429_v0 }
 0x294   : > { %5677 = vmatprep.mubr.f32.mxu1 %v1782_v37  ;;  %v1785_v60 = vmax.f32 %v1777_v7, 0.0  ;;  %5852 = vmatprep.subr.bf16.mxu0 %v5851_v11 }
 0x295   : > { %v1775_v5 = vadd.f32 %v1753_v18, %v1719_v24  ;;  %5854 = vmatpush3.bf16.msra.mxu0 %v5851_v11 }
 0x296   : > { %5856 = vmatprep.subr.bf16.mxu0 %v5855_v14 }
 0x297   : > { %v1783_v41 = vmax.f32 %v1775_v5, 0.0 }
 0x299   : > { %5678 = vmatmul.mubr.f32.gmra.mrb[20].mxu1 %v1783_v41  ;;  %5858 = vmatpush3.bf16.msra.mxu0 %v5855_v14 }
 0x29a   : > { %5680 = vmatprep.mubr.f32.mxu1 %v1784_v10  ;;  %5860 = vmatprep.subr.bf16.mxu0 %v5859_v58 }
 0x29d   : > { %5681 = vmatmul.mubr.f32.gmra.mrb[22].mxu1 %v1785_v60  ;;  %5862 = vmatpush3.bf16.msra.mxu0 %v5859_v58 }
 0x29e   : > { %5864 = vmatprep.subr.bf16.mxu0 %v5863_v20 }
 0x2a1   : > { %5866 = vmatpush3.bf16.msra.mxu0 %v5863_v20 }
 0x362   : > { %v7500_v49 = vpop.f32.mrb[16].mxu1 }
 0x363   : > { %v1917_v57 = vsel %vm1909_vm0, %v7500_v49, 0.0  ;;  %v1967_v51 = vmul.f32 %v7500_v49, %v7500_v49  ;;  %v7506_v63 = vpop.f32.mrb[17].mxu1 }
 0x364   : > { %v1918_v52 = vrot.slane %v1917_v57, 4  ;;  %v1910_v21 = vsel %vm1909_vm0, %v7506_v63, 0.0  ;;  %v1966_v22 = vmul.f32 %v7506_v63, %v7506_v63 }
 0x365   : > { %v1981_v23 = vsel %vm1909_vm0, %v1967_v51, 0.0  ;;  %v1911_v25 = vrot.slane %v1910_v21, 4 }
 0x366   : > { %v1919_v26 = vadd.f32 %v1918_v52, %v1917_v57  ;;  %v1982_v55 = vrot.slane %v1981_v23, 4  ;;  %v1974_v27 = vsel %vm1909_vm0, %v1966_v22, 0.0  ;;  %v7514_v28 = vpop.f32.mrb[18].mxu1 }
 0x367   : > { %v1912_v29 = vadd.f32 %v1911_v25, %v1910_v21  ;;  %v1975_v30 = vrot.slane %v1974_v27, 4  ;;  %v1931_v46 = vsel %vm1909_vm0, %v7514_v28, 0.0  ;;  %v1969_v31 = vmul.f32 %v7514_v28, %v7514_v28  ;;  %v7520_v32 = vpop.f32.mrb[19].mxu1 }
 0x368   : > { %v1920_v33 = vrot.slane %v1919_v26, 2  ;;  %v1983_v34 = vadd.f32 %v1982_v55, %v1981_v23  ;;  %v1932_v53 = vrot.slane %v1931_v46, 4  ;;  %v1924_v35 = vsel %vm1909_vm0, %v7520_v32, 0.0 }
 0x369   : > { %v1913_v9 = vrot.slane %v1912_v29, 2  ;;  %v1976_v38 = vadd.f32 %v1975_v30, %v1974_v27  ;;  %v1995_v39 = vsel %vm1909_vm0, %v1969_v31, 0.0  ;;  %v1925_v15 = vrot.slane %v1924_v35, 4 }
 0x36a   : > { %v1921_v42 = vadd.f32 %v1920_v33, %v1919_v26  ;;  %v1984_v43 = vrot.slane %v1983_v34, 2  ;;  %v1933_v59 = vadd.f32 %v1932_v53, %v1931_v46  ;;  %v1996_v44 = vrot.slane %v1995_v39, 4 }
 0x36b   : > { %v1914_v45 = vadd.f32 %v1913_v9, %v1912_v29  ;;  %v1977_v47 = vrot.slane %v1976_v38, 2  ;;  %v1926_v54 = vadd.f32 %v1925_v15, %v1924_v35  ;;  %v1968_v56 = vmul.f32 %v7520_v32, %v7520_v32 }
 0x36c   : > { %v1922_v61 = vrot.slane %v1921_v42, 1  ;;  %v1985_v62 = vadd.f32 %v1984_v43, %v1983_v34  ;;  %v1934_v37 = vrot.slane %v1933_v59, 2  ;;  %v1997_v1 = vadd.f32 %v1996_v44, %v1995_v39  ;;  %v7527_v50 = vpop.f32.mrb[20].mxu1 }
 0x36d   : > { %v1915_v36 = vrot.slane %v1914_v45, 1  ;;  %v1978_v24 = vadd.f32 %v1977_v47, %v1976_v38  ;;  %v1927_v18 = vrot.slane %v1926_v54, 2  ;;  %v1988_v3 = vsel %vm1909_vm0, %v1968_v56, 0.0  ;;  %v7530_v4 = vpop.f32.mrb[21].mxu1 }
 0x36e   : > { %v1923_v5 = vadd.f32 %v1922_v61, %v1921_v42  ;;  %v1986_v6 = vrot.slane %v1985_v62, 1  ;;  %v1935_v41 = vadd.f32 %v1934_v37, %v1933_v59  ;;  %v1998_v7 = vrot.slane %v1997_v1, 2 }
 0x36f   : > { %v1916_v10 = vadd.f32 %v1915_v36, %v1914_v45  ;;  %v1979_v60 = vrot.slane %v1978_v24, 1  ;;  %v1928_v48 = vadd.f32 %v1927_v18, %v1926_v54  ;;  %v1989_v12 = vrot.slane %v1988_v3, 4 }
 0x370   : > { %v1987_v11 = vadd.f32 %v1986_v6, %v1985_v62  ;;  %v7532_v8 = vmul.f32 0.125, %v1923_v5  ;;  %v1936_v13 = vrot.slane %v1935_v41, 1  ;;  %v1999_v14 = vadd.f32 %v1998_v7, %v1997_v1  ;;  %v7534_v16 = vpop.f32.mrb[22].mxu1 }
 0x371   : > { %v1980_v17 = vadd.f32 %v1979_v60, %v1978_v24  ;;  %v7536_v58 = vmul.f32 0.125, %v1916_v10  ;;  %v1929_v19 = vrot.slane %v1928_v48, 1  ;;  %v1990_v2 = vadd.f32 %v1989_v12, %v1988_v3  ;;  %v7538_v20 = vpop.f32.mrb[23].mxu1 }
 0x372   : > { %v2039_v57 = vmul.f32 0.125, %v1987_v11  ;;  %v2047_v51 = vmul.f32 %v7532_v8, %v7532_v8  ;;  %v1937_v52 = vadd.f32 %v1936_v13, %v1935_v41  ;;  %v2000_v21 = vrot.slane %v1999_v14, 1 }
 0x373   : > { %v2038_v22 = vmul.f32 0.125, %v1980_v17  ;;  %v2046_v23 = vmul.f32 %v7536_v58, %v7536_v58  ;;  %v1930_v25 = vadd.f32 %v1929_v19, %v1928_v48  ;;  %v1991_v26 = vrot.slane %v1990_v2, 2 }
 0x374   : > { %v2055_v55 = vsub.f32 %v2039_v57, %v2047_v51  ;;  %v2001_v27 = vadd.f32 %v2000_v21, %v1999_v14  ;;  %v7544_v29 = vmul.f32 0.125, %v1937_v52  ;;  %v1945_v30 = vsel %vm1909_vm0, %v7527_v50, 0.0 }
 0x375   : > { %v2054_v46 = vsub.f32 %v2038_v22, %v2046_v23  ;;  %v1992_v31 = vadd.f32 %v1991_v26, %v1990_v2  ;;  %v7548_v33 = vmul.f32 0.125, %v1930_v25  ;;  %v1946_v34 = vrot.slane %v1945_v30, 4 }
 0x376   : > { %v2063_v53 = vmax.f32 %v2055_v55, 0.0  ;;  %v2041_v35 = vmul.f32 0.125, %v2001_v27  ;;  %v2049_v9 = vmul.f32 %v7544_v29, %v7544_v29  ;;  %v1971_v38 = vmul.f32 %v7527_v50, %v7527_v50  ;;  %v7572_v55 = vld [vmem:[%s8682_s13] sm:$0x1] }
 0x377   : > { %v2062_v39 = vmax.f32 %v2054_v46, 0.0  ;;  %v1993_v15 = vrot.slane %v1992_v31, 1  ;;  %v2048_v42 = vmul.f32 %v7548_v33, %v7548_v33  ;;  %v1947_v43 = vadd.f32 %v1946_v34, %v1945_v30 }
 0x378   : > { %v2071_v59 = vadd.f32 1e-05, %v2063_v53  ;;  %v2057_v44 = vsub.f32 %v2041_v35, %v2049_v9  ;;  %v2009_v45 = vsel %vm1909_vm0, %v1971_v38, 0.0  ;;  %v1938_v47 = vsel %vm1909_vm0, %v7530_v4, 0.0 }
 0x379   : > { %v2070_v54 = vadd.f32 1e-05, %v2062_v39  ;;  %v1994_v56 = vadd.f32 %v1993_v15, %v1992_v31  ;;  %v1948_v61 = vrot.slane %v1947_v43, 2  ;;  %v2010_v62 = vrot.slane %v2009_v45, 4 }
 0x37a   : > { %6163 = vrsqrt.f32 %v2071_v59  ;;  %v2065_v37 = vmax.f32 %v2057_v44, 0.0  ;;  %v1939_v1 = vrot.slane %v1938_v47, 4  ;;  %v1970_v36 = vmul.f32 %v7530_v4, %v7530_v4 }
 0x37b   : > { %6165 = vrsqrt.f32 %v2070_v54  ;;  %v2040_v24 = vmul.f32 0.125, %v1994_v56  ;;  %v1949_v18 = vadd.f32 %v1948_v61, %v1947_v43  ;;  %v2011_v3 = vadd.f32 %v2010_v62, %v2009_v45 }
 0x37c   : > { %v2073_v5 = vadd.f32 1e-05, %v2065_v37  ;;  %v1940_v6 = vadd.f32 %v1939_v1, %v1938_v47  ;;  %v2002_v41 = vsel %vm1909_vm0, %v1970_v36, 0.0  ;;  %v1959_v7 = vsel %vm1909_vm0, %v7534_v16, 0.0  ;;  %v7582_v47 = vld [vmem:[%s8683_s23] sm:$0x1] }
 0x37d   : > { %v2056_v10 = vsub.f32 %v2040_v24, %v2048_v42  ;;  %v1950_v60 = vrot.slane %v1949_v18, 1  ;;  %v2012_v48 = vrot.slane %v2011_v3, 2  ;;  %v2003_v12 = vrot.slane %v2002_v41, 4 }
 0x37e   : > { %6167 = vrsqrt.f32 %v2073_v5  ;;  %v1941_v11 = vrot.slane %v1940_v6, 2  ;;  %v1960_v13 = vrot.slane %v1959_v7, 4  ;;  %v1973_v14 = vmul.f32 %v7534_v16, %v7534_v16 }
 0x37f   : > { %v2064_v17 = vmax.f32 %v2056_v10, 0.0  ;;  %v1951_v19 = vadd.f32 %v1950_v60, %v1949_v18  ;;  %v2013_v2 = vadd.f32 %v2012_v48, %v2011_v3  ;;  %v2004_v57 = vadd.f32 %v2003_v12, %v2002_v41 }
 0x380   : > { %v1942_v51 = vadd.f32 %v1941_v11, %v1940_v6  ;;  %v1961_v52 = vadd.f32 %v1960_v13, %v1959_v7  ;;  %v2023_v21 = vsel %vm1909_vm0, %v1973_v14, 0.0  ;;  %v1952_v31 = vsel %vm1909_vm0, %v7538_v20, 0.0 }
 0x381   : > { %v2072_v22 = vadd.f32 1e-05, %v2064_v17  ;;  %v2014_v23 = vrot.slane %v2013_v2, 1  ;;  %v7567_v25 = vmul.f32 0.125, %v1951_v19  ;;  %v2005_v26 = vrot.slane %v2004_v57, 2 }
 0x382   : > { %v1943_v27 = vrot.slane %v1942_v51, 1  ;;  %v1962_v30 = vrot.slane %v1961_v52, 2  ;;  %v2024_v46 = vrot.slane %v2023_v21, 4  ;;  %v1953_v45 = vrot.slane %v1952_v31, 4 }
 0x383   : > { %6169 = vrsqrt.f32 %v2072_v22  ;;  %v2015_v34 = vadd.f32 %v2014_v23, %v2013_v2  ;;  %v2051_v53 = vmul.f32 %v7567_v25, %v7567_v25  ;;  %v2006_v35 = vadd.f32 %v2005_v26, %v2004_v57 }
 0x384   : > { %v6164_v9 = vpop.eup %6163  ;;  %v1944_v38 = vadd.f32 %v1943_v27, %v1942_v51  ;;  %v1963_v39 = vadd.f32 %v1962_v30, %v1961_v52  ;;  %v2025_v15 = vadd.f32 %v2024_v46, %v2023_v21  ;;  %v1954_v48 = vadd.f32 %v1953_v45, %v1952_v31 }
 0x385   : > { %v6166_v42 = vpop.eup %6165  ;;  %v2087_v43 = vmul.f32 %v6164_v9, %v7572_v55  ;;  %v2043_v59 = vmul.f32 0.125, %v2015_v34  ;;  %v2007_v44 = vrot.slane %v2006_v35, 1  ;;  %v1972_v23 = vmul.f32 %v7538_v20, %v7538_v20 }
 0x386   : > { %v2086_v54 = vmul.f32 %v6166_v42, %v7572_v55  ;;  %v7585_v56 = vmul.f32 0.125, %v1944_v38  ;;  %v1964_v61 = vrot.slane %v1963_v39, 1  ;;  %v2026_v62 = vrot.slane %v2025_v15, 2 }
 0x387   : > { %v2095_v37 = vmul.f32 %v2087_v43, %v7532_v8  ;;  %v2125_v1 = vrot.slane %v2087_v43, %v7429_v0  ;;  %v2059_v36 = vsub.f32 %v2043_v59, %v2051_v53  ;;  %v2008_v24 = vadd.f32 %v2007_v44, %v2006_v35 }
 0x388   : > { %v6168_v18 = vpop.eup %6167  ;;  %v2094_v3 = vmul.f32 %v2086_v54, %v7536_v58  ;;  %v2121_v5 = vrot.slane %v2086_v54, %v7429_v0  ;;  %v2050_v6 = vmul.f32 %v7585_v56, %v7585_v56  ;;  %v1965_v41 = vadd.f32 %v1964_v61, %v1963_v39 }
 0x389   : > { %v2103_v7 = vsub.f32 %v7582_v47, %v2095_v37  ;;  %v2089_v10 = vmul.f32 %v6168_v18, %v7572_v55  ;;  %v2067_v60 = vmax.f32 %v2059_v36, 0.0  ;;  %v2159_v8 = vmul.f32 %v7500_v49, %v2125_v1 }
 0x38a   : > { %v2102_v12 = vsub.f32 %v7582_v47, %v2094_v3  ;;  %v2042_v11 = vmul.f32 0.125, %v2008_v24  ;;  %v2027_v13 = vadd.f32 %v2026_v62, %v2025_v15  ;;  %v2158_v14 = vmul.f32 %v2121_v5, %v7506_v63 }
 0x38b   : > { %v2181_v58 = vrot.slane %v2103_v7, %v7429_v0  ;;  %v2097_v17 = vmul.f32 %v2089_v10, %v7544_v29  ;;  %v2075_v19 = vadd.f32 1e-05, %v2067_v60  ;;  %v7601_v52 = vmul.f32 0.125, %v1965_v41 }
 0x38c   : > { %v2177_v2 = vrot.slane %v2102_v12, %v7429_v0  ;;  %v2058_v57 = vsub.f32 %v2042_v11, %v2050_v6  ;;  %v2028_v51 = vrot.slane %v2027_v13, 1  ;;  %v2133_v46 = vrot.slane %v2089_v10, %v7429_v0 }
 0x38d   : > { %v6170_v21 = vpop.eup %6169  ;;  %v2215_v22 = vadd.f32 %v2181_v58, %v2159_v8  ;;  %v2105_v49 = vsub.f32 %v7582_v47, %v2097_v17  ;;  %6171 = vrsqrt.f32 %v2075_v19  ;;  %v2053_v31 = vmul.f32 %v7601_v52, %v7601_v52 }
 0x38e   : > { %v2214_v26 = vadd.f32 %v2177_v2, %v2158_v14  ;;  %v2088_v63 = vmul.f32 %v6170_v21, %v7572_v55  ;;  %v2066_v27 = vmax.f32 %v2058_v57, 0.0  ;;  %v2029_v29 = vadd.f32 %v2028_v51, %v2027_v13 }
 0x38f   : > { %v2223_v30 = vmax.f32 %v2215_v22, 0.0  ;;  %v1955_v34 = vrot.slane %v1954_v48, 2  ;;  %v2189_v39 = vrot.slane %v2105_v49, %v7429_v0  ;;  %v2016_v43 = vsel %vm1909_vm0, %v1972_v23, 0.0 }
 0x390   : > { %v2222_v53 = vmax.f32 %v2214_v26, 0.0  ;;  %v2096_v35 = vmul.f32 %v2088_v63, %v7548_v33  ;;  %v2129_v9 = vrot.slane %v2088_v63, %v7429_v0  ;;  %v2074_v38 = vadd.f32 1e-05, %v2066_v27 }
 0x391   : > { %v2045_v15 = vmul.f32 0.125, %v2029_v29  ;;  %v1956_v42 = vadd.f32 %v1955_v34, %v1954_v48  ;;  %v2017_v44 = vrot.slane %v2016_v43, 4  ;;  %v2161_v45 = vmul.f32 %v7514_v28, %v2133_v46 }
 0x392   : > { %v2104_v59 = vsub.f32 %v7582_v47, %v2096_v35  ;;  %6173 = vrsqrt.f32 %v2074_v38  ;;  %5699 = vmatprep.mubr.msk.f32.mxu0 %vm1909_vm0, %v2222_v53  ;;  %v2160_v33 = vmul.f32 %v2129_v9, %v7520_v32 }
 0x393   : > { %v2061_v54 = vsub.f32 %v2045_v15, %v2053_v31  ;;  %v1957_v61 = vrot.slane %v1956_v42, 1  ;;  %5700 = vmatmul.mubr.msk.f32.vlgmr.msra.gmra.mrb[24].mxu0 %vm1909_vm0, %v2223_v30  ;;  %v2018_v37 = vadd.f32 %v2017_v44, %v2016_v43  ;;  %v2217_v1 = vadd.f32 %v2189_v39, %v2161_v45 }
 0x394   : > { %v2185_v62 = vrot.slane %v2104_v59, %v7429_v0 }
 0x395   : > { %v2069_v36 = vmax.f32 %v2061_v54, 0.0  ;;  %v1958_v24 = vadd.f32 %v1957_v61, %v1956_v42  ;;  %v2019_v3 = vrot.slane %v2018_v37, 2  ;;  %v2225_v60 = vmax.f32 %v2217_v1, 0.0  ;;  %v2693_v54 = vld [vmem:[%s8601_s10 + $0x18] sm:$0xff] }
 0x396   : > { %v2216_v18 = vadd.f32 %v2185_v62, %v2160_v33 }
 0x397   : > { %v6172_v5 = vpop.eup %6171  ;;  %v2077_v6 = vadd.f32 1e-05, %v2069_v36  ;;  %v2020_v28 = vadd.f32 %v2019_v3, %v2018_v37  ;;  %v2036_v10 = vmul.f32 0.125, %v1958_v24 }
 0x398   : > { %v2224_v41 = vmax.f32 %v2216_v18, 0.0  ;;  %v2091_v7 = vmul.f32 %v6172_v5, %v7572_v55 }
 0x399   : > { %v2021_v8 = vrot.slane %v2020_v28, 1  ;;  %6175 = vrsqrt.f32 %v2077_v6  ;;  %v2052_v13 = vmul.f32 %v2036_v10, %v2036_v10 }
 0x39a   : > { %v2099_v48 = vmul.f32 %v2091_v7, %v7567_v25  ;;  %5702 = vmatprep.mubr.msk.f32.mxu0 %vm1909_vm0, %v2224_v41  ;;  %v2141_v14 = vrot.slane %v2091_v7, %v7429_v0 }
 0x39b   : > { %5703 = vmatmul.mubr.msk.f32.gmra.mrb[26].mxu0 %vm1909_vm0, %v2225_v60  ;;  %v2022_v11 = vadd.f32 %v2021_v8, %v2020_v28 }
 0x39c   : > { %v6174_v32 = vpop.eup %6173  ;;  %v2107_v12 = vsub.f32 %v7582_v47, %v2099_v48  ;;  %v2163_v21 = vmul.f32 %v7527_v50, %v2141_v14 }
 0x39d   : > { %v2090_v58 = vmul.f32 %v6174_v32, %v7572_v55  ;;  %v2044_v17 = vmul.f32 0.125, %v2022_v11 }
 0x39e   : > { %v2197_v2 = vrot.slane %v2107_v12, %v7429_v0 }
 0x39f   : > { %v2098_v19 = vmul.f32 %v2090_v58, %v7585_v56  ;;  %v2137_v25 = vrot.slane %v2090_v58, %v7429_v0  ;;  %v2060_v57 = vsub.f32 %v2044_v17, %v2052_v13 }
 0x3a0   : > { %v2219_v26 = vadd.f32 %v2197_v2, %v2163_v21 }
 0x3a1   : > { %v2106_v51 = vsub.f32 %v7582_v47, %v2098_v19  ;;  %v2068_v22 = vmax.f32 %v2060_v57, 0.0  ;;  %v2162_v49 = vmul.f32 %v2137_v25, %v7530_v4 }
 0x3a2   : > { %v2227_v30 = vmax.f32 %v2219_v26, 0.0 }
 0x3a3   : > { %v2193_v23 = vrot.slane %v2106_v51, %v7429_v0  ;;  %v2076_v63 = vadd.f32 1e-05, %v2068_v22  ;;  %v6176_v27 = vpop.eup %6175 }
 0x3a4   : > { %v2093_v46 = vmul.f32 %v6176_v27, %v7572_v55 }
 0x3a5   : > { %v2218_v29 = vadd.f32 %v2193_v23, %v2162_v49  ;;  %6177 = vrsqrt.f32 %v2076_v63 }
 0x3a6   : > { %v2101_v50 = vmul.f32 %v2093_v46, %v7601_v52  ;;  %v2149_v53 = vrot.slane %v2093_v46, %v7429_v0 }
 0x3a7   : > { %v2226_v56 = vmax.f32 %v2218_v29, 0.0 }
 0x3a8   : > { %v2109_v4 = vsub.f32 %v7582_v47, %v2101_v50  ;;  %v2165_v15 = vmul.f32 %v7534_v16, %v2149_v53  ;;  %v2691_v16 = vld [vmem:[%s8601_s10 + $0x8] sm:$0xff] }
 0x3a9   : > { %5705 = vmatprep.mubr.msk.f32.mxu0 %vm1909_vm0, %v2226_v56 }
 0x3aa   : > { %5706 = vmatmul.mubr.msk.f32.gmra.mrb[28].mxu0 %vm1909_vm0, %v2227_v30  ;;  %v2205_v38 = vrot.slane %v2109_v4, %v7429_v0 }
 0x3ac   : > { %v2221_v43 = vadd.f32 %v2205_v38, %v2165_v15 }
 0x3ae   : > { %v2229_v45 = vmax.f32 %v2221_v43, 0.0 }
 0x3af   : > { %v6178_v31 = vpop.eup %6177 }
 0x3b0   : > { %v2092_v34 = vmul.f32 %v6178_v31, %v7572_v55  ;;  %v2690_v55 = vld [vmem:[%s8601_s10] sm:$0xff] }
 0x3b2   : > { %v2100_v35 = vmul.f32 %v2092_v34, %v2036_v10  ;;  %v2145_v9 = vrot.slane %v2092_v34, %v7429_v0 }
 0x3b4   : > { %v2108_v39 = vsub.f32 %v7582_v47, %v2100_v35  ;;  %v2164_v42 = vmul.f32 %v2145_v9, %v7538_v20  ;;  %v5867_v47 = vpack.c.bf16 %v2691_v16, %v2690_v55  ;;  %v2692_v20 = vld [vmem:[%s8601_s10 + $0x10] sm:$0xff] }
 0x3b5   : > { %v5871_v61 = vpack.c.bf16 %v2693_v54, %v2692_v20 }
 0x3b6   : > { %v2201_v52 = vrot.slane %v2108_v39, %v7429_v0  ;;  %5868 = vmatprep.subr.bf16.mxu1 %v5867_v47 }
 0x3b7   : > { %5870 = vmatpush3.bf16.msra.mxu1 %v5867_v47 }
 0x3b8   : > { %v2220_v59 = vadd.f32 %v2201_v52, %v2164_v42  ;;  %5872 = vmatprep.subr.bf16.mxu1 %v5871_v61 }
 0x3ba   : > { %v2228_v44 = vmax.f32 %v2220_v59, 0.0 }
 0x3bb   : > { %5874 = vmatpush3.bf16.msra.mxu1 %v5871_v61 }
 0x3bc   : > { %5708 = vmatprep.mubr.msk.f32.mxu0 %vm1909_vm0, %v2228_v44 }
 0x3bd   : > { %5709 = vmatmul.mubr.msk.f32.gmra.mrb[30].mxu0 %vm1909_vm0, %v2229_v45 }
 0x466   : > { %v7661_v33 = vpop.f32.mrb[24].mxu0 }
 0x467   : > { %v2377_v62 = vsel %vm2369_vm1, %v7661_v33, 0.0  ;;  %v2427_v37 = vmul.f32 %v7661_v33, %v7661_v33  ;;  %v7667_v1 = vpop.f32.mrb[25].mxu0 }
 0x468   : > { %v2378_v36 = vrot.slane %v2377_v62, 4  ;;  %v2370_v24 = vsel %vm2369_vm1, %v7667_v1, 0.0  ;;  %v2426_v18 = vmul.f32 %v7667_v1, %v7667_v1 }
 0x469   : > { %v2441_v3 = vsel %vm2369_vm1, %v2427_v37, 0.0  ;;  %v2371_v5 = vrot.slane %v2370_v24, 4 }
 0x46a   : > { %v2379_v6 = vadd.f32 %v2378_v36, %v2377_v62  ;;  %v2442_v41 = vrot.slane %v2441_v3, 4  ;;  %v2434_v7 = vsel %vm2369_vm1, %v2426_v18, 0.0 }
 0x46b   : > { %v2372_v28 = vadd.f32 %v2371_v5, %v2370_v24  ;;  %v2435_v10 = vrot.slane %v2434_v7, 4 }
 0x46c   : > { %v2380_v60 = vrot.slane %v2379_v6, 2  ;;  %v2443_v48 = vadd.f32 %v2442_v41, %v2441_v3 }
 0x46d   : > { %v2373_v8 = vrot.slane %v2372_v28, 2  ;;  %v2436_v32 = vadd.f32 %v2435_v10, %v2434_v7 }
 0x46e   : > { %v2381_v12 = vadd.f32 %v2380_v60, %v2379_v6  ;;  %v2444_v11 = vrot.slane %v2443_v48, 2  ;;  %v7675_v13 = vpop.f32.mrb[26].mxu0 }
 0x46f   : > { %v2374_v58 = vadd.f32 %v2373_v8, %v2372_v28  ;;  %v2437_v14 = vrot.slane %v2436_v32, 2  ;;  %v2391_v17 = vsel %vm2369_vm1, %v7675_v13, 0.0  ;;  %v2429_v19 = vmul.f32 %v7675_v13, %v7675_v13  ;;  %v7681_v25 = vpop.f32.mrb[27].mxu0 }
 0x470   : > { %v2382_v2 = vrot.slane %v2381_v12, 1  ;;  %v2445_v57 = vadd.f32 %v2444_v11, %v2443_v48  ;;  %v2392_v51 = vrot.slane %v2391_v17, 4  ;;  %v2384_v21 = vsel %vm2369_vm1, %v7681_v25, 0.0 }
 0x471   : > { %v2375_v22 = vrot.slane %v2374_v58, 1  ;;  %v2438_v49 = vadd.f32 %v2437_v14, %v2436_v32  ;;  %v2455_v23 = vsel %vm2369_vm1, %v2429_v19, 0.0  ;;  %v2385_v26 = vrot.slane %v2384_v21, 4 }
 0x472   : > { %v2383_v63 = vadd.f32 %v2382_v2, %v2381_v12  ;;  %v2446_v27 = vrot.slane %v2445_v57, 1  ;;  %v2393_v29 = vadd.f32 %v2392_v51, %v2391_v17  ;;  %v2456_v56 = vrot.slane %v2455_v23, 4 }
 0x473   : > { %v2376_v30 = vadd.f32 %v2375_v22, %v2374_v58  ;;  %v2439_v46 = vrot.slane %v2438_v49, 1  ;;  %v2386_v50 = vadd.f32 %v2385_v26, %v2384_v21  ;;  %v2428_v31 = vmul.f32 %v7681_v25, %v7681_v25 }
 0x474   : > { %v2447_v4 = vadd.f32 %v2446_v27, %v2445_v57  ;;  %v7688_v34 = vmul.f32 0.125, %v2383_v63  ;;  %v2394_v53 = vrot.slane %v2393_v29, 2  ;;  %v2457_v35 = vadd.f32 %v2456_v56, %v2455_v23 }
 0x475   : > { %v2440_v9 = vadd.f32 %v2439_v46, %v2438_v49  ;;  %v7690_v38 = vmul.f32 0.125, %v2376_v30  ;;  %v2387_v39 = vrot.slane %v2386_v50, 2  ;;  %v2448_v15 = vsel %vm2369_vm1, %v2428_v31, 0.0 }
 0x476   : > { %v2499_v42 = vmul.f32 0.125, %v2447_v4  ;;  %v2507_v52 = vmul.f32 %v7688_v34, %v7688_v34  ;;  %v2395_v43 = vadd.f32 %v2394_v53, %v2393_v29  ;;  %v2458_v59 = vrot.slane %v2457_v35, 2 }
 0x477   : > { %v2498_v44 = vmul.f32 0.125, %v2440_v9  ;;  %v2506_v45 = vmul.f32 %v7690_v38, %v7690_v38  ;;  %v2388_v55 = vadd.f32 %v2387_v39, %v2386_v50  ;;  %v2449_v16 = vrot.slane %v2448_v15, 4  ;;  %v7722_v39 = vld [vmem:[%s8684_s27] sm:$0x1]  ;;  %s6513_s27 = scalar_lea.vmem %s8415_s7, 1024 }
 0x478   : > { %v2515_v47 = vsub.f32 %v2499_v42, %v2507_v52  ;;  %v2396_v20 = vrot.slane %v2395_v43, 1  ;;  %v2459_v54 = vadd.f32 %v2458_v59, %v2457_v35  ;;  %p6514_p4 = scmp.ne.s32.totalorder %s8415_s7, %s6513_s27 }
 0x479   : > { %v2514_v61 = vsub.f32 %v2498_v44, %v2506_v45  ;;  %v2389_v62 = vrot.slane %v2388_v55, 1  ;;  %v2450_v37 = vadd.f32 %v2449_v16, %v2448_v15 }
 0x47a   : > { %v2523_v36 = vmax.f32 %v2515_v47, 0.0  ;;  %v2397_v24 = vadd.f32 %v2396_v20, %v2395_v43  ;;  %v2460_v18 = vrot.slane %v2459_v54, 1  ;;  %p6515_p13 = pnand %p6514_p4, %p8689_p1 }
 0x47b   : > { %v2522_v3 = vmax.f32 %v2514_v61, 0.0  ;;  %v2390_v5 = vadd.f32 %v2389_v62, %v2388_v55  ;;  %v2451_v6 = vrot.slane %v2450_v37, 2  ;;  %v7725_v61 = vld [vmem:[#allocation5] sm:$0x1] }
 0x47c   : > { %v2531_v41 = vadd.f32 1e-05, %v2523_v36  ;;  %v2461_v7 = vadd.f32 %v2460_v18, %v2459_v54  ;;  %v7697_v28 = vmul.f32 0.125, %v2397_v24  ;;  %p6516_p0 = pneg %p6515_p13 }
 0x47d   : > { %v2530_v10 = vadd.f32 1e-05, %v2522_v3  ;;  %v2452_v60 = vadd.f32 %v2451_v6, %v2450_v37  ;;  %v7699_v48 = vmul.f32 0.125, %v2390_v5  ;;  %v7701_v8 = vpop.f32.mrb[28].mxu0 }
 0x47e   : > { %6179 = vrsqrt.f32 %v2531_v41  ;;  %v2501_v32 = vmul.f32 0.125, %v2461_v7  ;;  %v2509_v12 = vmul.f32 %v7697_v28, %v7697_v28  ;;  %v2405_v11 = vsel %vm2369_vm1, %v7701_v8, 0.0  ;;  %v7707_v58 = vpop.f32.mrb[29].mxu0 }
 0x47f   : > { %6181 = vrsqrt.f32 %v2530_v10  ;;  %v2453_v14 = vrot.slane %v2452_v60, 1  ;;  %v2406_v17 = vrot.slane %v2405_v11, 4  ;;  %v2431_v2 = vmul.f32 %v7701_v8, %v7701_v8 }
 0x480   : > { %v2517_v19 = vsub.f32 %v2501_v32, %v2509_v12  ;;  %v2398_v57 = vsel %vm2369_vm1, %v7707_v58, 0.0  ;;  %v2430_v51 = vmul.f32 %v7707_v58, %v7707_v58  ;;  %v2508_v22 = vmul.f32 %v7699_v48, %v7699_v48 }
 0x481   : > { %v2454_v21 = vadd.f32 %v2453_v14, %v2452_v60  ;;  %v2407_v49 = vadd.f32 %v2406_v17, %v2405_v11  ;;  %v2399_v23 = vrot.slane %v2398_v57, 4  ;;  %v2469_v63 = vsel %vm2369_vm1, %v2431_v2, 0.0 }
 0x482   : > { %v2525_v26 = vmax.f32 %v2517_v19, 0.0  ;;  %v2462_v27 = vsel %vm2369_vm1, %v2430_v51, 0.0  ;;  %v2470_v30 = vrot.slane %v2469_v63, 4 }
 0x483   : > { %v2500_v29 = vmul.f32 0.125, %v2454_v21  ;;  %v2408_v56 = vrot.slane %v2407_v49, 2  ;;  %v2400_v46 = vadd.f32 %v2399_v23, %v2398_v57  ;;  %v2463_v31 = vrot.slane %v2462_v27, 4 }
 0x484   : > { %v2533_v50 = vadd.f32 1e-05, %v2525_v26  ;;  %v2471_v35 = vadd.f32 %v2470_v30, %v2469_v63 }
 0x485   : > { %v2516_v4 = vsub.f32 %v2500_v29, %v2508_v22  ;;  %v2409_v53 = vadd.f32 %v2408_v56, %v2407_v49  ;;  %v2401_v9 = vrot.slane %v2400_v46, 2  ;;  %v2464_v15 = vadd.f32 %v2463_v31, %v2462_v27 }
 0x486   : > { %6183 = vrsqrt.f32 %v2533_v50  ;;  %v2472_v43 = vrot.slane %v2471_v35, 2 }
 0x487   : > { %v2524_v42 = vmax.f32 %v2516_v4, 0.0  ;;  %v2410_v52 = vrot.slane %v2409_v53, 1  ;;  %v2402_v59 = vadd.f32 %v2401_v9, %v2400_v46  ;;  %v2465_v45 = vrot.slane %v2464_v15, 2 }
 0x488   : > { %v6180_v44 = vpop.eup %6179  ;;  %v2473_v54 = vadd.f32 %v2472_v43, %v2471_v35 }
 0x489   : > { %v6182_v55 = vpop.eup %6181  ;;  %v2547_v16 = vmul.f32 %v6180_v44, %v7722_v39  ;;  %v2532_v47 = vadd.f32 1e-05, %v2524_v42  ;;  %v2411_v20 = vadd.f32 %v2410_v52, %v2409_v53  ;;  %v2403_v37 = vrot.slane %v2402_v59, 1 }
 0x48a   : > { %v2546_v62 = vmul.f32 %v6182_v55, %v7722_v39  ;;  %v2466_v36 = vadd.f32 %v2465_v45, %v2464_v15  ;;  %v2474_v3 = vrot.slane %v2473_v54, 1 }
 0x48b   : > { %v2555_v24 = vmul.f32 %v2547_v16, %v7688_v34  ;;  %v2585_v18 = vrot.slane %v2547_v16, %v7429_v0  ;;  %6185 = vrsqrt.f32 %v2532_v47  ;;  %v7732_v41 = vmul.f32 0.125, %v2411_v20 }
 0x48c   : > { %v2554_v5 = vmul.f32 %v2546_v62, %v7690_v38  ;;  %v2581_v6 = vrot.slane %v2546_v62, %v7429_v0  ;;  %v2404_v7 = vadd.f32 %v2403_v37, %v2402_v59  ;;  %v2475_v60 = vadd.f32 %v2474_v3, %v2473_v54 }
 0x48d   : > { %v2563_v10 = vsub.f32 %v7725_v61, %v2555_v24  ;;  %v2467_v32 = vrot.slane %v2466_v36, 1  ;;  %v2511_v34 = vmul.f32 %v7732_v41, %v7732_v41  ;;  %v2619_v14 = vmul.f32 %v7661_v33, %v2585_v18 }
 0x48e   : > { %v2562_v12 = vsub.f32 %v7725_v61, %v2554_v5  ;;  %v7738_v11 = vmul.f32 0.125, %v2404_v7  ;;  %v2503_v17 = vmul.f32 0.125, %v2475_v60  ;;  %v2618_v57 = vmul.f32 %v2581_v6, %v7667_v1 }
 0x48f   : > { %v2641_v38 = vrot.slane %v2563_v10, %v7429_v0  ;;  %v2468_v19 = vadd.f32 %v2467_v32, %v2466_v36 }
 0x490   : > { %v6184_v2 = vpop.eup %6183  ;;  %v2637_v51 = vrot.slane %v2562_v12, %v7429_v0  ;;  %v2510_v21 = vmul.f32 %v7738_v11, %v7738_v11  ;;  %v2519_v23 = vsub.f32 %v2503_v17, %v2511_v34  ;;  %v7747_v63 = vpop.f32.mrb[30].mxu0 }
 0x491   : > { %v2675_v22 = vadd.f32 %v2641_v38, %v2619_v14  ;;  %v2549_v49 = vmul.f32 %v6184_v2, %v7722_v39  ;;  %v2502_v26 = vmul.f32 0.125, %v2468_v19  ;;  %v2419_v27 = vsel %vm2369_vm1, %v7747_v63, 0.0  ;;  %v7753_v1 = vpop.f32.mrb[31].mxu0 }
 0x492   : > { %v2674_v33 = vadd.f32 %v2637_v51, %v2618_v57  ;;  %v2433_v29 = vmul.f32 %v7747_v63, %v7747_v63  ;;  %v2527_v30 = vmax.f32 %v2519_v23, 0.0  ;;  %v2420_v31 = vrot.slane %v2419_v27, 4 }
 0x493   : > { %v2557_v56 = vmul.f32 %v2549_v49, %v7697_v28  ;;  %v2518_v50 = vsub.f32 %v2502_v26, %v2510_v21  ;;  %v2683_v35 = vmax.f32 %v2675_v22, 0.0  ;;  %v2412_v44 = vsel %vm2369_vm1, %v7753_v1, 0.0 }
 0x494   : > { %v2682_v46 = vmax.f32 %v2674_v33, 0.0  ;;  %v2483_v4 = vsel %vm2369_vm1, %v2433_v29, 0.0  ;;  %v2535_v15 = vadd.f32 1e-05, %v2527_v30  ;;  %v2421_v59 = vadd.f32 %v2420_v31, %v2419_v27 }
 0x495   : > { %v6186_v53 = vpop.eup %6185  ;;  %v2565_v9 = vsub.f32 %v7725_v61, %v2557_v56  ;;  %v2484_v42 = vrot.slane %v2483_v4, 4  ;;  %v2526_v43 = vmax.f32 %v2518_v50, 0.0  ;;  %v2593_v28 = vrot.slane %v2549_v49, %v7429_v0 }
 0x496   : > { %v2548_v52 = vmul.f32 %v6186_v53, %v7722_v39  ;;  %5719 = vmatprep.mubr.msk.f32.mxu1 %vm2369_vm1, %v2682_v46  ;;  %6187 = vrsqrt.f32 %v2535_v15  ;;  %v2413_v55 = vrot.slane %v2412_v44, 4  ;;  %v2422_v54 = vrot.slane %v2421_v59, 2 }
 0x497   : > { %v2485_v45 = vadd.f32 %v2484_v42, %v2483_v4  ;;  %5720 = vmatmul.mubr.msk.f32.vlgmr.msra.gmra.mrb[24].mxu1 %vm2369_vm1, %v2683_v35  ;;  %v2534_v20 = vadd.f32 1e-05, %v2526_v43  ;;  %v2649_v62 = vrot.slane %v2565_v9, %v7429_v0  ;;  %v2432_v24 = vmul.f32 %v7753_v1, %v7753_v1 }
 0x498   : > { %v2556_v16 = vmul.f32 %v2548_v52, %v7699_v48  ;;  %v2589_v47 = vrot.slane %v2548_v52, %v7429_v0  ;;  %v2414_v36 = vadd.f32 %v2413_v55, %v2412_v44  ;;  %v2423_v3 = vadd.f32 %v2422_v54, %v2421_v59 }
 0x499   : > { %v2486_v37 = vrot.slane %v2485_v45, 2  ;;  %6189 = vrsqrt.f32 %v2534_v20  ;;  %v2621_v5 = vmul.f32 %v7675_v13, %v2593_v28  ;;  %v2476_v48 = vsel %vm2369_vm1, %v2432_v24, 0.0 }
 0x49a   : > { %v2564_v18 = vsub.f32 %v7725_v61, %v2556_v16  ;;  %v2415_v7 = vrot.slane %v2414_v36, 2  ;;  %v2620_v10 = vmul.f32 %v2589_v47, %v7681_v25  ;;  %v2424_v32 = vrot.slane %v2423_v3, 1 }
 0x49b   : > { %v2487_v6 = vadd.f32 %v2486_v37, %v2485_v45  ;;  %v2477_v12 = vrot.slane %v2476_v48, 4  ;;  %v2677_v34 = vadd.f32 %v2649_v62, %v2621_v5 }
 0x49c   : > { %v2645_v60 = vrot.slane %v2564_v18, %v7429_v0  ;;  %v2416_v38 = vadd.f32 %v2415_v7, %v2414_v36  ;;  %v2425_v19 = vadd.f32 %v2424_v32, %v2423_v3 }
 0x49d   : > { %v2488_v14 = vrot.slane %v2487_v6, 1  ;;  %v2478_v2 = vadd.f32 %v2477_v12, %v2476_v48  ;;  %v2685_v23 = vmax.f32 %v2677_v34, 0.0 }
 0x49e   : > { %v2676_v17 = vadd.f32 %v2645_v60, %v2620_v10  ;;  %v2417_v51 = vrot.slane %v2416_v38, 1  ;;  %v2497_v13 = vmul.f32 0.125, %v2425_v19 }
 0x49f   : > { %v2489_v57 = vadd.f32 %v2488_v14, %v2487_v6  ;;  %v2479_v22 = vrot.slane %v2478_v2, 2 }
 0x4a0   : > { %v2684_v21 = vmax.f32 %v2676_v17, 0.0  ;;  %v6188_v49 = vpop.eup %6187  ;;  %v2418_v33 = vadd.f32 %v2417_v51, %v2416_v38  ;;  %v2513_v27 = vmul.f32 %v2497_v13, %v2497_v13 }
 0x4a1   : > { %v2505_v26 = vmul.f32 0.125, %v2489_v57  ;;  %v2551_v25 = vmul.f32 %v6188_v49, %v7722_v39  ;;  %v2480_v29 = vadd.f32 %v2479_v22, %v2478_v2 }
 0x4a2   : > { %5722 = vmatprep.mubr.msk.f32.mxu1 %vm2369_vm1, %v2684_v21  ;;  %v2496_v56 = vmul.f32 0.125, %v2418_v33 }
 0x4a3   : > { %5723 = vmatmul.mubr.msk.f32.gmra.mrb[26].mxu1 %vm2369_vm1, %v2685_v23  ;;  %v6190_v30 = vpop.eup %6189  ;;  %v2559_v46 = vmul.f32 %v2551_v25, %v7732_v41  ;;  %v2521_v50 = vsub.f32 %v2505_v26, %v2513_v27  ;;  %v2481_v31 = vrot.slane %v2480_v29, 1  ;;  %v2601_v4 = vrot.slane %v2551_v25, %v7429_v0 }
 0x4a4   : > { %v2550_v53 = vmul.f32 %v6190_v30, %v7722_v39  ;;  %v2512_v42 = vmul.f32 %v2496_v56, %v2496_v56 }
 0x4a5   : > { %v2567_v35 = vsub.f32 %v7725_v61, %v2559_v46  ;;  %v2529_v9 = vmax.f32 %v2521_v50, 0.0  ;;  %v2482_v15 = vadd.f32 %v2481_v31, %v2480_v29  ;;  %v2623_v45 = vmul.f32 %v7701_v8, %v2601_v4 }
 0x4a6   : > { %v2558_v52 = vmul.f32 %v2550_v53, %v7738_v11  ;;  %v2597_v43 = vrot.slane %v2550_v53, %v7429_v0 }
 0x4a7   : > { %v2657_v59 = vrot.slane %v2567_v35, %v7429_v0  ;;  %v2537_v44 = vadd.f32 1e-05, %v2529_v9  ;;  %v2504_v28 = vmul.f32 0.125, %v2482_v15 }
 0x4a8   : > { %v2566_v41 = vsub.f32 %v7725_v61, %v2558_v52  ;;  %v2622_v16 = vmul.f32 %v2597_v43, %v7707_v58 }
 0x4a9   : > { %6191 = vrsqrt.f32 %v2537_v44  ;;  %v2520_v55 = vsub.f32 %v2504_v28, %v2512_v42  ;;  %v2679_v20 = vadd.f32 %v2657_v59, %v2623_v45 }
 0x4aa   : > { %v2653_v47 = vrot.slane %v2566_v41, %v7429_v0 }
 0x4ab   : > { %v2528_v54 = vmax.f32 %v2520_v55, 0.0  ;;  %v2687_v36 = vmax.f32 %v2679_v20, 0.0 }
 0x4ac   : > { %v2678_v62 = vadd.f32 %v2653_v47, %v2622_v16 }
 0x4ad   : > { %v2536_v11 = vadd.f32 1e-05, %v2528_v54 }
 0x4ae   : > { %v2686_v37 = vmax.f32 %v2678_v62, 0.0 }
 0x4af   : > { %6193 = vrsqrt.f32 %v2536_v11 }
 0x4b0   : > { %5725 = vmatprep.mubr.msk.f32.mxu1 %vm2369_vm1, %v2686_v37 }
 0x4b1   : > { %5726 = vmatmul.mubr.msk.f32.gmra.mrb[28].mxu1 %vm2369_vm1, %v2687_v36 }
 0x4b3   : > { %v6192_v24 = vpop.eup %6191 }
 0x4b4   : > { %v2553_v8 = vmul.f32 %v6192_v24, %v7722_v39 }
 0x4b6   : > { %v2561_v18 = vmul.f32 %v2553_v8, %v2497_v13  ;;  %v2609_v6 = vrot.slane %v2553_v8, %v7429_v0 }
 0x4b8   : > { %v2569_v58 = vsub.f32 %v7725_v61, %v2561_v18  ;;  %v2625_v32 = vmul.f32 %v7747_v63, %v2609_v6  ;;  %v3163_v63 = vld [vmem:[#allocation10 + $0x8] sm:$0xff] }
 0x4b9   : > { %v6194_v3 = vpop.eup %6193 }
 0x4ba   : > { %v2552_v5 = vmul.f32 %v6194_v3, %v7722_v39  ;;  %v2665_v10 = vrot.slane %v2569_v58, %v7429_v0  ;;  %v6644_v39 = vmov 0.0  }
 0x4bb   : > { %3147 = vst [vmem:[%s7803_s3 + $0x8] sm:$0xff] %v6644_v39  ;;  %3146 = vst [vmem:[%s7803_s3] sm:$0xff] %v6644_v39 }
 0x4bc   : > { %v2560_v7 = vmul.f32 %v2552_v5, %v2496_v56  ;;  %v2605_v48 = vrot.slane %v2552_v5, %v7429_v0  ;;  %v2681_v14 = vadd.f32 %v2665_v10, %v2625_v32  ;;  %3148 = vst [vmem:[%s7803_s3 + $0x10] sm:$0xff] %v6644_v39  ;;  %3149 = vst [vmem:[%s7803_s3 + $0x18] sm:$0xff] %v6644_v39 }
 0x4bd   : > { %3150 = vst [vmem:[%s7803_s3 + $0x20] sm:$0xff] %v6644_v39  ;;  %3151 = vst [vmem:[%s7803_s3 + $0x28] sm:$0xff] %v6644_v39 }
 0x4be   : > { %v2568_v60 = vsub.f32 %v7725_v61, %v2560_v7  ;;  %v2624_v12 = vmul.f32 %v2605_v48, %v7753_v1  ;;  %v2689_v19 = vmax.f32 %v2681_v14, 0.0  ;;  %3152 = vst [vmem:[%s7803_s3 + $0x30] sm:$0xff] %v6644_v39  ;;  %3153 = vst [vmem:[%s7803_s3 + $0x38] sm:$0xff] %v6644_v39  ;;  %v3162_v61 = vld [vmem:[#allocation10] sm:$0xff] }
 0x4bf   : > { %v5875_v1 = vpack.c.bf16 %v3163_v63, %v3162_v61 }
 0x4c0   : > { %v2661_v34 = vrot.slane %v2568_v60, %v7429_v0 }
 0x4c1   : > { %5876 = vmatprep.subr.bf16.mxu0 %v5875_v1 }
 0x4c2   : > { %v2680_v38 = vadd.f32 %v2661_v34, %v2624_v12  ;;  %5878 = vmatpush3.bf16.msra.mxu0 %v5875_v1 }
 0x4c4   : > { %v2688_v17 = vmax.f32 %v2680_v38, 0.0 }
 0x4c6   : > { %5728 = vmatprep.mubr.msk.f32.mxu1 %vm2369_vm1, %v2688_v17 }
 0x4c7   : > { %5729 = vmatmul.mubr.msk.f32.gmra.mrb[30].mxu1 %vm2369_vm1, %v2689_v19 }
 0x56a   : > { %v7813_v2 = vpop.f32.mrb[24].mxu1 }
 0x56b   : > { %v2833_v57 = vsel %vm2825_vm2, %v7813_v2, 0.0  ;;  %v2883_v51 = vmul.f32 %v7813_v2, %v7813_v2  ;;  %v7819_v21 = vpop.f32.mrb[25].mxu1 }
 0x56c   : > { %v2834_v13 = vrot.slane %v2833_v57, 4  ;;  %v2826_v22 = vsel %vm2825_vm2, %v7819_v21, 0.0  ;;  %v2882_v49 = vmul.f32 %v7819_v21, %v7819_v21 }
 0x56d   : > { %v2897_v23 = vsel %vm2825_vm2, %v2883_v51, 0.0  ;;  %v2827_v26 = vrot.slane %v2826_v22, 4 }
 0x56e   : > { %v2835_v33 = vadd.f32 %v2834_v13, %v2833_v57  ;;  %v2898_v25 = vrot.slane %v2897_v23, 4  ;;  %v2890_v27 = vsel %vm2825_vm2, %v2882_v49, 0.0 }
 0x56f   : > { %v2828_v29 = vadd.f32 %v2827_v26, %v2826_v22  ;;  %v2891_v56 = vrot.slane %v2890_v27, 4 }
 0x570   : > { %v2836_v30 = vrot.slane %v2835_v33, 2  ;;  %v2899_v46 = vadd.f32 %v2898_v25, %v2897_v23 }
 0x571   : > { %v2829_v50 = vrot.slane %v2828_v29, 2  ;;  %v2892_v31 = vadd.f32 %v2891_v56, %v2890_v27 }
 0x572   : > { %v2837_v4 = vadd.f32 %v2836_v30, %v2835_v33  ;;  %v2900_v53 = vrot.slane %v2899_v46, 2 }
 0x573   : > { %v2830_v35 = vadd.f32 %v2829_v50, %v2828_v29  ;;  %v2893_v9 = vrot.slane %v2892_v31, 2 }
 0x574   : > { %v2838_v15 = vrot.slane %v2837_v4, 1  ;;  %v2901_v42 = vadd.f32 %v2900_v53, %v2899_v46 }
 0x575   : > { %v2831_v52 = vrot.slane %v2830_v35, 1  ;;  %v2894_v43 = vadd.f32 %v2893_v9, %v2892_v31 }
 0x576   : > { %v2839_v59 = vadd.f32 %v2838_v15, %v2837_v4  ;;  %v2902_v44 = vrot.slane %v2901_v42, 1  ;;  %v7827_v28 = vpop.f32.mrb[26].mxu1 }
 0x577   : > { %v2832_v41 = vadd.f32 %v2831_v52, %v2830_v35  ;;  %v2895_v45 = vrot.slane %v2894_v43, 1  ;;  %v2847_v55 = vsel %vm2825_vm2, %v7827_v28, 0.0  ;;  %v2885_v16 = vmul.f32 %v7827_v28, %v7827_v28  ;;  %v7833_v47 = vpop.f32.mrb[27].mxu1 }
 0x578   : > { %v2903_v20 = vadd.f32 %v2902_v44, %v2901_v42  ;;  %v7835_v54 = vmul.f32 0.125, %v2839_v59  ;;  %v2848_v62 = vrot.slane %v2847_v55, 4  ;;  %v2840_v11 = vsel %vm2825_vm2, %v7833_v47, 0.0 }
 0x579   : > { %v2896_v37 = vadd.f32 %v2895_v45, %v2894_v43  ;;  %v7839_v36 = vmul.f32 0.125, %v2832_v41  ;;  %v2911_v24 = vsel %vm2825_vm2, %v2885_v16, 0.0  ;;  %v2841_v8 = vrot.slane %v2840_v11, 4 }
 0x57a   : > { %v2955_v18 = vmul.f32 0.125, %v2903_v20  ;;  %v2963_v3 = vmul.f32 %v7835_v54, %v7835_v54  ;;  %v2849_v58 = vadd.f32 %v2848_v62, %v2847_v55  ;;  %v2912_v5 = vrot.slane %v2911_v24, 4  ;;  %v7870_v20 = vld [vmem:[#allocation7] sm:$0x1] }
 0x57b   : > { %v2954_v6 = vmul.f32 0.125, %v2896_v37  ;;  %v2962_v7 = vmul.f32 %v7839_v36, %v7839_v36  ;;  %v2842_v48 = vadd.f32 %v2841_v8, %v2840_v11  ;;  %v2884_v10 = vmul.f32 %v7833_v47, %v7833_v47 }
 0x57c   : > { %v2971_v60 = vsub.f32 %v2955_v18, %v2963_v3  ;;  %v2850_v32 = vrot.slane %v2849_v58, 2  ;;  %v2913_v12 = vadd.f32 %v2912_v5, %v2911_v24 }
 0x57d   : > { %v2970_v34 = vsub.f32 %v2954_v6, %v2962_v7  ;;  %v2843_v14 = vrot.slane %v2842_v48, 2  ;;  %v2904_v38 = vsel %vm2825_vm2, %v2884_v10, 0.0 }
 0x57e   : > { %v2979_v17 = vmax.f32 %v2971_v60, 0.0  ;;  %v2851_v19 = vadd.f32 %v2850_v32, %v2849_v58  ;;  %v2914_v39 = vrot.slane %v2913_v12, 2  ;;  %v2905_v61 = vrot.slane %v2904_v38, 4 }
 0x57f   : > { %v2978_v63 = vmax.f32 %v2970_v34, 0.0  ;;  %v2844_v1 = vadd.f32 %v2843_v14, %v2842_v48 }
 0x580   : > { %v2987_v57 = vadd.f32 1e-05, %v2979_v17  ;;  %v2852_v51 = vrot.slane %v2851_v19, 1  ;;  %v2915_v13 = vadd.f32 %v2914_v39, %v2913_v12  ;;  %v2906_v22 = vadd.f32 %v2905_v61, %v2904_v38  ;;  %v7874_v12 = vld [vmem:[#allocation8] sm:$0x1] }
 0x581   : > { %v2986_v49 = vadd.f32 1e-05, %v2978_v63  ;;  %v2845_v23 = vrot.slane %v2844_v1, 1 }
 0x582   : > { %6195 = vrsqrt.f32 %v2987_v57  ;;  %v2853_v26 = vadd.f32 %v2852_v51, %v2851_v19  ;;  %v2916_v33 = vrot.slane %v2915_v13, 1  ;;  %v2907_v25 = vrot.slane %v2906_v22, 2 }
 0x583   : > { %6197 = vrsqrt.f32 %v2986_v49  ;;  %v2846_v27 = vadd.f32 %v2845_v23, %v2844_v1 }
 0x584   : > { %v2917_v29 = vadd.f32 %v2916_v33, %v2915_v13  ;;  %v7849_v56 = vmul.f32 0.125, %v2853_v26  ;;  %v2908_v30 = vadd.f32 %v2907_v25, %v2906_v22  ;;  %v7853_v50 = vpop.f32.mrb[28].mxu1 }
 0x585   : > { %v7851_v46 = vmul.f32 0.125, %v2846_v27  ;;  %v2861_v35 = vsel %vm2825_vm2, %v7853_v50, 0.0  ;;  %v7859_v9 = vpop.f32.mrb[29].mxu1  ;;  %v2887_v52 = vmul.f32 %v7853_v50, %v7853_v50 }
 0x586   : > { %v2957_v31 = vmul.f32 0.125, %v2917_v29  ;;  %v2965_v4 = vmul.f32 %v7849_v56, %v7849_v56  ;;  %v2909_v53 = vrot.slane %v2908_v30, 1  ;;  %v2862_v42 = vrot.slane %v2861_v35, 4 }
 0x587   : > { %v2964_v15 = vmul.f32 %v7851_v46, %v7851_v46  ;;  %v2854_v43 = vsel %vm2825_vm2, %v7859_v9, 0.0  ;;  %v2886_v45 = vmul.f32 %v7859_v9, %v7859_v9  ;;  %v2925_v16 = vsel %vm2825_vm2, %v2887_v52, 0.0 }
 0x588   : > { %v2973_v59 = vsub.f32 %v2957_v31, %v2965_v4  ;;  %v2910_v44 = vadd.f32 %v2909_v53, %v2908_v30  ;;  %v2855_v41 = vrot.slane %v2854_v43, 4  ;;  %v2863_v55 = vadd.f32 %v2862_v42, %v2861_v35 }
 0x589   : > { %v2926_v37 = vrot.slane %v2925_v16, 4  ;;  %v2918_v18 = vsel %vm2825_vm2, %v2886_v45, 0.0 }
 0x58a   : > { %v2981_v62 = vmax.f32 %v2973_v59, 0.0  ;;  %v2956_v11 = vmul.f32 0.125, %v2910_v44  ;;  %v2856_v24 = vadd.f32 %v2855_v41, %v2854_v43  ;;  %v2864_v8 = vrot.slane %v2863_v55, 2 }
 0x58b   : > { %v2927_v6 = vadd.f32 %v2926_v37, %v2925_v16  ;;  %v2919_v32 = vrot.slane %v2918_v18, 4 }
 0x58c   : > { %v6196_v3 = vpop.eup %6195  ;;  %v2989_v58 = vadd.f32 1e-05, %v2981_v62  ;;  %v2972_v5 = vsub.f32 %v2956_v11, %v2964_v15  ;;  %v2857_v7 = vrot.slane %v2856_v24, 2  ;;  %v2865_v60 = vadd.f32 %v2864_v8, %v2863_v55 }
 0x58d   : > { %v6198_v48 = vpop.eup %6197  ;;  %v3003_v10 = vmul.f32 %v6196_v3, %v7870_v20  ;;  %v2928_v38 = vrot.slane %v2927_v6, 2 }
 0x58e   : > { %v3002_v34 = vmul.f32 %v6198_v48, %v7870_v20  ;;  %6199 = vrsqrt.f32 %v2989_v58  ;;  %v2980_v14 = vmax.f32 %v2972_v5, 0.0  ;;  %v2866_v39 = vrot.slane %v2865_v60, 1 }
 0x58f   : > { %v3011_v17 = vmul.f32 %v3003_v10, %v7835_v54  ;;  %v3041_v19 = vrot.slane %v3003_v10, %v7429_v0  ;;  %v2858_v61 = vadd.f32 %v2857_v7, %v2856_v24  ;;  %v2929_v51 = vadd.f32 %v2928_v38, %v2927_v6 }
 0x590   : > { %v3010_v63 = vmul.f32 %v3002_v34, %v7839_v36  ;;  %v3037_v1 = vrot.slane %v3002_v34, %v7429_v0  ;;  %v2988_v57 = vadd.f32 1e-05, %v2980_v14  ;;  %v2867_v22 = vadd.f32 %v2866_v39, %v2865_v60 }
 0x591   : > { %v3019_v13 = vsub.f32 %v7874_v12, %v3011_v17  ;;  %v2859_v49 = vrot.slane %v2858_v61, 1  ;;  %v3075_v23 = vmul.f32 %v7813_v2, %v3041_v19  ;;  %v2930_v54 = vrot.slane %v2929_v51, 1 }
 0x592   : > { %v3018_v26 = vsub.f32 %v7874_v12, %v3010_v63  ;;  %6201 = vrsqrt.f32 %v2988_v57  ;;  %v7885_v25 = vmul.f32 0.125, %v2867_v22  ;;  %v2920_v36 = vadd.f32 %v2919_v32, %v2918_v18 }
 0x593   : > { %v3097_v33 = vrot.slane %v3019_v13, %v7429_v0  ;;  %v2860_v27 = vadd.f32 %v2859_v49, %v2858_v61  ;;  %v3074_v29 = vmul.f32 %v3037_v1, %v7819_v21  ;;  %v2931_v31 = vadd.f32 %v2930_v54, %v2929_v51 }
 0x594   : > { %v3093_v30 = vrot.slane %v3018_v26, %v7429_v0  ;;  %v2967_v2 = vmul.f32 %v7885_v25, %v7885_v25  ;;  %v2921_v53 = vrot.slane %v2920_v36, 2 }
 0x595   : > { %v3131_v4 = vadd.f32 %v3097_v33, %v3075_v23  ;;  %v2959_v15 = vmul.f32 0.125, %v2931_v31  ;;  %v7891_v43 = vmul.f32 0.125, %v2860_v27 }
 0x596   : > { %v3130_v35 = vadd.f32 %v3093_v30, %v3074_v29  ;;  %v2922_v52 = vadd.f32 %v2921_v53, %v2920_v36 }
 0x597   : > { %v3139_v42 = vmax.f32 %v3131_v4, 0.0  ;;  %v2975_v41 = vsub.f32 %v2959_v15, %v2967_v2  ;;  %v2966_v37 = vmul.f32 %v7891_v43, %v7891_v43 }
 0x598   : > { %v6200_v59 = vpop.eup %6199  ;;  %v3138_v44 = vmax.f32 %v3130_v35, 0.0  ;;  %v2923_v45 = vrot.slane %v2922_v52, 1 }
 0x599   : > { %3155 = vst.msk [vmem:[%s7803_s3 + $0x8] sm:$0xff] %vm2825_vm2, %v3139_v42  ;;  %v3005_v21 = vmul.f32 %v6200_v59, %v7870_v20  ;;  %v2983_v55 = vmax.f32 %v2975_v41, 0.0 }
 0x59a   : > { %3154 = vst.msk [vmem:[%s7803_s3] sm:$0xff] %vm2825_vm2, %v3138_v44  ;;  %5735 = vmatprep.mubr.msk.f32.mxu0 %vm2825_vm2, %v3138_v44  ;;  %v2924_v11 = vadd.f32 %v2923_v45, %v2922_v52  ;;  %v7903_v24 = vpop.f32.mrb[30].mxu1 }
 0x59b   : > { %v3013_v16 = vmul.f32 %v3005_v21, %v7849_v56  ;;  %v3049_v62 = vrot.slane %v3005_v21, %v7429_v0  ;;  %5736 = vmatmul.mubr.msk.f32.vlgmr.msra.gmra.mrb[32].mxu0 %vm2825_vm2, %v3139_v42  ;;  %v2991_v18 = vadd.f32 1e-05, %v2983_v55  ;;  %v2875_v3 = vsel %vm2825_vm2, %v7903_v24, 0.0  ;;  %v7910_v5 = vpop.f32.mrb[31].mxu1 }
 0x59c   : > { %v6202_v8 = vpop.eup %6201  ;;  %v2889_v58 = vmul.f32 %v7903_v24, %v7903_v24  ;;  %v2958_v48 = vmul.f32 0.125, %v2924_v11  ;;  %v2876_v10 = vrot.slane %v2875_v3, 4  ;;  %v2868_v32 = vsel %vm2825_vm2, %v7910_v5, 0.0 }
 0x59d   : > { %v3021_v56 = vsub.f32 %v7874_v12, %v3013_v16  ;;  %v3077_v6 = vmul.f32 %v7827_v28, %v3049_v62  ;;  %v3004_v7 = vmul.f32 %v6202_v8, %v7870_v20  ;;  %6203 = vrsqrt.f32 %v2991_v18 }
 0x59e   : > { %v2939_v60 = vsel %vm2825_vm2, %v2889_v58, 0.0  ;;  %v2974_v17 = vsub.f32 %v2958_v48, %v2966_v37  ;;  %v2877_v19 = vadd.f32 %v2876_v10, %v2875_v3  ;;  %v2869_v28 = vrot.slane %v2868_v32, 4 }
 0x59f   : > { %v3105_v34 = vrot.slane %v3021_v56, %v7429_v0  ;;  %v3012_v14 = vmul.f32 %v3004_v7, %v7851_v46  ;;  %v3045_v38 = vrot.slane %v3004_v7, %v7429_v0  ;;  %v2940_v39 = vrot.slane %v2939_v60, 4 }
 0x5a0   : > { %v2888_v61 = vmul.f32 %v7910_v5, %v7910_v5  ;;  %v2982_v51 = vmax.f32 %v2974_v17, 0.0  ;;  %v2878_v13 = vrot.slane %v2877_v19, 2  ;;  %v2870_v49 = vadd.f32 %v2869_v28, %v2868_v32 }
 0x5a1   : > { %v3133_v63 = vadd.f32 %v3105_v34, %v3077_v6  ;;  %v3020_v1 = vsub.f32 %v7874_v12, %v3012_v14  ;;  %v3076_v57 = vmul.f32 %v3045_v38, %v7833_v47  ;;  %v2941_v22 = vadd.f32 %v2940_v39, %v2939_v60 }
 0x5a2   : > { %v2932_v46 = vsel %vm2825_vm2, %v2888_v61, 0.0  ;;  %v2990_v54 = vadd.f32 1e-05, %v2982_v51  ;;  %v2879_v27 = vadd.f32 %v2878_v13, %v2877_v19  ;;  %v2871_v29 = vrot.slane %v2870_v49, 2 }
 0x5a3   : > { %v3141_v23 = vmax.f32 %v3133_v63, 0.0  ;;  %v3101_v26 = vrot.slane %v3020_v1, %v7429_v0  ;;  %v2933_v33 = vrot.slane %v2932_v46, 4  ;;  %v2942_v36 = vrot.slane %v2941_v22, 2 }
 0x5a4   : > { %6205 = vrsqrt.f32 %v2990_v54  ;;  %v2880_v31 = vrot.slane %v2879_v27, 1  ;;  %v2872_v2 = vadd.f32 %v2871_v29, %v2870_v49 }
 0x5a5   : > { %3157 = vst.msk [vmem:[%s7803_s3 + $0x18] sm:$0xff] %vm2825_vm2, %v3141_v23  ;;  %v3132_v30 = vadd.f32 %v3101_v26, %v3076_v57  ;;  %v2934_v47 = vadd.f32 %v2933_v33, %v2932_v46  ;;  %v2943_v4 = vadd.f32 %v2942_v36, %v2941_v22 }
 0x5a6   : > { %v2881_v42 = vadd.f32 %v2880_v31, %v2879_v27  ;;  %v2873_v59 = vrot.slane %v2872_v2, 1 }
 0x5a7   : > { %v3140_v53 = vmax.f32 %v3132_v30, 0.0  ;;  %v2935_v35 = vrot.slane %v2934_v47, 2  ;;  %v6204_v15 = vpop.eup %6203  ;;  %v2944_v52 = vrot.slane %v2943_v4, 1 }
 0x5a8   : > { %v3007_v44 = vmul.f32 %v6204_v15, %v7870_v20  ;;  %v2953_v45 = vmul.f32 0.125, %v2881_v42  ;;  %v2874_v55 = vadd.f32 %v2873_v59, %v2872_v2  ;;  %v3616_v2 = vld [vmem:[#allocation14 + $0x8] sm:$0xff] }
 0x5a9   : > { %3156 = vst.msk [vmem:[%s7803_s3 + $0x10] sm:$0xff] %vm2825_vm2, %v3140_v53  ;;  %v2936_v41 = vadd.f32 %v2935_v35, %v2934_v47  ;;  %5738 = vmatprep.mubr.msk.f32.mxu0 %vm2825_vm2, %v3140_v53  ;;  %v2945_v21 = vadd.f32 %v2944_v52, %v2943_v4 }
 0x5aa   : > { %5739 = vmatmul.mubr.msk.f32.gmra.mrb[34].mxu0 %vm2825_vm2, %v3141_v23  ;;  %v3015_v16 = vmul.f32 %v3007_v44, %v7885_v25  ;;  %v3057_v62 = vrot.slane %v3007_v44, %v7429_v0  ;;  %v2969_v8 = vmul.f32 %v2953_v45, %v2953_v45  ;;  %v2952_v18 = vmul.f32 0.125, %v2874_v55 }
 0x5ab   : > { %v2937_v11 = vrot.slane %v2936_v41, 1  ;;  %v2961_v37 = vmul.f32 0.125, %v2945_v21 }
 0x5ac   : > { %v3023_v3 = vsub.f32 %v7874_v12, %v3015_v16  ;;  %v2968_v6 = vmul.f32 %v2952_v18, %v2952_v18  ;;  %v3079_v48 = vmul.f32 %v7853_v50, %v3057_v62 }
 0x5ad   : > { %v2938_v58 = vadd.f32 %v2937_v11, %v2936_v41  ;;  %v2977_v56 = vsub.f32 %v2961_v37, %v2969_v8 }
 0x5ae   : > { %v6206_v7 = vpop.eup %6205  ;;  %v3113_v10 = vrot.slane %v3023_v3, %v7429_v0 }
 0x5af   : > { %v2960_v60 = vmul.f32 0.125, %v2938_v58  ;;  %v3006_v25 = vmul.f32 %v6206_v7, %v7870_v20  ;;  %v2985_v32 = vmax.f32 %v2977_v56, 0.0 }
 0x5b0   : > { %v3135_v34 = vadd.f32 %v3113_v10, %v3079_v48 }
 0x5b1   : > { %v2976_v14 = vsub.f32 %v2960_v60, %v2968_v6  ;;  %v3014_v38 = vmul.f32 %v3006_v25, %v7891_v43  ;;  %v3053_v17 = vrot.slane %v3006_v25, %v7429_v0  ;;  %v2993_v19 = vadd.f32 1e-05, %v2985_v32 }
 0x5b2   : > { %v3143_v39 = vmax.f32 %v3135_v34, 0.0 }
 0x5b3   : > { %v2984_v28 = vmax.f32 %v2976_v14, 0.0  ;;  %v3022_v61 = vsub.f32 %v7874_v12, %v3014_v38  ;;  %6207 = vrsqrt.f32 %v2993_v19  ;;  %v3078_v63 = vmul.f32 %v3053_v17, %v7859_v9 }
 0x5b4   : > { %3159 = vst.msk [vmem:[%s7803_s3 + $0x28] sm:$0xff] %vm2825_vm2, %v3143_v39 }
 0x5b5   : > { %v2992_v50 = vadd.f32 1e-05, %v2984_v28  ;;  %v3109_v1 = vrot.slane %v3022_v61, %v7429_v0 }
 0x5b7   : > { %6209 = vrsqrt.f32 %v2992_v50  ;;  %v3134_v57 = vadd.f32 %v3109_v1, %v3078_v63 }
 0x5b9   : > { %v3142_v51 = vmax.f32 %v3134_v57, 0.0 }
 0x5bb   : > { %3158 = vst.msk [vmem:[%s7803_s3 + $0x20] sm:$0xff] %vm2825_vm2, %v3142_v51  ;;  %5741 = vmatprep.mubr.msk.f32.mxu0 %vm2825_vm2, %v3142_v51 }
 0x5bc   : > { %5742 = vmatmul.mubr.msk.f32.gmra.mrb[36].mxu0 %vm2825_vm2, %v3143_v39 }
 0x5bd   : > { %v6208_v43 = vpop.eup %6207 }
 0x5be   : > { %v3009_v13 = vmul.f32 %v6208_v43, %v7870_v20 }
 0x5c0   : > { %v3017_v49 = vmul.f32 %v3009_v13, %v2953_v45  ;;  %v3065_v9 = vrot.slane %v3009_v13, %v7429_v0 }
 0x5c1   : > { %v6210_v22 = vpop.eup %6209 }
 0x5c2   : > { %v3008_v46 = vmul.f32 %v6210_v22, %v7870_v20  ;;  %v3025_v23 = vsub.f32 %v7874_v12, %v3017_v49  ;;  %v3081_v33 = vmul.f32 %v7903_v24, %v3065_v9  ;;  %v3615_v24 = vld [vmem:[#allocation14] sm:$0xff] }
 0x5c3   : > { %v5879_v53 = vpack.c.bf16 %v3616_v2, %v3615_v24 }
 0x5c4   : > { %v3016_v26 = vmul.f32 %v3008_v46, %v2952_v18  ;;  %v3061_v54 = vrot.slane %v3008_v46, %v7429_v0  ;;  %v3121_v27 = vrot.slane %v3025_v23, %v7429_v0 }
 0x5c5   : > { %5880 = vmatprep.subr.bf16.mxu1 %v5879_v53 }
 0x5c6   : > { %v3024_v36 = vsub.f32 %v7874_v12, %v3016_v26  ;;  %v3137_v29 = vadd.f32 %v3121_v27, %v3081_v33  ;;  %v3080_v30 = vmul.f32 %v3061_v54, %v7910_v5  ;;  %5882 = vmatpush3.bf16.msra.mxu1 %v5879_v53  ;;  %v3617_v12 = vld [vmem:[#allocation14 + $0x10] sm:$0xff]  ;;  %v3618_v5 = vld [vmem:[#allocation14 + $0x18] sm:$0xff] }
 0x5c7   : > { %v5883_v35 = vpack.c.bf16 %v3618_v5, %v3617_v12 }
 0x5c8   : > { %v3117_v47 = vrot.slane %v3024_v36, %v7429_v0  ;;  %v3145_v31 = vmax.f32 %v3137_v29, 0.0 }
 0x5c9   : > { %5884 = vmatprep.subr.bf16.mxu1 %v5883_v35 }
 0x5ca   : > { %v3136_v4 = vadd.f32 %v3117_v47, %v3080_v30  ;;  %3161 = vst.msk [vmem:[%s7803_s3 + $0x38] sm:$0xff] %vm2825_vm2, %v3145_v31  ;;  %5886 = vmatpush3.bf16.msra.mxu1 %v5883_v35 }
 0x5cc   : > { %v3144_v20 = vmax.f32 %v3136_v4, 0.0 }
 0x5ce   : > { %3160 = vst.msk [vmem:[%s7803_s3 + $0x30] sm:$0xff] %vm2825_vm2, %v3144_v20  ;;  %5744 = vmatprep.mubr.msk.f32.mxu0 %vm2825_vm2, %v3144_v20 }
 0x5cf   : > { %5745 = vmatmul.mubr.msk.f32.gmra.mrb[38].mxu0 %vm2825_vm2, %v3145_v31 }
 0x66e   : > { %v7967_v15 = vpop.f32.mrb[32].mxu0 }
 0x66f   : > { %v3302_v42 = vsel %vm2369_vm1, %v7967_v15, 0.0  ;;  %v3352_v52 = vmul.f32 %v7967_v15, %v7967_v15  ;;  %v7973_v59 = vpop.f32.mrb[33].mxu0 }
 0x670   : > { %v3303_v44 = vrot.slane %v3302_v42, 4  ;;  %v3295_v41 = vsel %vm2369_vm1, %v7973_v59, 0.0  ;;  %v3351_v21 = vmul.f32 %v7973_v59, %v7973_v59 }
 0x671   : > { %v3366_v45 = vsel %vm2369_vm1, %v3352_v52, 0.0  ;;  %v3296_v55 = vrot.slane %v3295_v41, 4 }
 0x672   : > { %v3304_v16 = vadd.f32 %v3303_v44, %v3302_v42  ;;  %v3367_v62 = vrot.slane %v3366_v45, 4  ;;  %v3359_v11 = vsel %vm2369_vm1, %v3351_v21, 0.0 }
 0x673   : > { %v3297_v37 = vadd.f32 %v3296_v55, %v3295_v41  ;;  %v3360_v8 = vrot.slane %v3359_v11, 4 }
 0x674   : > { %v3305_v18 = vrot.slane %v3304_v16, 2  ;;  %v3368_v3 = vadd.f32 %v3367_v62, %v3366_v45 }
 0x675   : > { %v3298_v58 = vrot.slane %v3297_v37, 2  ;;  %v3361_v56 = vadd.f32 %v3360_v8, %v3359_v11 }
 0x676   : > { %v3306_v6 = vadd.f32 %v3305_v18, %v3304_v16  ;;  %v3369_v7 = vrot.slane %v3368_v3, 2 }
 0x677   : > { %v3299_v48 = vadd.f32 %v3298_v58, %v3297_v37  ;;  %v3362_v10 = vrot.slane %v3361_v56, 2 }
 0x678   : > { %v3307_v60 = vrot.slane %v3306_v6, 1  ;;  %v3370_v25 = vadd.f32 %v3369_v7, %v3368_v3 }
 0x679   : > { %v3300_v32 = vrot.slane %v3299_v48, 1  ;;  %v3363_v34 = vadd.f32 %v3362_v10, %v3361_v56 }
 0x67a   : > { %v3308_v14 = vadd.f32 %v3307_v60, %v3306_v6  ;;  %v3371_v38 = vrot.slane %v3370_v25, 1 }
 0x67b   : > { %v3301_v17 = vadd.f32 %v3300_v32, %v3299_v48  ;;  %v3364_v19 = vrot.slane %v3363_v34, 1  ;;  %v8009_v48 = vld [vmem:[#allocation11] sm:$0x1] }
 0x67c   : > { %v3372_v39 = vadd.f32 %v3371_v38, %v3370_v25  ;;  %v7981_v28 = vmul.f32 0.125, %v3308_v14 }
 0x67d   : > { %v3365_v61 = vadd.f32 %v3364_v19, %v3363_v34  ;;  %v7983_v50 = vmul.f32 0.125, %v3301_v17  ;;  %v7985_v63 = vpop.f32.mrb[34].mxu0 }
 0x67e   : > { %v3424_v1 = vmul.f32 0.125, %v3372_v39  ;;  %v3432_v57 = vmul.f32 %v7981_v28, %v7981_v28  ;;  %v3316_v51 = vsel %vm2369_vm1, %v7985_v63, 0.0  ;;  %v3354_v43 = vmul.f32 %v7985_v63, %v7985_v63  ;;  %v7993_v13 = vpop.f32.mrb[35].mxu0 }
 0x67f   : > { %v3423_v22 = vmul.f32 0.125, %v3365_v61  ;;  %v3431_v49 = vmul.f32 %v7983_v50, %v7983_v50  ;;  %v3317_v9 = vrot.slane %v3316_v51, 4  ;;  %v3309_v46 = vsel %vm2369_vm1, %v7993_v13, 0.0 }
 0x680   : > { %v3440_v23 = vsub.f32 %v3424_v1, %v3432_v57  ;;  %v3380_v26 = vsel %vm2369_vm1, %v3354_v43, 0.0  ;;  %v3310_v54 = vrot.slane %v3309_v46, 4  ;;  %v3353_v33 = vmul.f32 %v7993_v13, %v7993_v13  ;;  %v8020_v1 = vld [vmem:[#allocation13] sm:$0x1] }
 0x681   : > { %v3439_v27 = vsub.f32 %v3423_v22, %v3431_v49  ;;  %v3318_v36 = vadd.f32 %v3317_v9, %v3316_v51  ;;  %v3381_v29 = vrot.slane %v3380_v26, 4 }
 0x682   : > { %v3448_v30 = vmax.f32 %v3440_v23, 0.0  ;;  %v3311_v47 = vadd.f32 %v3310_v54, %v3309_v46  ;;  %v3373_v31 = vsel %vm2369_vm1, %v3353_v33, 0.0 }
 0x683   : > { %v3447_v4 = vmax.f32 %v3439_v27, 0.0  ;;  %v3319_v20 = vrot.slane %v3318_v36, 2  ;;  %v3382_v24 = vadd.f32 %v3381_v29, %v3380_v26  ;;  %v3374_v2 = vrot.slane %v3373_v31, 4 }
 0x684   : > { %v3456_v53 = vadd.f32 1e-05, %v3448_v30  ;;  %v3312_v12 = vrot.slane %v3311_v47, 2 }
 0x685   : > { %v3455_v5 = vadd.f32 1e-05, %v3447_v4  ;;  %v3320_v35 = vadd.f32 %v3319_v20, %v3318_v36  ;;  %v3383_v42 = vrot.slane %v3382_v24, 2  ;;  %v3375_v52 = vadd.f32 %v3374_v2, %v3373_v31 }
 0x686   : > { %6211 = vrsqrt.f32 %v3456_v53  ;;  %v3313_v44 = vadd.f32 %v3312_v12, %v3311_v47 }
 0x687   : > { %6213 = vrsqrt.f32 %v3455_v5  ;;  %v3321_v41 = vrot.slane %v3320_v35, 1  ;;  %v3384_v21 = vadd.f32 %v3383_v42, %v3382_v24  ;;  %v3376_v45 = vrot.slane %v3375_v52, 2 }
 0x688   : > { %v3314_v55 = vrot.slane %v3313_v44, 1 }
 0x689   : > { %v3322_v16 = vadd.f32 %v3321_v41, %v3320_v35  ;;  %v3385_v62 = vrot.slane %v3384_v21, 1  ;;  %v3377_v11 = vadd.f32 %v3376_v45, %v3375_v52 }
 0x68a   : > { %v3315_v37 = vadd.f32 %v3314_v55, %v3313_v44 }
 0x68b   : > { %v3386_v8 = vadd.f32 %v3385_v62, %v3384_v21  ;;  %v8003_v18 = vmul.f32 0.125, %v3322_v16  ;;  %v3378_v3 = vrot.slane %v3377_v11, 1 }
 0x68c   : > { %v8005_v58 = vmul.f32 0.125, %v3315_v37 }
 0x68d   : > { %v3426_v56 = vmul.f32 0.125, %v3386_v8  ;;  %v3434_v6 = vmul.f32 %v8003_v18, %v8003_v18  ;;  %v3379_v7 = vadd.f32 %v3378_v3, %v3377_v11 }
 0x68e   : > { %v3433_v10 = vmul.f32 %v8005_v58, %v8005_v58 }
 0x68f   : > { %v3442_v60 = vsub.f32 %v3426_v56, %v3434_v6  ;;  %v3425_v25 = vmul.f32 0.125, %v3379_v7  ;;  %v8013_v34 = vpop.f32.mrb[36].mxu0 }
 0x690   : > { %v6212_v32 = vpop.eup %6211  ;;  %v3330_v39 = vsel %vm2369_vm1, %v8013_v34, 0.0  ;;  %v8018_v61 = vpop.f32.mrb[37].mxu0  ;;  %v3356_v43 = vmul.f32 %v8013_v34, %v8013_v34 }
 0x691   : > { %v6214_v14 = vpop.eup %6213  ;;  %v3472_v38 = vmul.f32 %v6212_v32, %v8009_v48  ;;  %v3450_v17 = vmax.f32 %v3442_v60, 0.0  ;;  %v3441_v19 = vsub.f32 %v3425_v25, %v3433_v10  ;;  %v3331_v51 = vrot.slane %v3330_v39, 4 }
 0x692   : > { %v3471_v57 = vmul.f32 %v6214_v14, %v8009_v48  ;;  %v3323_v22 = vsel %vm2369_vm1, %v8018_v61, 0.0  ;;  %v3394_v27 = vsel %vm2369_vm1, %v3356_v43, 0.0 }
 0x693   : > { %v3480_v49 = vmul.f32 %v3472_v38, %v7981_v28  ;;  %v3510_v9 = vrot.slane %v3472_v38, %v7429_v0  ;;  %v3458_v46 = vadd.f32 1e-05, %v3450_v17  ;;  %v3449_v23 = vmax.f32 %v3441_v19, 0.0 }
 0x694   : > { %v3479_v26 = vmul.f32 %v3471_v57, %v7983_v50  ;;  %v3506_v54 = vrot.slane %v3471_v57, %v7429_v0  ;;  %v3332_v33 = vadd.f32 %v3331_v51, %v3330_v39  ;;  %v3395_v31 = vrot.slane %v3394_v27, 4 }
 0x695   : > { %v3488_v36 = vsub.f32 %v8020_v1, %v3480_v49  ;;  %6215 = vrsqrt.f32 %v3458_v46  ;;  %v3457_v29 = vadd.f32 1e-05, %v3449_v23  ;;  %v3544_v30 = vmul.f32 %v7967_v15, %v3510_v9 }
 0x696   : > { %v3487_v47 = vsub.f32 %v8020_v1, %v3479_v26  ;;  %v3333_v28 = vrot.slane %v3332_v33, 2  ;;  %v3324_v20 = vrot.slane %v3323_v22, 4  ;;  %v3355_v50 = vmul.f32 %v8018_v61, %v8018_v61 }
 0x697   : > { %v3566_v4 = vrot.slane %v3488_v36, %v7429_v0  ;;  %6217 = vrsqrt.f32 %v3457_v29  ;;  %v3543_v24 = vmul.f32 %v3506_v54, %v7973_v59  ;;  %v3396_v12 = vadd.f32 %v3395_v31, %v3394_v27 }
 0x698   : > { %v3562_v2 = vrot.slane %v3487_v47, %v7429_v0  ;;  %v3334_v53 = vadd.f32 %v3333_v28, %v3332_v33  ;;  %v3325_v35 = vadd.f32 %v3324_v20, %v3323_v22  ;;  %v3387_v15 = vsel %vm2369_vm1, %v3355_v50, 0.0 }
 0x699   : > { %v3600_v5 = vadd.f32 %v3566_v4, %v3544_v30  ;;  %v3397_v44 = vrot.slane %v3396_v12, 2  ;;  %v3388_v41 = vrot.slane %v3387_v15, 4 }
 0x69a   : > { %v3599_v42 = vadd.f32 %v3562_v2, %v3543_v24  ;;  %v3335_v52 = vrot.slane %v3334_v53, 1  ;;  %v3326_v21 = vrot.slane %v3325_v35, 2 }
 0x69b   : > { %v3398_v16 = vadd.f32 %v3397_v44, %v3396_v12  ;;  %v3389_v62 = vadd.f32 %v3388_v41, %v3387_v15  ;;  %v3608_v11 = vmax.f32 %v3600_v5, 0.0 }
 0x69c   : > { %v3607_v45 = vmax.f32 %v3599_v42, 0.0  ;;  %v3336_v55 = vadd.f32 %v3335_v52, %v3334_v53  ;;  %v3327_v37 = vadd.f32 %v3326_v21, %v3325_v35 }
 0x69d   : > { %v3399_v59 = vrot.slane %v3398_v16, 1  ;;  %v3390_v3 = vrot.slane %v3389_v62, 2 }
 0x69e   : > { %v8041_v8 = vmul.f32 0.125, %v3336_v55  ;;  %5755 = vmatprep.mubr.msk.f32.mxu1 %vm2369_vm1, %v3607_v45  ;;  %v3328_v6 = vrot.slane %v3327_v37, 1 }
 0x69f   : > { %v6216_v56 = vpop.eup %6215  ;;  %5756 = vmatmul.mubr.msk.f32.vlgmr.msra.gmra.mrb[32].mxu1 %vm2369_vm1, %v3608_v11  ;;  %v3400_v10 = vadd.f32 %v3399_v59, %v3398_v16  ;;  %v3391_v60 = vadd.f32 %v3390_v3, %v3389_v62 }
 0x6a0   : > { %v3474_v7 = vmul.f32 %v6216_v56, %v8009_v48  ;;  %v3436_v32 = vmul.f32 %v8041_v8, %v8041_v8  ;;  %v3329_v14 = vadd.f32 %v3328_v6, %v3327_v37 }
 0x6a1   : > { %v6218_v25 = vpop.eup %6217  ;;  %v3428_v39 = vmul.f32 0.125, %v3400_v10  ;;  %v3392_v51 = vrot.slane %v3391_v60, 1 }
 0x6a2   : > { %v3482_v38 = vmul.f32 %v3474_v7, %v8003_v18  ;;  %v3518_v17 = vrot.slane %v3474_v7, %v7429_v0  ;;  %v3473_v19 = vmul.f32 %v6218_v25, %v8009_v48  ;;  %v8051_v57 = vpop.f32.mrb[38].mxu0  ;;  %v8053_v43 = vmul.f32 0.125, %v3329_v14 }
 0x6a3   : > { %v3344_v22 = vsel %vm2369_vm1, %v8051_v57, 0.0  ;;  %v3358_v49 = vmul.f32 %v8051_v57, %v8051_v57  ;;  %v8059_v9 = vpop.f32.mrb[39].mxu0  ;;  %v3444_v54 = vsub.f32 %v3428_v39, %v3436_v32  ;;  %v3393_v33 = vadd.f32 %v3392_v51, %v3391_v60 }
 0x6a4   : > { %v3490_v18 = vsub.f32 %v8020_v1, %v3482_v38  ;;  %v3546_v46 = vmul.f32 %v7985_v63, %v3518_v17  ;;  %v3481_v23 = vmul.f32 %v3473_v19, %v8005_v58  ;;  %v3514_v26 = vrot.slane %v3473_v19, %v7429_v0 }
 0x6a5   : > { %v3435_v27 = vmul.f32 %v8053_v43, %v8053_v43  ;;  %v3345_v36 = vrot.slane %v3344_v22, 4  ;;  %v3408_v28 = vsel %vm2369_vm1, %v3358_v49, 0.0  ;;  %v3452_v31 = vmax.f32 %v3444_v54, 0.0 }
 0x6a6   : > { %v3574_v29 = vrot.slane %v3490_v18, %v7429_v0  ;;  %v3489_v30 = vsub.f32 %v8020_v1, %v3481_v23  ;;  %v3545_v47 = vmul.f32 %v3514_v26, %v7993_v13  ;;  %v3427_v63 = vmul.f32 0.125, %v3393_v33 }
 0x6a7   : > { %v3346_v4 = vadd.f32 %v3345_v36, %v3344_v22  ;;  %v3409_v58 = vrot.slane %v3408_v28, 4  ;;  %v3337_v24 = vsel %vm2369_vm1, %v8059_v9, 0.0  ;;  %v3357_v2 = vmul.f32 %v8059_v9, %v8059_v9 }
 0x6a8   : > { %v3602_v20 = vadd.f32 %v3574_v29, %v3546_v46  ;;  %v3570_v50 = vrot.slane %v3489_v30, %v7429_v0  ;;  %v3460_v53 = vadd.f32 1e-05, %v3452_v31  ;;  %v3443_v12 = vsub.f32 %v3427_v63, %v3435_v27 }
 0x6a9   : > { %v3347_v5 = vrot.slane %v3346_v4, 2  ;;  %v3410_v35 = vadd.f32 %v3409_v58, %v3408_v28  ;;  %v3338_v15 = vrot.slane %v3337_v24, 4  ;;  %v3401_v42 = vsel %vm2369_vm1, %v3357_v2, 0.0 }
 0x6aa   : > { %v3601_v13 = vadd.f32 %v3570_v50, %v3545_v47  ;;  %6219 = vrsqrt.f32 %v3460_v53  ;;  %v3451_v52 = vmax.f32 %v3443_v12, 0.0  ;;  %v3402_v55 = vrot.slane %v3401_v42, 4 }
 0x6ab   : > { %v3348_v44 = vadd.f32 %v3347_v5, %v3346_v4  ;;  %v3411_v41 = vrot.slane %v3410_v35, 2  ;;  %v3339_v45 = vadd.f32 %v3338_v15, %v3337_v24  ;;  %v3610_v16 = vmax.f32 %v3602_v20, 0.0 }
 0x6ac   : > { %v3609_v21 = vmax.f32 %v3601_v13, 0.0  ;;  %v3459_v62 = vadd.f32 1e-05, %v3451_v52  ;;  %v3403_v3 = vadd.f32 %v3402_v55, %v3401_v42 }
 0x6ad   : > { %v3349_v11 = vrot.slane %v3348_v44, 1  ;;  %v3412_v37 = vadd.f32 %v3411_v41, %v3410_v35  ;;  %v3340_v59 = vrot.slane %v3339_v45, 2 }
 0x6ae   : > { %5758 = vmatprep.mubr.msk.f32.mxu1 %vm2369_vm1, %v3609_v21  ;;  %6221 = vrsqrt.f32 %v3459_v62  ;;  %v3404_v10 = vrot.slane %v3403_v3, 2 }
 0x6af   : > { %v3350_v56 = vadd.f32 %v3349_v11, %v3348_v44  ;;  %v3413_v6 = vrot.slane %v3412_v37, 1  ;;  %5759 = vmatmul.mubr.msk.f32.gmra.mrb[34].mxu1 %vm2369_vm1, %v3610_v16  ;;  %v3341_v7 = vadd.f32 %v3340_v59, %v3339_v45 }
 0x6b0   : > { %v3405_v14 = vadd.f32 %v3404_v10, %v3403_v3  ;;  %v4075_v10 = vld [vmem:[%s8610_s19 + $0x28] sm:$0xff] }
 0x6b1   : > { %v3414_v60 = vadd.f32 %v3413_v6, %v3412_v37  ;;  %v3422_v25 = vmul.f32 0.125, %v3350_v56  ;;  %v3342_v32 = vrot.slane %v3341_v7, 1  ;;  %v4073_v56 = vld [vmem:[%s8610_s19 + $0x18] sm:$0xff] }
 0x6b2   : > { %v3406_v39 = vrot.slane %v3405_v14, 1 }
 0x6b3   : > { %v3430_v38 = vmul.f32 0.125, %v3414_v60  ;;  %v3438_v17 = vmul.f32 %v3422_v25, %v3422_v25  ;;  %v3343_v19 = vadd.f32 %v3342_v32, %v3341_v7  ;;  %v4074_v7 = vld [vmem:[%s8610_s19 + $0x20] sm:$0xff]  ;;  %v4077_v32 = vld [vmem:[%s8610_s19 + $0x38] sm:$0xff] }
 0x6b4   : > { %v6220_v51 = vpop.eup %6219  ;;  %v3407_v18 = vadd.f32 %v3406_v39, %v3405_v14  ;;  %v5895_v60 = vpack.c.bf16 %v4075_v10, %v4074_v7 }
 0x6b5   : > { %v3446_v22 = vsub.f32 %v3430_v38, %v3438_v17  ;;  %v3476_v49 = vmul.f32 %v6220_v51, %v8009_v48  ;;  %v3421_v46 = vmul.f32 0.125, %v3343_v19 }
 0x6b6   : > { %v3429_v54 = vmul.f32 0.125, %v3407_v18 }
 0x6b7   : > { %v3454_v23 = vmax.f32 %v3446_v22, 0.0  ;;  %v3484_v26 = vmul.f32 %v3476_v49, %v8041_v8  ;;  %v3437_v33 = vmul.f32 %v3421_v46, %v3421_v46  ;;  %v3526_v28 = vrot.slane %v3476_v49, %v7429_v0 }
 0x6b8   : > { %v6222_v27 = vpop.eup %6221 }
 0x6b9   : > { %v3462_v36 = vadd.f32 1e-05, %v3454_v23  ;;  %v3492_v29 = vsub.f32 %v8020_v1, %v3484_v26  ;;  %v3475_v30 = vmul.f32 %v6222_v27, %v8009_v48  ;;  %v3445_v47 = vsub.f32 %v3429_v54, %v3437_v33 }
 0x6ba   : > { %v3548_v50 = vmul.f32 %v8013_v34, %v3526_v28 }
 0x6bb   : > { %6223 = vrsqrt.f32 %v3462_v36  ;;  %v3483_v31 = vmul.f32 %v3475_v30, %v8053_v43  ;;  %v3522_v63 = vrot.slane %v3475_v30, %v7429_v0  ;;  %v3453_v4 = vmax.f32 %v3445_v47, 0.0 }
 0x6bc   : > { %v3582_v58 = vrot.slane %v3492_v29, %v7429_v0 }
 0x6bd   : > { %v3491_v8 = vsub.f32 %v8020_v1, %v3483_v31  ;;  %v3461_v20 = vadd.f32 1e-05, %v3453_v4  ;;  %v3547_v24 = vmul.f32 %v3522_v63, %v8018_v61 }
 0x6be   : > { %v3604_v53 = vadd.f32 %v3582_v58, %v3548_v50 }
 0x6bf   : > { %v3578_v2 = vrot.slane %v3491_v8, %v7429_v0  ;;  %6225 = vrsqrt.f32 %v3461_v20 }
 0x6c0   : > { %v3612_v43 = vmax.f32 %v3604_v53, 0.0 }
 0x6c1   : > { %v3603_v12 = vadd.f32 %v3578_v2, %v3547_v24 }
 0x6c3   : > { %v3611_v5 = vmax.f32 %v3603_v12, 0.0 }
 0x6c5   : > { %v6224_v35 = vpop.eup %6223  ;;  %5761 = vmatprep.mubr.msk.f32.mxu1 %vm2369_vm1, %v3611_v5 }
 0x6c6   : > { %v3478_v13 = vmul.f32 %v6224_v35, %v8009_v48  ;;  %5762 = vmatmul.mubr.msk.f32.gmra.mrb[36].mxu1 %vm2369_vm1, %v3612_v43 }
 0x6c8   : > { %v3486_v15 = vmul.f32 %v3478_v13, %v3422_v25  ;;  %v3534_v52 = vrot.slane %v3478_v13, %v7429_v0  ;;  %v4076_v25 = vld [vmem:[%s8610_s19 + $0x30] sm:$0xff] }
 0x6c9   : > { %v6226_v42 = vpop.eup %6225  ;;  %v5899_v14 = vpack.c.bf16 %v4077_v32, %v4076_v25 }
 0x6ca   : > { %v3494_v34 = vsub.f32 %v8020_v1, %v3486_v15  ;;  %v3477_v61 = vmul.f32 %v6226_v42, %v8009_v48  ;;  %v3550_v55 = vmul.f32 %v8051_v57, %v3534_v52  ;;  %v4070_v48 = vld [vmem:[%s8610_s19] sm:$0xff] }
 0x6cc   : > { %v3485_v44 = vmul.f32 %v3477_v61, %v3421_v46  ;;  %v3530_v41 = vrot.slane %v3477_v61, %v7429_v0  ;;  %v3590_v21 = vrot.slane %v3494_v34, %v7429_v0 }
 0x6ce   : > { %v3493_v45 = vsub.f32 %v8020_v1, %v3485_v44  ;;  %v3549_v16 = vmul.f32 %v3530_v41, %v8059_v9  ;;  %v3606_v11 = vadd.f32 %v3590_v21, %v3550_v55  ;;  %v4071_v1 = vld [vmem:[%s8610_s19 + $0x8] sm:$0xff]  ;;  %v4072_v9 = vld [vmem:[%s8610_s19 + $0x10] sm:$0xff] }
 0x6cf   : > { %v5887_v57 = vpack.c.bf16 %v4071_v1, %v4070_v48  ;;  %v5891_v6 = vpack.c.bf16 %v4073_v56, %v4072_v9 }
 0x6d0   : > { %v3586_v62 = vrot.slane %v3493_v45, %v7429_v0  ;;  %v3614_v3 = vmax.f32 %v3606_v11, 0.0 }
 0x6d1   : > { %5888 = vmatprep.subr.bf16.mxu0 %v5887_v57 }
 0x6d2   : > { %v3605_v37 = vadd.f32 %v3586_v62, %v3549_v16  ;;  %5890 = vmatpush3.bf16.msra.mxu0 %v5887_v57 }
 0x6d3   : > { %5892 = vmatprep.subr.bf16.mxu0 %v5891_v6 }
 0x6d4   : > { %v3613_v59 = vmax.f32 %v3605_v37, 0.0 }
 0x6d6   : > { %5764 = vmatprep.mubr.msk.f32.mxu1 %vm2369_vm1, %v3613_v59  ;;  %5894 = vmatpush3.bf16.msra.mxu0 %v5891_v6 }
 0x6d7   : > { %5765 = vmatmul.mubr.msk.f32.gmra.mrb[38].mxu1 %vm2369_vm1, %v3614_v3  ;;  %5896 = vmatprep.subr.bf16.mxu0 %v5895_v60 }
 0x6da   : > { %5898 = vmatpush3.bf16.msra.mxu0 %v5895_v60 }
 0x6db   : > { %5900 = vmatprep.subr.bf16.mxu0 %v5899_v14 }
 0x6de   : > { %5902 = vmatpush3.bf16.msra.mxu0 %v5899_v14 }
 0x772   : > { %v8129_v38 = vpop.f32.mrb[32].mxu1 }
 0x773   : > { %v3757_v17 = vsel %vm1909_vm0, %v8129_v38, 0.0  ;;  %v3807_v19 = vmul.f32 %v8129_v38, %v8129_v38  ;;  %v8135_v39 = vpop.f32.mrb[33].mxu1 }
 0x774   : > { %v3758_v51 = vrot.slane %v3757_v17, 4  ;;  %v3750_v22 = vsel %vm1909_vm0, %v8135_v39, 0.0  ;;  %v3806_v49 = vmul.f32 %v8135_v39, %v8135_v39 }
 0x775   : > { %v3821_v18 = vsel %vm1909_vm0, %v3807_v19, 0.0  ;;  %v3751_v46 = vrot.slane %v3750_v22, 4 }
 0x776   : > { %v3759_v23 = vadd.f32 %v3758_v51, %v3757_v17  ;;  %v3822_v26 = vrot.slane %v3821_v18, 4  ;;  %v3814_v54 = vsel %vm1909_vm0, %v3806_v49, 0.0 }
 0x777   : > { %v3752_v33 = vadd.f32 %v3751_v46, %v3750_v22  ;;  %v3815_v27 = vrot.slane %v3814_v54, 4 }
 0x778   : > { %v3760_v36 = vrot.slane %v3759_v23, 2  ;;  %v3823_v29 = vadd.f32 %v3822_v26, %v3821_v18 }
 0x779   : > { %v3753_v30 = vrot.slane %v3752_v33, 2  ;;  %v3816_v47 = vadd.f32 %v3815_v27, %v3814_v54 }
 0x77a   : > { %v3761_v28 = vadd.f32 %v3760_v36, %v3759_v23  ;;  %v3824_v31 = vrot.slane %v3823_v29, 2 }
 0x77b   : > { %v3754_v63 = vadd.f32 %v3753_v30, %v3752_v33  ;;  %v3817_v4 = vrot.slane %v3816_v47, 2 }
 0x77c   : > { %v3762_v58 = vrot.slane %v3761_v28, 1  ;;  %v3825_v8 = vadd.f32 %v3824_v31, %v3823_v29 }
 0x77d   : > { %v3755_v20 = vrot.slane %v3754_v63, 1  ;;  %v3818_v50 = vadd.f32 %v3817_v4, %v3816_v47 }
 0x77e   : > { %v3763_v24 = vadd.f32 %v3762_v58, %v3761_v28  ;;  %v3826_v2 = vrot.slane %v3825_v8, 1  ;;  %v8168_v28 = vld [vmem:[%s8608_s17] sm:$0x1] }
 0x77f   : > { %v3756_v53 = vadd.f32 %v3755_v20, %v3754_v63  ;;  %v3819_v12 = vrot.slane %v3818_v50, 1 }
 0x780   : > { %v3827_v5 = vadd.f32 %v3826_v2, %v3825_v8  ;;  %v3871_v35 = vmul.f32 0.125, %v3763_v24 }
 0x781   : > { %v3820_v43 = vadd.f32 %v3819_v12, %v3818_v50  ;;  %v8143_v13 = vmul.f32 0.125, %v3756_v53  ;;  %v8178_v53 = vld [vmem:[%s8685_s28] sm:$0x1] }
 0x782   : > { %v3879_v15 = vmul.f32 0.125, %v3827_v5  ;;  %v3887_v42 = vmul.f32 %v3871_v35, %v3871_v35  ;;  %v8145_v34 = vpop.f32.mrb[34].mxu1 }
 0x783   : > { %v3878_v61 = vmul.f32 0.125, %v3820_v43  ;;  %v3886_v52 = vmul.f32 %v8143_v13, %v8143_v13  ;;  %v3771_v44 = vsel %vm1909_vm0, %v8145_v34, 0.0  ;;  %v3809_v41 = vmul.f32 %v8145_v34, %v8145_v34  ;;  %v8153_v21 = vpop.f32.mrb[35].mxu1 }
 0x784   : > { %v3895_v45 = vsub.f32 %v3879_v15, %v3887_v42  ;;  %v3772_v55 = vrot.slane %v3771_v44, 4  ;;  %v3764_v16 = vsel %vm1909_vm0, %v8153_v21, 0.0  ;;  %v3808_v62 = vmul.f32 %v8153_v21, %v8153_v21 }
 0x785   : > { %v3894_v11 = vsub.f32 %v3878_v61, %v3886_v52  ;;  %v3835_v37 = vsel %vm1909_vm0, %v3809_v41, 0.0  ;;  %v3765_v59 = vrot.slane %v3764_v16, 4 }
 0x786   : > { %v3903_v3 = vmax.f32 %v3895_v45, 0.0  ;;  %v3773_v48 = vadd.f32 %v3772_v55, %v3771_v44  ;;  %v3836_v1 = vrot.slane %v3835_v37, 4  ;;  %v3828_v57 = vsel %vm1909_vm0, %v3808_v62, 0.0 }
 0x787   : > { %v3902_v9 = vmax.f32 %v3894_v11, 0.0  ;;  %v3766_v56 = vadd.f32 %v3765_v59, %v3764_v16  ;;  %v3829_v6 = vrot.slane %v3828_v57, 4 }
 0x788   : > { %v3911_v7 = vadd.f32 1e-05, %v3903_v3  ;;  %v3774_v10 = vrot.slane %v3773_v48, 2  ;;  %v3837_v60 = vadd.f32 %v3836_v1, %v3835_v37 }
 0x789   : > { %v3910_v25 = vadd.f32 1e-05, %v3902_v9  ;;  %v3767_v32 = vrot.slane %v3766_v56, 2  ;;  %v3830_v14 = vadd.f32 %v3829_v6, %v3828_v57 }
 0x78a   : > { %6227 = vrsqrt.f32 %v3911_v7  ;;  %v3775_v17 = vadd.f32 %v3774_v10, %v3773_v48  ;;  %v3838_v19 = vrot.slane %v3837_v60, 2 }
 0x78b   : > { %6229 = vrsqrt.f32 %v3910_v25  ;;  %v3768_v51 = vadd.f32 %v3767_v32, %v3766_v56  ;;  %v3831_v22 = vrot.slane %v3830_v14, 2 }
 0x78c   : > { %v3776_v49 = vrot.slane %v3775_v17, 1  ;;  %v3839_v18 = vadd.f32 %v3838_v19, %v3837_v60 }
 0x78d   : > { %v3769_v46 = vrot.slane %v3768_v51, 1  ;;  %v3832_v23 = vadd.f32 %v3831_v22, %v3830_v14 }
 0x78e   : > { %v3777_v26 = vadd.f32 %v3776_v49, %v3775_v17  ;;  %v3840_v54 = vrot.slane %v3839_v18, 1 }
 0x78f   : > { %v3770_v33 = vadd.f32 %v3769_v46, %v3768_v51  ;;  %v3833_v27 = vrot.slane %v3832_v23, 1 }
 0x790   : > { %v3841_v36 = vadd.f32 %v3840_v54, %v3839_v18  ;;  %v8161_v29 = vmul.f32 0.125, %v3777_v26 }
 0x791   : > { %v3834_v30 = vadd.f32 %v3833_v27, %v3832_v23  ;;  %v8163_v47 = vmul.f32 0.125, %v3770_v33 }
 0x792   : > { %v3881_v31 = vmul.f32 0.125, %v3841_v36  ;;  %v3889_v63 = vmul.f32 %v8161_v29, %v8161_v29 }
 0x793   : > { %v3880_v4 = vmul.f32 0.125, %v3834_v30  ;;  %v3888_v58 = vmul.f32 %v8163_v47, %v8163_v47 }
 0x794   : > { %v6228_v8 = vpop.eup %6227  ;;  %v3897_v20 = vsub.f32 %v3881_v31, %v3889_v63 }
 0x795   : > { %v6230_v50 = vpop.eup %6229  ;;  %v3927_v24 = vmul.f32 %v6228_v8, %v8168_v28  ;;  %v3896_v2 = vsub.f32 %v3880_v4, %v3888_v58 }
 0x796   : > { %v3926_v12 = vmul.f32 %v6230_v50, %v8168_v28  ;;  %v3905_v5 = vmax.f32 %v3897_v20, 0.0 }
 0x797   : > { %v3935_v43 = vmul.f32 %v3927_v24, %v3871_v35  ;;  %v3965_v15 = vrot.slane %v3927_v24, %v7429_v0  ;;  %v3904_v42 = vmax.f32 %v3896_v2, 0.0 }
 0x798   : > { %v3934_v61 = vmul.f32 %v3926_v12, %v8143_v13  ;;  %v3961_v52 = vrot.slane %v3926_v12, %v7429_v0  ;;  %v3913_v44 = vadd.f32 1e-05, %v3905_v5 }
 0x799   : > { %v3943_v41 = vsub.f32 %v8178_v53, %v3935_v43  ;;  %v3912_v45 = vadd.f32 1e-05, %v3904_v42  ;;  %v3999_v55 = vmul.f32 %v8129_v38, %v3965_v15  ;;  %v8188_v11 = vpop.f32.mrb[36].mxu1 }
 0x79a   : > { %v3942_v16 = vsub.f32 %v8178_v53, %v3934_v61  ;;  %v3998_v62 = vmul.f32 %v3961_v52, %v8135_v39  ;;  %6231 = vrsqrt.f32 %v3913_v44  ;;  %v3785_v13 = vsel %vm1909_vm0, %v8188_v11, 0.0  ;;  %v8195_v59 = vpop.f32.mrb[37].mxu1 }
 0x79b   : > { %v4021_v35 = vrot.slane %v3943_v41, %v7429_v0  ;;  %6233 = vrsqrt.f32 %v3912_v45  ;;  %v3811_v37 = vmul.f32 %v8188_v11, %v8188_v11  ;;  %v3786_v3 = vrot.slane %v3785_v13, 4 }
 0x79c   : > { %v4017_v38 = vrot.slane %v3942_v16, %v7429_v0  ;;  %v3778_v39 = vsel %vm1909_vm0, %v8195_v59, 0.0  ;;  %v3810_v48 = vmul.f32 %v8195_v59, %v8195_v59 }
 0x79d   : > { %v4055_v1 = vadd.f32 %v4021_v35, %v3999_v55  ;;  %v3849_v57 = vsel %vm1909_vm0, %v3811_v37, 0.0  ;;  %v3779_v9 = vrot.slane %v3778_v39, 4  ;;  %v3787_v6 = vadd.f32 %v3786_v3, %v3785_v13 }
 0x79e   : > { %v4054_v56 = vadd.f32 %v4017_v38, %v3998_v62  ;;  %v3850_v7 = vrot.slane %v3849_v57, 4  ;;  %v3842_v10 = vsel %vm1909_vm0, %v3810_v48, 0.0 }
 0x79f   : > { %v3780_v60 = vadd.f32 %v3779_v9, %v3778_v39  ;;  %v3843_v25 = vrot.slane %v3842_v10, 4  ;;  %v3788_v14 = vrot.slane %v3787_v6, 2  ;;  %v4063_v19 = vmax.f32 %v4055_v1, 0.0 }
 0x7a0   : > { %v4062_v32 = vmax.f32 %v4054_v56, 0.0  ;;  %v3851_v17 = vadd.f32 %v3850_v7, %v3849_v57 }
 0x7a1   : > { %v3781_v51 = vrot.slane %v3780_v60, 2  ;;  %v3844_v22 = vadd.f32 %v3843_v25, %v3842_v10  ;;  %v3789_v49 = vadd.f32 %v3788_v14, %v3787_v6 }
 0x7a2   : > { %v3852_v18 = vrot.slane %v3851_v17, 2  ;;  %5783 = vmatprep.mubr.msk.f32.mxu0 %vm1909_vm0, %v4062_v32 }
 0x7a3   : > { %v3782_v46 = vadd.f32 %v3781_v51, %v3780_v60  ;;  %v3845_v23 = vrot.slane %v3844_v22, 2  ;;  %5784 = vmatmul.mubr.msk.f32.vlgmr.msra.gmra.mrb[40].mxu0 %vm1909_vm0, %v4063_v19  ;;  %v3790_v54 = vrot.slane %v3789_v49, 1 }
 0x7a4   : > { %v6232_v26 = vpop.eup %6231  ;;  %v3853_v33 = vadd.f32 %v3852_v18, %v3851_v17 }
 0x7a5   : > { %v6234_v27 = vpop.eup %6233  ;;  %v3929_v36 = vmul.f32 %v6232_v26, %v8168_v28  ;;  %v3783_v30 = vrot.slane %v3782_v46, 1  ;;  %v3846_v31 = vadd.f32 %v3845_v23, %v3844_v22  ;;  %v3791_v4 = vadd.f32 %v3790_v54, %v3789_v49 }
 0x7a6   : > { %v3928_v63 = vmul.f32 %v6234_v27, %v8168_v28  ;;  %v3854_v58 = vrot.slane %v3853_v33, 1 }
 0x7a7   : > { %v3937_v8 = vmul.f32 %v3929_v36, %v8161_v29  ;;  %v3973_v20 = vrot.slane %v3929_v36, %v7429_v0  ;;  %v3784_v50 = vadd.f32 %v3783_v30, %v3782_v46  ;;  %v3847_v24 = vrot.slane %v3846_v31, 1 }
 0x7a8   : > { %v3936_v2 = vmul.f32 %v3928_v63, %v8163_v47  ;;  %v3969_v12 = vrot.slane %v3928_v63, %v7429_v0  ;;  %v3855_v5 = vadd.f32 %v3854_v58, %v3853_v33  ;;  %v8212_v43 = vmul.f32 0.125, %v3791_v4 }
 0x7a9   : > { %v3945_v15 = vsub.f32 %v8178_v53, %v3937_v8  ;;  %v3848_v42 = vadd.f32 %v3847_v24, %v3846_v31  ;;  %v8215_v61 = vmul.f32 0.125, %v3784_v50  ;;  %v4001_v52 = vmul.f32 %v8145_v34, %v3973_v20 }
 0x7aa   : > { %v3944_v29 = vsub.f32 %v8178_v53, %v3936_v2  ;;  %v3883_v44 = vmul.f32 0.125, %v3855_v5  ;;  %v3891_v41 = vmul.f32 %v8212_v43, %v8212_v43  ;;  %v4000_v45 = vmul.f32 %v3969_v12, %v8153_v21  ;;  %v8225_v62 = vpop.f32.mrb[38].mxu1 }
 0x7ab   : > { %v4029_v47 = vrot.slane %v3945_v15, %v7429_v0  ;;  %v3882_v55 = vmul.f32 0.125, %v3848_v42  ;;  %v3890_v16 = vmul.f32 %v8215_v61, %v8215_v61  ;;  %v3799_v34 = vsel %vm1909_vm0, %v8225_v62, 0.0  ;;  %v8232_v38 = vpop.f32.mrb[39].mxu1 }
 0x7ac   : > { %v4025_v35 = vrot.slane %v3944_v29, %v7429_v0  ;;  %v3899_v13 = vsub.f32 %v3883_v44, %v3891_v41  ;;  %v3813_v37 = vmul.f32 %v8225_v62, %v8225_v62  ;;  %v3800_v21 = vrot.slane %v3799_v34, 4 }
 0x7ad   : > { %v4057_v3 = vadd.f32 %v4029_v47, %v4001_v52  ;;  %v3898_v39 = vsub.f32 %v3882_v55, %v3890_v16  ;;  %v3792_v48 = vsel %vm1909_vm0, %v8232_v38, 0.0  ;;  %v3812_v14 = vmul.f32 %v8232_v38, %v8232_v38 }
 0x7ae   : > { %v4056_v1 = vadd.f32 %v4025_v35, %v4000_v45  ;;  %v3907_v57 = vmax.f32 %v3899_v13, 0.0  ;;  %v3863_v9 = vsel %vm1909_vm0, %v3813_v37, 0.0  ;;  %v3793_v56 = vrot.slane %v3792_v48, 4 }
 0x7af   : > { %v3906_v6 = vmax.f32 %v3898_v39, 0.0  ;;  %v3801_v7 = vadd.f32 %v3800_v21, %v3799_v34  ;;  %v3864_v10 = vrot.slane %v3863_v9, 4  ;;  %v4065_v17 = vmax.f32 %v4057_v3, 0.0 }
 0x7b0   : > { %v4064_v60 = vmax.f32 %v4056_v1, 0.0  ;;  %v3915_v25 = vadd.f32 1e-05, %v3907_v57  ;;  %v3794_v32 = vadd.f32 %v3793_v56, %v3792_v48  ;;  %v3856_v18 = vsel %vm1909_vm0, %v3812_v14, 0.0 }
 0x7b1   : > { %v3914_v19 = vadd.f32 1e-05, %v3906_v6  ;;  %v3802_v51 = vrot.slane %v3801_v7, 2  ;;  %v3865_v22 = vadd.f32 %v3864_v10, %v3863_v9  ;;  %v3857_v26 = vrot.slane %v3856_v18, 4 }
 0x7b2   : > { %6235 = vrsqrt.f32 %v3915_v25  ;;  %v3795_v49 = vrot.slane %v3794_v32, 2  ;;  %5786 = vmatprep.mubr.msk.f32.mxu0 %vm1909_vm0, %v4064_v60 }
 0x7b3   : > { %6237 = vrsqrt.f32 %v3914_v19  ;;  %v3803_v46 = vadd.f32 %v3802_v51, %v3801_v7  ;;  %v3866_v23 = vrot.slane %v3865_v22, 2  ;;  %5787 = vmatmul.mubr.msk.f32.gmra.mrb[42].mxu0 %vm1909_vm0, %v4065_v17  ;;  %v3858_v36 = vadd.f32 %v3857_v26, %v3856_v18 }
 0x7b4   : > { %v3796_v54 = vadd.f32 %v3795_v49, %v3794_v32 }
 0x7b5   : > { %v3804_v33 = vrot.slane %v3803_v46, 1  ;;  %v3867_v27 = vadd.f32 %v3866_v23, %v3865_v22  ;;  %v3859_v4 = vrot.slane %v3858_v36, 2 }
 0x7b6   : > { %v3797_v30 = vrot.slane %v3796_v54, 1 }
 0x7b7   : > { %v3805_v31 = vadd.f32 %v3804_v33, %v3803_v46  ;;  %v3868_v63 = vrot.slane %v3867_v27, 1  ;;  %v3860_v50 = vadd.f32 %v3859_v4, %v3858_v36  ;;  %v6096_v36 = vld [vmem:[#allocation16 + $0xc] ss:$20 sps:$4 sm:$0xff]   ;;  %v6105_v4 = vld [vmem:[#allocation16 + $0x54] ss:$20 sps:$4 sm:$0xff]  }
 0x7b8   : > { %v3798_v58 = vadd.f32 %v3797_v30, %v3796_v54  ;;  %v6091_v30 = vld [vmem:[#allocation16] ss:$20 sps:$4 sm:$0xff]   ;;  %4873 = vmatprep.subr.bf16.mxu0 %v6096_v36 }
 0x7b9   : > { %v3869_v8 = vadd.f32 %v3868_v63, %v3867_v27  ;;  %v3877_v20 = vmul.f32 0.125, %v3805_v31  ;;  %v3861_v5 = vrot.slane %v3860_v50, 1  ;;  %v6094_v31 = vld [vmem:[#allocation16 + $0x8] ss:$20 sps:$4 sm:$0xff]   ;;  %v6100_v63 = vld [vmem:[#allocation16 + $0x30] ss:$20 sps:$4 sm:$0xff]  }
 0x7ba   : > { %v3876_v24 = vmul.f32 0.125, %v3798_v58  ;;  %4874 = vmatpush1.bf16.msra.mxu0 %v6094_v31  ;;  %v6108_v58 = vld [vmem:[#allocation16 + $0x5c] ss:$20 sps:$4 sm:$0xff]  }
 0x7bb   : > { %v3885_v2 = vmul.f32 0.125, %v3869_v8  ;;  %v3893_v12 = vmul.f32 %v3877_v20, %v3877_v20  ;;  %v3862_v44 = vadd.f32 %v3861_v5, %v3860_v50  ;;  %v6103_v8 = vld [vmem:[#allocation16 + $0x50] ss:$20 sps:$4 sm:$0xff]  }
 0x7bc   : > { %v6236_v15 = vpop.eup %6235  ;;  %v3892_v41 = vmul.f32 %v3876_v24, %v3876_v24  ;;  %v6111_v50 = vld [vmem:[#allocation16 + $0x7c] ss:$20 sps:$4 sm:$0xff]   ;;  %v6117_v5 = vld [vmem:[#allocation16 + $0xa4] ss:$20 sps:$4 sm:$0xff]  }
 0x7bd   : > { %v6238_v42 = vpop.eup %6237  ;;  %v3931_v52 = vmul.f32 %v6236_v15, %v8168_v28  ;;  %v3901_v29 = vsub.f32 %v3885_v2, %v3893_v12  ;;  %v3884_v35 = vmul.f32 0.125, %v3862_v44  ;;  %v6109_v2 = vld [vmem:[#allocation16 + $0x78] ss:$20 sps:$4 sm:$0xff]   ;;  %v6112_v12 = vld [vmem:[#allocation16 + $0x80] ss:$20 sps:$4 sm:$0xff]  }
 0x7be   : > { %v3930_v47 = vmul.f32 %v6238_v42, %v8168_v28  ;;  %v6120_v15 = vld [vmem:[#allocation16 + $0xac] ss:$20 sps:$4 sm:$0xff]   ;;  %v6126_v44 = vld [vmem:[#allocation16 + $0xd4] ss:$20 sps:$4 sm:$0xff]  }
 0x7bf   : > { %v3939_v45 = vmul.f32 %v3931_v52, %v8212_v43  ;;  %v3981_v55 = vrot.slane %v3931_v52, %v7429_v0  ;;  %v3909_v16 = vmax.f32 %v3901_v29, 0.0  ;;  %v3900_v39 = vsub.f32 %v3884_v35, %v3892_v41  ;;  %v6115_v42 = vld [vmem:[#allocation16 + $0xa0] ss:$20 sps:$4 sm:$0xff]   ;;  %v6118_v52 = vld [vmem:[#allocation16 + $0xa8] ss:$20 sps:$4 sm:$0xff]  }
 0x7c0   : > { %v3938_v13 = vmul.f32 %v3930_v47, %v8215_v61  ;;  %v3977_v34 = vrot.slane %v3930_v47, %v7429_v0  ;;  %v6123_v29 = vld [vmem:[#allocation16 + $0xcc] ss:$20 sps:$4 sm:$0xff]   ;;  %v6121_v41 = vld [vmem:[#allocation16 + $0xc8] ss:$20 sps:$4 sm:$0xff]   ;;  %v6124_v47 = vld [vmem:[#allocation16 + $0xd0] ss:$20 sps:$4 sm:$0xff]  }
 0x7c1   : > { %v3947_v37 = vsub.f32 %v8178_v53, %v3939_v45  ;;  %v3917_v3 = vadd.f32 1e-05, %v3909_v16  ;;  %v4003_v48 = vmul.f32 %v8188_v11, %v3981_v55  ;;  %v3908_v43 = vmax.f32 %v3900_v39, 0.0  ;;  %v6129_v45 = vld [vmem:[#allocation16 + $0xf4] ss:$20 sps:$4 sm:$0xff]  }
 0x7c2   : > { %v3946_v21 = vsub.f32 %v8178_v53, %v3938_v13  ;;  %v4002_v57 = vmul.f32 %v3977_v34, %v8195_v59  ;;  %v6132_v55 = vld [vmem:[#allocation16 + $0xfc] ss:$20 sps:$4 sm:$0xff]   ;;  %v6130_v35 = vld [vmem:[#allocation16 + $0xf8] ss:$20 sps:$4 sm:$0xff]  }
 0x7c3   : > { %v4037_v1 = vrot.slane %v3947_v37, %v7429_v0  ;;  %6239 = vrsqrt.f32 %v3917_v3  ;;  %v3916_v61 = vadd.f32 1e-05, %v3908_v43  ;;  %v6127_v16 = vld [vmem:[#allocation16 + $0xf0] ss:$20 sps:$4 sm:$0xff]   ;;  %v6133_v37 = vld [vmem:[#allocation16 + $0x118] ss:$20 sps:$4 sm:$0xff]  }
 0x7c4   : > { %v4033_v9 = vrot.slane %v3946_v21, %v7429_v0  ;;  %v6135_v13 = vld [vmem:[#allocation16 + $0x11c] ss:$20 sps:$4 sm:$0xff]   ;;  %v6138_v34 = vld [vmem:[#allocation16 + $0x124] ss:$20 sps:$4 sm:$0xff]   ;;  %v6136_v3 = vld [vmem:[#allocation16 + $0x120] ss:$20 sps:$4 sm:$0xff]  }
 0x7c5   : > { %v4059_v56 = vadd.f32 %v4037_v1, %v4003_v48  ;;  %6241 = vrsqrt.f32 %v3916_v61  ;;  %v8268_v39 = vld [vmem:[#allocation16 + $0x10] ss:$20 sps:$4 sm:$0xff]   ;;  %v6645_v21 = vmov 0  }
 0x7c6   : > { %v4058_v6 = vadd.f32 %v4033_v9, %v4002_v57  ;;  %4832 = vmatprep.mubr.bf16.mxu1 %v6645_v21 }
 0x7c7   : > { %v4067_v10 = vmax.f32 %v4059_v56, 0.0 }
 0x7c8   : > { %v4066_v7 = vmax.f32 %v4058_v6, 0.0 }
 0x7ca   : > { %5789 = vmatprep.mubr.msk.f32.mxu0 %vm1909_vm0, %v4066_v7 }
 0x7cb   : > { %5790 = vmatmul.mubr.msk.f32.gmra.mrb[44].mxu0 %vm1909_vm0, %v4067_v10 }
 0x7cd   : > { %v6240_v60 = vpop.eup %6239 }
 0x7ce   : > { %v3933_v11 = vmul.f32 %v6240_v60, %v8168_v28 }
 0x7cf   : > { %v6242_v32 = vpop.eup %6241 }
 0x7d0   : > { %v3941_v25 = vmul.f32 %v3933_v11, %v3877_v20  ;;  %v3932_v59 = vmul.f32 %v6242_v32, %v8168_v28  ;;  %v3989_v17 = vrot.slane %v3933_v11, %v7429_v0  ;;  %v6093_v28 = vld [vmem:[#allocation16 + $0x4] ss:$20 sps:$4 sm:$0xff]  }
 0x7d1   : > { %4800 = vmatprep.subr.bf16.mxu1 %v6093_v28  ;;  %v6106_v20 = vld [vmem:[#allocation16 + $0x58] ss:$20 sps:$4 sm:$0xff]  }
 0x7d2   : > { %v3949_v14 = vsub.f32 %v8178_v53, %v3941_v25  ;;  %v3940_v19 = vmul.f32 %v3932_v59, %v3876_v24  ;;  %v3985_v51 = vrot.slane %v3932_v59, %v7429_v0  ;;  %v4005_v18 = vmul.f32 %v8225_v62, %v3989_v17  ;;  %4801 = vmatpush1.bf16.msra.mxu1 %v6091_v30  ;;  %v6102_v62 = vld [vmem:[#allocation16 + $0x34] ss:$20 sps:$4 sm:$0xff]   ;;  %v6114_v24 = vld [vmem:[#allocation16 + $0x84] ss:$20 sps:$4 sm:$0xff]  }
 0x7d3   : > { %4875 = vmatprep.subr.bf16.mxu0 %v6102_v62 }
 0x7d4   : > { %v4045_v22 = vrot.slane %v3949_v14, %v7429_v0  ;;  %v3948_v49 = vsub.f32 %v8178_v53, %v3940_v19  ;;  %v4004_v46 = vmul.f32 %v3985_v51, %v8232_v38  ;;  %v6099_v53 = vld [vmem:[#allocation16 + $0x2c] ss:$20 sps:$4 sm:$0xff]   ;;  %v6097_v38 = vld [vmem:[#allocation16 + $0x28] ss:$20 sps:$4 sm:$0xff]   ;;  %4876 = vmatpush1.bf16.msra.mxu0 %v6100_v63 }
 0x7d5   : > { %4802 = vmatprep.subr.bf16.mxu1 %v6099_v53  ;;  %4877 = vmatprep.subr.bf16.mxu0 %v6108_v58 }
 0x7d6   : > { %v4041_v23 = vrot.slane %v3948_v49, %v7429_v0  ;;  %v4061_v26 = vadd.f32 %v4045_v22, %v4005_v18  ;;  %4803 = vmatpush1.bf16.msra.mxu1 %v6097_v38 }
 0x7d7   : > { %4804 = vmatprep.subr.bf16.mxu1 %v6105_v4 }
 0x7d8   : > { %v4060_v54 = vadd.f32 %v4041_v23, %v4004_v46  ;;  %v4069_v27 = vmax.f32 %v4061_v26, 0.0  ;;  %4878 = vmatpush1.bf16.msra.mxu0 %v6106_v20 }
 0x7d9   : > { %4879 = vmatprep.subr.bf16.mxu0 %v6114_v24 }
 0x7da   : > { %v4068_v33 = vmax.f32 %v4060_v54, 0.0  ;;  %4805 = vmatpush1.bf16.msra.mxu1 %v6103_v8 }
 0x7db   : > { %4806 = vmatprep.subr.bf16.mxu1 %v6111_v50 }
 0x7dc   : > { %5792 = vmatprep.mubr.msk.f32.mxu0 %vm1909_vm0, %v4068_v33  ;;  %4880 = vmatpush1.bf16.msra.mxu0 %v6112_v12 }
 0x7dd   : > { %5793 = vmatmul.mubr.msk.f32.gmra.mrb[46].mxu0 %vm1909_vm0, %v4069_v27  ;;  %4881 = vmatprep.subr.bf16.mxu0 %v6120_v15 }
 0x7de   : > { %4807 = vmatpush1.bf16.msra.mxu1 %v6109_v2  ;;  %4905 = vmatprep.mubr.bf16.mxu0 %v6645_v21 }
 0x7df   : > { %4808 = vmatprep.subr.bf16.mxu1 %v6117_v5 }
 0x7e0   : > { %4882 = vmatpush1.bf16.msra.mxu0 %v6118_v52 }
 0x7e1   : > { %4883 = vmatprep.subr.bf16.mxu0 %v6126_v44 }
 0x7e2   : > { %4809 = vmatpush1.bf16.msra.mxu1 %v6115_v42 }
 0x7e3   : > { %4810 = vmatprep.subr.bf16.mxu1 %v6123_v29 }
 0x7e4   : > { %4884 = vmatpush1.bf16.msra.mxu0 %v6124_v47 }
 0x7e5   : > { %4885 = vmatprep.subr.bf16.mxu0 %v6132_v55 }
 0x7e6   : > { %4811 = vmatpush1.bf16.msra.mxu1 %v6121_v41 }
 0x7e7   : > { %4812 = vmatprep.subr.bf16.mxu1 %v6129_v45 }
 0x7e8   : > { %4886 = vmatpush1.bf16.msra.mxu0 %v6130_v35 }
 0x7e9   : > { %4887 = vmatprep.subr.bf16.mxu0 %v6138_v34 }
 0x7ea   : > { %4813 = vmatpush1.bf16.msra.mxu1 %v6127_v16 }
 0x7eb   : > { %4814 = vmatprep.subr.bf16.mxu1 %v6135_v13 }
 0x7ec   : > { %4888 = vmatpush1.bf16.msra.mxu0 %v6136_v3 }
 0x7ee   : > { %4815 = vmatpush1.bf16.msra.mxu1 %v6133_v37 }
 0x7ef   : > { %5795 = vmatprep.subr.bf16.mxu1 %v8268_v39 }
 0x876   : > { %v8273_v48 = vpop.f32.mrb[40].mxu0 }
 0x877   : > { %v4215_v1 = vrot.slane %v8273_v48, 4  ;;  %v4258_v43 = vmul.f32 %v8273_v48, %v8273_v48  ;;  %v8278_v57 = vpop.f32.mrb[41].mxu0 }
 0x878   : > { %v4209_v9 = vrot.slane %v8278_v57, 4  ;;  %v4257_v56 = vmul.f32 %v8278_v57, %v8278_v57 }
 0x879   : > { %v4216_v61 = vadd.f32 %v8273_v48, %v4215_v1  ;;  %v4271_v6 = vrot.slane %v4258_v43, 4 }
 0x87a   : > { %v4210_v7 = vadd.f32 %v4209_v9, %v8278_v57  ;;  %v4265_v10 = vrot.slane %v4257_v56, 4 }
 0x87b   : > { %v4217_v60 = vrot.slane %v4216_v61, 2  ;;  %v4272_v11 = vadd.f32 %v4271_v6, %v4258_v43 }
 0x87c   : > { %v4211_v25 = vrot.slane %v4210_v7, 2  ;;  %v4266_v32 = vadd.f32 %v4265_v10, %v4257_v56 }
 0x87d   : > { %v4218_v14 = vadd.f32 %v4217_v60, %v4216_v61  ;;  %v4273_v59 = vrot.slane %v4272_v11, 2 }
 0x87e   : > { %v4212_v17 = vadd.f32 %v4211_v25, %v4210_v7  ;;  %v4267_v19 = vrot.slane %v4266_v32, 2  ;;  %v8304_v25 = vld [vmem:[%s8686_s14] sm:$0x1]  ;;  %s8413_s14 = scalar_lea.hbm %s8688_s12, %s5420_s21 }
 0x87f   : > { %v4219_v51 = vrot.slane %v4218_v14, 1  ;;  %v4274_v22 = vadd.f32 %v4273_v59, %v4272_v11 }
 0x880   : > { %v4213_v49 = vrot.slane %v4212_v17, 1  ;;  %v4268_v18 = vadd.f32 %v4267_v19, %v4266_v32 }
 0x881   : > { %v4220_v46 = vadd.f32 %v4219_v51, %v4218_v14  ;;  %v4275_v23 = vrot.slane %v4274_v22, 1 }
 0x882   : > { %v4214_v26 = vadd.f32 %v4213_v49, %v4212_v17  ;;  %v4269_v54 = vrot.slane %v4268_v18, 1 }
 0x883   : > { %v4276_v33 = vadd.f32 %v4275_v23, %v4274_v22  ;;  %v4314_v27 = vmul.f32 0.125, %v4220_v46  ;;  %v8314_v46 = vld [vmem:[%s8687_s1] sm:$0x1]  ;;  %s6646_s1 = smov [#allocation18]  }
 0x884   : > { %v4270_v28 = vadd.f32 %v4269_v54, %v4268_v18  ;;  %v4313_v36 = vmul.f32 0.125, %v4214_v26  ;;  %s6517_s8 = sshll.u32 %s6646_s1, 4  ;;  %s6518_s8 = int_to_ptr.vmem [resolvable:$false] %s6517_s8 }
 0x885   : > { %v4322_v30 = vmul.f32 0.125, %v4276_v33  ;;  %v4330_v31 = vmul.f32 %v4314_v27, %v4314_v27  ;;  %s6519_s3 = scalar_lea.vmem %s6518_s8, 2048  ;;  %p6520_p2 = scmp.lt.s32.totalorder %s8415_s7, %s6518_s8 }
 0x886   : > { %v4321_v53 = vmul.f32 0.125, %v4270_v28  ;;  %v4329_v62 = vmul.f32 %v4313_v36, %v4313_v36  ;;  %v8285_v38 = vpop.f32.mrb[42].mxu0  ;;  %p6521_p8 = scmp.lt.s32.totalorder %s6519_s3, %s6513_s27 }
 0x887   : > { %v4338_v63 = vsub.f32 %v4322_v30, %v4330_v31  ;;  %v4227_v4 = vrot.slane %v8285_v38, 4  ;;  %v4260_v58 = vmul.f32 %v8285_v38, %v8285_v38  ;;  %v8290_v8 = vpop.f32.mrb[43].mxu0 }
 0x888   : > { %v4337_v20 = vsub.f32 %v4321_v53, %v4329_v62  ;;  %v4221_v50 = vrot.slane %v8290_v8, 4  ;;  %v4259_v24 = vmul.f32 %v8290_v8, %v8290_v8  ;;  %p6522_p10 = por %p6521_p8, %p6520_p2 }
 0x889   : > { %v4346_v2 = vmax.f32 %v4338_v63, 0.0  ;;  %v4228_v12 = vadd.f32 %v8285_v38, %v4227_v4  ;;  %v4283_v5 = vrot.slane %v4260_v58, 4 }
 0x88a   : > { %v4345_v15 = vmax.f32 %v4337_v20, 0.0  ;;  %v4222_v42 = vadd.f32 %v4221_v50, %v8290_v8  ;;  %v4277_v52 = vrot.slane %v4259_v24, 4  ;;  %p6523_p11 = pnand %p6522_p10, %p6516_p0 }
 0x88b   : > { %v4354_v29 = vadd.f32 1e-05, %v4346_v2  ;;  %v4229_v44 = vrot.slane %v4228_v12, 2  ;;  %v4284_v41 = vadd.f32 %v4283_v5, %v4260_v58 }
 0x88c   : > { %v4353_v47 = vadd.f32 1e-05, %v4345_v15  ;;  %v4223_v45 = vrot.slane %v4222_v42, 2  ;;  %v4278_v55 = vadd.f32 %v4277_v52, %v4259_v24 }
 0x88d   : > { %6243 = vrsqrt.f32 %v4354_v29  ;;  %v4230_v16 = vadd.f32 %v4229_v44, %v4228_v12  ;;  %v4285_v35 = vrot.slane %v4284_v41, 2 }
 0x88e   : > { %6245 = vrsqrt.f32 %v4353_v47  ;;  %v4224_v13 = vadd.f32 %v4223_v45, %v4222_v42  ;;  %v4279_v34 = vrot.slane %v4278_v55, 2 }
 0x88f   : > { %v4231_v37 = vrot.slane %v4230_v16, 1  ;;  %v4286_v3 = vadd.f32 %v4285_v35, %v4284_v41 }
 0x890   : > { %v4225_v1 = vrot.slane %v4224_v13, 1  ;;  %v4280_v43 = vadd.f32 %v4279_v34, %v4278_v55 }
 0x891   : > { %v4232_v9 = vadd.f32 %v4231_v37, %v4230_v16  ;;  %v4287_v56 = vrot.slane %v4286_v3, 1 }
 0x892   : > { %v4226_v61 = vadd.f32 %v4225_v1, %v4224_v13  ;;  %v4281_v6 = vrot.slane %v4280_v43, 1 }
 0x893   : > { %v4288_v7 = vadd.f32 %v4287_v56, %v4286_v3  ;;  %v8297_v10 = vmul.f32 0.125, %v4232_v9  ;;  %v6140_v3 = vld [vmem:[#allocation16 + $0x38] ss:$20 sps:$4 sm:$0xff]  }
 0x894   : > { %v4282_v60 = vadd.f32 %v4281_v6, %v4280_v43  ;;  %v8299_v11 = vmul.f32 0.125, %v4226_v61 }
 0x895   : > { %v4324_v32 = vmul.f32 0.125, %v4288_v7  ;;  %v4332_v14 = vmul.f32 %v8297_v10, %v8297_v10 }
 0x896   : > { %v4323_v59 = vmul.f32 0.125, %v4282_v60  ;;  %v4331_v17 = vmul.f32 %v8299_v11, %v8299_v11 }
 0x897   : > { %v6244_v19 = vpop.eup %6243  ;;  %v4340_v51 = vsub.f32 %v4324_v32, %v4332_v14 }
 0x898   : > { %v6246_v22 = vpop.eup %6245  ;;  %v4370_v49 = vmul.f32 %v6244_v19, %v8304_v25  ;;  %v4339_v18 = vsub.f32 %v4323_v59, %v4331_v17  ;;  %v6141_v19 = vld [vmem:[#allocation16 + $0x60] ss:$20 sps:$4 sm:$0xff]  }
 0x899   : > { %v4369_v23 = vmul.f32 %v6246_v22, %v8304_v25  ;;  %v4348_v26 = vmax.f32 %v4340_v51, 0.0 }
 0x89a   : > { %v4378_v54 = vmul.f32 %v4370_v49, %v4314_v27  ;;  %v4408_v33 = vrot.slane %v4370_v49, %v7429_v0  ;;  %v4347_v28 = vmax.f32 %v4339_v18, 0.0 }
 0x89b   : > { %v4377_v30 = vmul.f32 %v4369_v23, %v4313_v36  ;;  %v4404_v31 = vrot.slane %v4369_v23, %v7429_v0  ;;  %v4356_v53 = vadd.f32 1e-05, %v4348_v26 }
 0x89c   : > { %v4386_v62 = vsub.f32 %v8314_v46, %v4378_v54  ;;  %v4355_v63 = vadd.f32 1e-05, %v4347_v28  ;;  %v4442_v58 = vmul.f32 %v8273_v48, %v4408_v33 }
 0x89d   : > { %v4385_v4 = vsub.f32 %v8314_v46, %v4377_v30  ;;  %6247 = vrsqrt.f32 %v4356_v53  ;;  %v4441_v27 = vmul.f32 %v4404_v31, %v8278_v57 }
 0x89e   : > { %v4464_v20 = vrot.slane %v4386_v62, %v7429_v0  ;;  %6249 = vrsqrt.f32 %v4355_v63  ;;  %v8323_v50 = vpop.f32.mrb[44].mxu0  ;;  %v6142_v62 = vld [vmem:[#allocation16 + $0x88] ss:$20 sps:$4 sm:$0xff]  }
 0x89f   : > { %v4460_v36 = vrot.slane %v4385_v4, %v7429_v0  ;;  %v4239_v24 = vrot.slane %v8323_v50, 4  ;;  %v4262_v2 = vmul.f32 %v8323_v50, %v8323_v50  ;;  %v8330_v12 = vpop.f32.mrb[45].mxu0 }
 0x8a0   : > { %v4498_v5 = vadd.f32 %v4464_v20, %v4442_v58  ;;  %v4233_v15 = vrot.slane %v8330_v12, 4  ;;  %v4261_v48 = vmul.f32 %v8330_v12, %v8330_v12 }
 0x8a1   : > { %v4497_v42 = vadd.f32 %v4460_v36, %v4441_v27  ;;  %v4240_v52 = vadd.f32 %v8323_v50, %v4239_v24  ;;  %v4295_v29 = vrot.slane %v4262_v2, 4 }
 0x8a2   : > { %v4506_v57 = vmax.f32 %v4498_v5, 0.0  ;;  %v4234_v44 = vadd.f32 %v4233_v15, %v8330_v12  ;;  %v4289_v41 = vrot.slane %v4261_v48, 4 }
 0x8a3   : > { %v4505_v47 = vmax.f32 %v4497_v42, 0.0  ;;  %v4241_v45 = vrot.slane %v4240_v52, 2  ;;  %v4296_v55 = vadd.f32 %v4295_v29, %v4262_v2 }
 0x8a4   : > { %v4235_v16 = vrot.slane %v4234_v44, 2  ;;  %v4290_v35 = vadd.f32 %v4289_v41, %v4261_v48  ;;  %v6143_v48 = vld [vmem:[#allocation16 + $0xb0] ss:$20 sps:$4 sm:$0xff]  }
 0x8a5   : > { %v8337_v13 = vpack.c.bf16 %v4506_v57, %v4505_v47  ;;  %v4242_v34 = vadd.f32 %v4241_v45, %v4240_v52  ;;  %v4297_v37 = vrot.slane %v4296_v55, 2 }
 0x8a6   : > { %v4236_v1 = vadd.f32 %v4235_v16, %v4234_v44  ;;  %v4291_v43 = vrot.slane %v4290_v35, 2 }
 0x8a7   : > { %v6248_v9 = vpop.eup %6247  ;;  %v4243_v56 = vrot.slane %v4242_v34, 1  ;;  %v4298_v61 = vadd.f32 %v4297_v37, %v4296_v55  ;;  %4833 = vmatmul.mubr.bf16.vlgmr.msra.gmra.mrb[40].mxu1 %v8337_v13  ;;  %4906 = vmatmul.mubr.bf16.vlgmr.msra.gmra.mrb[48].mxu0 %v8337_v13 }
 0x8a8   : > { %v6250_v6 = vpop.eup %6249  ;;  %v4372_v7 = vmul.f32 %v6248_v9, %v8304_v25  ;;  %v4237_v60 = vrot.slane %v4236_v1, 1  ;;  %v4292_v32 = vadd.f32 %v4291_v43, %v4290_v35  ;;  %5796 = vmatpush3.bf16.msra.mxu1 %v8268_v39  ;;  %4842 = vmatprep.mubr.bf16.mxu1 %v6645_v21 }
 0x8a9   : > { %v4371_v14 = vmul.f32 %v6250_v6, %v8304_v25  ;;  %v4244_v59 = vadd.f32 %v4243_v56, %v4242_v34  ;;  %v4299_v17 = vrot.slane %v4298_v61, 1  ;;  %5797 = vmatprep.subr.bf16.mxu1 %v6140_v3  ;;  %4915 = vmatprep.mubr.bf16.mxu0 %v6645_v21 }
 0x8aa   : > { %v4380_v51 = vmul.f32 %v4372_v7, %v8297_v10  ;;  %v4416_v22 = vrot.slane %v4372_v7, %v7429_v0  ;;  %v4238_v49 = vadd.f32 %v4237_v60, %v4236_v1  ;;  %v4293_v18 = vrot.slane %v4292_v32, 1  ;;  %v6144_v1 = vld [vmem:[#allocation16 + $0xd8] ss:$20 sps:$4 sm:$0xff]  }
 0x8ab   : > { %v4379_v23 = vmul.f32 %v4371_v14, %v8299_v11  ;;  %v4412_v39 = vrot.slane %v4371_v14, %v7429_v0  ;;  %v4300_v26 = vadd.f32 %v4299_v17, %v4298_v61  ;;  %v8350_v54 = vmul.f32 0.125, %v4244_v59  ;;  %v6145_v14 = vld [vmem:[#allocation16 + $0x100] ss:$20 sps:$4 sm:$0xff]  }
 0x8ac   : > { %v4294_v33 = vadd.f32 %v4293_v18, %v4292_v32  ;;  %v8352_v28 = vmul.f32 0.125, %v4238_v49  ;;  %5798 = vmatpush3.bf16.msra.mxu1 %v6140_v3  ;;  %v4388_v30 = vsub.f32 %v8314_v46, %v4380_v51  ;;  %v4444_v11 = vmul.f32 %v8285_v38, %v4416_v22 }
 0x8ad   : > { %v4326_v31 = vmul.f32 0.125, %v4300_v26  ;;  %v4334_v10 = vmul.f32 %v8350_v54, %v8350_v54  ;;  %v4387_v53 = vsub.f32 %v8314_v46, %v4379_v23  ;;  %5799 = vmatprep.subr.bf16.mxu1 %v6141_v19  ;;  %v4443_v20 = vmul.f32 %v4412_v39, %v8290_v8  ;;  %v6146_v39 = vld [vmem:[#allocation16 + $0x128] ss:$20 sps:$4 sm:$0xff]  }
 0x8ae   : > { %v4325_v63 = vmul.f32 0.125, %v4294_v33  ;;  %v4333_v4 = vmul.f32 %v8352_v28, %v8352_v28  ;;  %v4472_v58 = vrot.slane %v4388_v30, %v7429_v0 }
 0x8af   : > { %v4342_v27 = vsub.f32 %v4326_v31, %v4334_v10  ;;  %v4468_v36 = vrot.slane %v4387_v53, %v7429_v0 }
 0x8b0   : > { %v4341_v24 = vsub.f32 %v4325_v63, %v4333_v4  ;;  %v4500_v2 = vadd.f32 %v4472_v58, %v4444_v11  ;;  %5800 = vmatpush3.bf16.msra.mxu1 %v6141_v19  ;;  %v8364_v38 = vpop.f32.mrb[46].mxu0 }
 0x8b1   : > { %v4350_v5 = vmax.f32 %v4342_v27, 0.0  ;;  %v4499_v15 = vadd.f32 %v4468_v36, %v4443_v20  ;;  %5801 = vmatprep.subr.bf16.mxu1 %v6142_v62  ;;  %v4251_v57 = vrot.slane %v8364_v38, 4  ;;  %v4264_v8 = vmul.f32 %v8364_v38, %v8364_v38  ;;  %v8369_v44 = vpop.f32.mrb[47].mxu0 }
 0x8b2   : > { %v4349_v42 = vmax.f32 %v4341_v24, 0.0  ;;  %v4508_v52 = vmax.f32 %v4500_v2, 0.0  ;;  %v4245_v45 = vrot.slane %v8369_v44, 4  ;;  %v4263_v55 = vmul.f32 %v8369_v44, %v8369_v44 }
 0x8b3   : > { %v4358_v29 = vadd.f32 1e-05, %v4350_v5  ;;  %v4507_v41 = vmax.f32 %v4499_v15, 0.0  ;;  %v4252_v16 = vadd.f32 %v8364_v38, %v4251_v57  ;;  %v4307_v35 = vrot.slane %v4264_v8, 4 }
 0x8b4   : > { %v4357_v47 = vadd.f32 1e-05, %v4349_v42  ;;  %5802 = vmatpush3.bf16.msra.mxu1 %v6142_v62  ;;  %v4246_v37 = vadd.f32 %v4245_v45, %v8369_v44  ;;  %v4301_v3 = vrot.slane %v4263_v55, 4 }
 0x8b5   : > { %6251 = vrsqrt.f32 %v4358_v29  ;;  %v8375_v34 = vpack.c.bf16 %v4508_v52, %v4507_v41  ;;  %5803 = vmatprep.subr.bf16.mxu1 %v6143_v48  ;;  %v4253_v43 = vrot.slane %v4252_v16, 2  ;;  %v4308_v9 = vadd.f32 %v4307_v35, %v4264_v8 }
 0x8b6   : > { %6253 = vrsqrt.f32 %v4357_v47  ;;  %v4247_v56 = vrot.slane %v4246_v37, 2  ;;  %v4302_v61 = vadd.f32 %v4301_v3, %v4263_v55 }
 0x8b7   : > { %4843 = vmatmul.mubr.bf16.gmra.mrb[44].mxu1 %v8375_v34  ;;  %4916 = vmatmul.mubr.bf16.gmra.mrb[52].mxu0 %v8375_v34  ;;  %v4254_v6 = vadd.f32 %v4253_v43, %v4252_v16  ;;  %v4309_v7 = vrot.slane %v4308_v9, 2 }
 0x8b8   : > { %4852 = vmatprep.mubr.bf16.mxu1 %v6645_v21  ;;  %4925 = vmatprep.mubr.bf16.mxu0 %v6645_v21  ;;  %v4248_v60 = vadd.f32 %v4247_v56, %v4246_v37  ;;  %v4303_v32 = vrot.slane %v4302_v61, 2 }
 0x8b9   : > { %5804 = vmatpush3.bf16.msra.mxu1 %v6143_v48  ;;  %v4255_v59 = vrot.slane %v4254_v6, 1  ;;  %v4310_v17 = vadd.f32 %v4309_v7, %v4308_v9 }
 0x8ba   : > { %5805 = vmatprep.subr.bf16.mxu1 %v6144_v1  ;;  %v4249_v19 = vrot.slane %v4248_v60, 1  ;;  %v4304_v51 = vadd.f32 %v4303_v32, %v4302_v61 }
 0x8bb   : > { %v4256_v22 = vadd.f32 %v4255_v59, %v4254_v6  ;;  %v4311_v49 = vrot.slane %v4310_v17, 1 }
 0x8bc   : > { %v4250_v18 = vadd.f32 %v4249_v19, %v4248_v60  ;;  %v4305_v23 = vrot.slane %v4304_v51, 1 }
 0x8bd   : > { %5806 = vmatpush3.bf16.msra.mxu1 %v6144_v1  ;;  %v4312_v33 = vadd.f32 %v4311_v49, %v4310_v17  ;;  %v4320_v30 = vmul.f32 0.125, %v4256_v22 }
 0x8be   : > { %5807 = vmatprep.subr.bf16.mxu1 %v6145_v14  ;;  %v4306_v53 = vadd.f32 %v4305_v23, %v4304_v51  ;;  %v4319_v62 = vmul.f32 0.125, %v4250_v18 }
 0x8bf   : > { %v6252_v26 = vpop.eup %6251  ;;  %v4328_v63 = vmul.f32 0.125, %v4312_v33  ;;  %v4336_v4 = vmul.f32 %v4320_v30, %v4320_v30 }
 0x8c0   : > { %v6254_v31 = vpop.eup %6253  ;;  %v4374_v10 = vmul.f32 %v6252_v26, %v8304_v25  ;;  %v4327_v27 = vmul.f32 0.125, %v4306_v53  ;;  %v4335_v36 = vmul.f32 %v4319_v62, %v4319_v62 }
 0x8c1   : > { %v4373_v11 = vmul.f32 %v6254_v31, %v8304_v25  ;;  %5808 = vmatpush3.bf16.msra.mxu1 %v6145_v14  ;;  %v4344_v5 = vsub.f32 %v4328_v63, %v4336_v4 }
 0x8c2   : > { %v4382_v58 = vmul.f32 %v4374_v10, %v8350_v54  ;;  %v4424_v20 = vrot.slane %v4374_v10, %v7429_v0  ;;  %5809 = vmatprep.subr.bf16.mxu1 %v6146_v39  ;;  %v4343_v15 = vsub.f32 %v4327_v27, %v4335_v36 }
 0x8c3   : > { %v4381_v24 = vmul.f32 %v4373_v11, %v8352_v28  ;;  %v4420_v2 = vrot.slane %v4373_v11, %v7429_v0  ;;  %v4352_v42 = vmax.f32 %v4344_v5, 0.0 }
 0x8c4   : > { %v4390_v48 = vsub.f32 %v8314_v46, %v4382_v58  ;;  %v4446_v29 = vmul.f32 %v8323_v50, %v4424_v20  ;;  %v4351_v54 = vmax.f32 %v4343_v15, 0.0 }
 0x8c5   : > { %v4389_v52 = vsub.f32 %v8314_v46, %v4381_v24  ;;  %5810 = vmatpush3.bf16.msra.mxu1 %v6146_v39  ;;  %v4445_v8 = vmul.f32 %v4420_v2, %v8330_v12  ;;  %v4360_v41 = vadd.f32 1e-05, %v4352_v42 }
 0x8c6   : > { %v4480_v57 = vrot.slane %v4390_v48, %v7429_v0  ;;  %v4359_v47 = vadd.f32 1e-05, %v4351_v54 }
 0x8c7   : > { %v4476_v28 = vrot.slane %v4389_v52, %v7429_v0  ;;  %6255 = vrsqrt.f32 %v4360_v41 }
 0x8c8   : > { %v4502_v45 = vadd.f32 %v4480_v57, %v4446_v29  ;;  %6257 = vrsqrt.f32 %v4359_v47 }
 0x8c9   : > { %v4501_v55 = vadd.f32 %v4476_v28, %v4445_v8 }
 0x8ca   : > { %v4510_v16 = vmax.f32 %v4502_v45, 0.0 }
 0x8cb   : > { %v4509_v35 = vmax.f32 %v4501_v55, 0.0 }
 0x8cd   : > { %v4564_v37 = vpack.c.bf16 %v4510_v16, %v4509_v35 }
 0x8cf   : > { %4853 = vmatmul.mubr.bf16.gmra.mrb[48].mxu1 %v4564_v37  ;;  %4926 = vmatmul.mubr.bf16.gmra.mrb[56].mxu0 %v4564_v37 }
 0x8d0   : > { %4862 = vmatprep.mubr.bf16.mxu1 %v6645_v21  ;;  %4935 = vmatprep.mubr.bf16.mxu0 %v6645_v21 }
 0x8d1   : > { %v6256_v50 = vpop.eup %6255 }
 0x8d2   : > { %v6258_v3 = vpop.eup %6257  ;;  %v4376_v12 = vmul.f32 %v6256_v50, %v8304_v25 }
 0x8d3   : > { %v4375_v1 = vmul.f32 %v6258_v3, %v8304_v25 }
 0x8d4   : > { %v4384_v43 = vmul.f32 %v4376_v12, %v4320_v30  ;;  %v4432_v9 = vrot.slane %v4376_v12, %v7429_v0 }
 0x8d5   : > { %v4383_v56 = vmul.f32 %v4375_v1, %v4319_v62  ;;  %v4428_v61 = vrot.slane %v4375_v1, %v7429_v0 }
 0x8d6   : > { %v4392_v6 = vsub.f32 %v8314_v46, %v4384_v43  ;;  %v4448_v60 = vmul.f32 %v8364_v38, %v4432_v9 }
 0x8d7   : > { %v4391_v7 = vsub.f32 %v8314_v46, %v4383_v56  ;;  %v4447_v32 = vmul.f32 %v4428_v61, %v8369_v44 }
 0x8d8   : > { %v4488_v21 = vrot.slane %v4392_v6, %v7429_v0 }
 0x8d9   : > { %v4484_v25 = vrot.slane %v4391_v7, %v7429_v0 }
 0x8da   : > { %v4504_v14 = vadd.f32 %v4488_v21, %v4448_v60 }
 0x8db   : > { %v4503_v59 = vadd.f32 %v4484_v25, %v4447_v32 }
 0x8dc   : > { %v4512_v17 = vmax.f32 %v4504_v14, 0.0 }
 0x8dd   : > { %v4511_v19 = vmax.f32 %v4503_v59, 0.0 }
 0x8df   : > { %v4565_v51 = vpack.c.bf16 %v4512_v17, %v4511_v19 }
 0x8e1   : > { %4863 = vmatmul.mubr.bf16.gmra.mrb[52].mxu1 %v4565_v51  ;;  %4936 = vmatmul.mubr.bf16.gmra.mrb[60].mxu0 %v4565_v51 }
 0x8e2   : > { %5811 = vmatprep.mubr.bf16.mxu1 %v8337_v13 }
 0x8e9   : > { %5812 = vmatmul.mubr.bf16.vlgmr.msra.gmra.mrb[56].mxu1 %v8375_v34 }
 0x8ea   : > { %5815 = vmatprep.mubr.bf16.mxu1 %v4564_v37 }
 0x8f1   : > { %5816 = vmatmul.mubr.bf16.gmra.mrb[60].mxu1 %v4565_v51 }
 0x8f2   : > { %6526 = shalt.err (!%p6523_p11)
}
 0x8f3   : > { %s6527_s21 = scalar_lea.hbm %s8413_s14, 1024  ;;  %s6531_s1 = scalar_lea.hbm %s8688_s12, 2048 }
 0x8f4   : > { %p6528_p12 = scmp.ne.s32.totalorder %s8413_s14, %s6527_s21  ;;  %p6532_p7 = scmp.lt.u32.totalorder %s8413_s14, %s8688_s12 }
 0x8f5   : > { %p6533_p5 = scmp.lt.u32.totalorder %s6531_s1, %s6527_s21  ;;  %p6535_p4 = scmp.lt.u32.totalorder %s6527_s21, %s8413_s14 }
 0x8f6   : > { %p6529_p3 = pnand %p6528_p12, %p8689_p1 }
 0x8f7   : > { %p6534_p9 = por %p6533_p5, %p6532_p7 }
 0x8f8   : > { %p6530_p6 = pneg %p6529_p3 }
 0x8f9   : > { %p6536_p13 = por %p6535_p4, %p6534_p9 }
 0x8fb   : > { %p6537_p0 = pnand %p6536_p13, %p6530_p6 }
 0x8fd   : > { %6540 = shalt.err (!%p6537_p0)
}
 0x8fe   : > { %s6647_s27 = smov 128   ;;  %s6648_s3 = smov 8   ;;  %v4577_v46 = vsub.s32 2, %v7419_v40  ;;  %v4573_v38 = vsub.s32 1, %v7419_v40  ;;  %v4581_v44 = vsub.s32 3, %v7419_v40  ;;  %v4585_v51 = vsub.s32 4, %v7419_v40 }
 0x8ff   : > { %s8690_s9 = scalar_lea.sflag [#allocation19], %s7076_s18  ;;  %s8691_s13 = sld [smem:[#allocation44_spill]] }
 0x900   : > { %5942 = dma.vmem_to_hbm [thread:$0]  (%p8689_p1), %s8415_s7, 1024, %s8413_s14, %s8690_s9, %s6647_s27, %s6647_s27, %s6648_s3  }
 0x901   : > { %s8692_s9 = smul.u32 320, %s7076_s18  ;;  %s8693_s27 = sld [smem:[#allocation45_spill]] }
 0x902   : > { %s5906_s14 = smul.u32 5120, %s6803_s26  ;;  %s5052_s26 = scalar_lea.sflag [#allocation4], %s7076_s18 }
 0x903   : > { %s8468_s7 = scalar_lea.vmem [#allocation17], %s8692_s9  ;;  %s6649_s23 = smov [#allocation17]  }
 0x904   : > { %s5071_s21 = sshll.u32 %s8468_s7, 4  ;;  %s8545_s21 = int_to_ptr.vmem [resolvable:$true] %s5071_s21 }
 0x905   : > { %v8445_v13 = vld [vmem:[%s8691_s13] sm:$0x1f]  ;;  %s6541_s28 = scalar_lea.vmem %s8545_s21, 5120  ;;  %s6545_s13 = sshll.u32 %s6649_s23, 4  ;;  %s6546_s13 = int_to_ptr.vmem [resolvable:$false] %s6545_s13 }
 0x906   : > { %v8451_v34 = vrot.slane %v8445_v13, %v7429_v0  ;;  %v8454_v22 = vrot.slane %v8445_v13, %v4577_v46  ;;  %v8457_v49 = vrot.slane %v8445_v13, %v4573_v38  ;;  %v8460_v18 = vrot.slane %v8445_v13, %v4581_v44  ;;  %p6542_p2 = scmp.ne.s32.totalorder %s8545_s21, %s6541_s28  ;;  %s6547_s9 = scalar_lea.vmem %s6546_s13, 10240 }
 0x907   : > { %s8542_s3 = scalar_lea.hbm %s8693_s27, %s5906_s14  ;;  %p6548_p11 = scmp.lt.s32.totalorder %s8545_s21, %s6546_s13 }
 0x908   : > { %p6543_p8 = pnand %p6542_p2, %p8689_p1  ;;  %p6549_p12 = scmp.lt.s32.totalorder %s6547_s9, %s6541_s28 }
 0x90a   : > { %p6544_p10 = pneg %p6543_p8  ;;  %p6550_p3 = por %p6549_p12, %p6548_p11 }
 0x90c   : > { %p6551_p6 = pnand %p6550_p3, %p6544_p10 }
 0x97a   : > { %v4834_v23 = vpop.f32.mrb[40].mxu1  ;;  %v4907_v39 = vpop.f32.mrb[48].mxu0 }
 0x97b   : > { %v4835_v26 = vadd.f32 %v4834_v23, %v8451_v34  ;;  %v4908_v33 = vadd.f32 %v4907_v39, %v8454_v22  ;;  %v4836_v30 = vpop.f32.mrb[41].mxu1  ;;  %v4909_v31 = vpop.f32.mrb[49].mxu0 }
 0x97c   : > { %v4837_v0 = vadd.f32 %v4836_v30, %v8457_v49  ;;  %v4910_v10 = vadd.f32 %v4909_v31, %v8460_v18  ;;  %v4838_v53 = vpop.f32.mrb[42].mxu1  ;;  %v4911_v62 = vpop.f32.mrb[50].mxu0 }
 0x97d   : > { %5011 = vst [vmem:[%s8468_s7] sm:$0xff] %v4835_v26  ;;  %5013 = vst [vmem:[%s8468_s7 + $0x10] sm:$0xff] %v4908_v33  ;;  %v4839_v11 = vadd.f32 %v4838_v53, %v8451_v34  ;;  %v4912_v63 = vadd.f32 %v4911_v62, %v8454_v22  ;;  %v4840_v4 = vpop.f32.mrb[43].mxu1  ;;  %v4913_v58 = vpop.f32.mrb[51].mxu0 }
 0x97e   : > { %5012 = vst [vmem:[%s8468_s7 + $0x8] sm:$0xff] %v4837_v0  ;;  %5014 = vst [vmem:[%s8468_s7 + $0x18] sm:$0xff] %v4910_v10  ;;  %v4841_v20 = vadd.f32 %v4840_v4, %v8457_v49  ;;  %v4914_v27 = vadd.f32 %v4913_v58, %v8460_v18  ;;  %v4586_v0 = vrot.slane %v8445_v13, %v4585_v51 }
 0x97f   : > { %5016 = vst [vmem:[%s8468_s7 + $0x28] sm:$0xff] %v4839_v11  ;;  %5018 = vst [vmem:[%s8468_s7 + $0x38] sm:$0xff] %v4912_v63 }
 0x980   : > { %5017 = vst [vmem:[%s8468_s7 + $0x30] sm:$0xff] %v4841_v20  ;;  %5019 = vst [vmem:[%s8468_s7 + $0x40] sm:$0xff] %v4914_v27 }
 0x98a   : > { %v4844_v36 = vpop.f32.mrb[44].mxu1  ;;  %v4917_v24 = vpop.f32.mrb[52].mxu0 }
 0x98b   : > { %v4845_v2 = vadd.f32 %v4844_v36, %v8451_v34  ;;  %v4918_v5 = vadd.f32 %v4917_v24, %v8454_v22  ;;  %v4846_v15 = vpop.f32.mrb[45].mxu1  ;;  %v4919_v48 = vpop.f32.mrb[53].mxu0 }
 0x98c   : > { %v4847_v42 = vadd.f32 %v4846_v15, %v8457_v49  ;;  %v4920_v52 = vadd.f32 %v4919_v48, %v8460_v18  ;;  %v4848_v29 = vpop.f32.mrb[46].mxu1  ;;  %v4921_v54 = vpop.f32.mrb[54].mxu0 }
 0x98d   : > { %5021 = vst [vmem:[%s8468_s7 + $0x50] sm:$0xff] %v4845_v2  ;;  %5023 = vst [vmem:[%s8468_s7 + $0x60] sm:$0xff] %v4918_v5  ;;  %v4849_v57 = vadd.f32 %v4848_v29, %v8451_v34  ;;  %v4922_v8 = vadd.f32 %v4921_v54, %v8454_v22  ;;  %v4850_v41 = vpop.f32.mrb[47].mxu1  ;;  %v4923_v28 = vpop.f32.mrb[55].mxu0 }
 0x98e   : > { %5022 = vst [vmem:[%s8468_s7 + $0x58] sm:$0xff] %v4847_v42  ;;  %5024 = vst [vmem:[%s8468_s7 + $0x68] sm:$0xff] %v4920_v52  ;;  %v4851_v47 = vadd.f32 %v4850_v41, %v8457_v49  ;;  %v4924_v45 = vadd.f32 %v4923_v28, %v8460_v18 }
 0x98f   : > { %5026 = vst [vmem:[%s8468_s7 + $0x78] sm:$0xff] %v4849_v57  ;;  %5028 = vst [vmem:[%s8468_s7 + $0x88] sm:$0xff] %v4922_v8 }
 0x990   : > { %5027 = vst [vmem:[%s8468_s7 + $0x80] sm:$0xff] %v4851_v47  ;;  %5029 = vst [vmem:[%s8468_s7 + $0x90] sm:$0xff] %v4924_v45 }
 0x9a2   : > { %v4854_v55 = vpop.f32.mrb[48].mxu1  ;;  %v4927_v16 = vpop.f32.mrb[56].mxu0 }
 0x9a3   : > { %v4855_v35 = vadd.f32 %v4854_v55, %v8451_v34  ;;  %v4928_v37 = vadd.f32 %v4927_v16, %v8454_v22  ;;  %v4856_v50 = vpop.f32.mrb[49].mxu1  ;;  %v4929_v3 = vpop.f32.mrb[57].mxu0 }
 0x9a4   : > { %v4857_v12 = vadd.f32 %v4856_v50, %v8457_v49  ;;  %v4930_v1 = vadd.f32 %v4929_v3, %v8460_v18  ;;  %v4858_v43 = vpop.f32.mrb[50].mxu1  ;;  %v4931_v9 = vpop.f32.mrb[58].mxu0 }
 0x9a5   : > { %5031 = vst [vmem:[%s8468_s7 + $0xa0] sm:$0xff] %v4855_v35  ;;  %5033 = vst [vmem:[%s8468_s7 + $0xb0] sm:$0xff] %v4928_v37  ;;  %v4859_v56 = vadd.f32 %v4858_v43, %v8451_v34  ;;  %v4932_v61 = vadd.f32 %v4931_v9, %v8454_v22  ;;  %v4860_v6 = vpop.f32.mrb[51].mxu1  ;;  %v4933_v7 = vpop.f32.mrb[59].mxu0 }
 0x9a6   : > { %5032 = vst [vmem:[%s8468_s7 + $0xa8] sm:$0xff] %v4857_v12  ;;  %5034 = vst [vmem:[%s8468_s7 + $0xb8] sm:$0xff] %v4930_v1  ;;  %v4861_v60 = vadd.f32 %v4860_v6, %v8457_v49  ;;  %v4934_v21 = vadd.f32 %v4933_v7, %v8460_v18 }
 0x9a7   : > { %5036 = vst [vmem:[%s8468_s7 + $0xc8] sm:$0xff] %v4859_v56  ;;  %5038 = vst [vmem:[%s8468_s7 + $0xd8] sm:$0xff] %v4932_v61 }
 0x9a8   : > { %5037 = vst [vmem:[%s8468_s7 + $0xd0] sm:$0xff] %v4861_v60  ;;  %5039 = vst [vmem:[%s8468_s7 + $0xe0] sm:$0xff] %v4934_v21 }
 0x9b4   : > { %v4864_v32 = vpop.f32.mrb[52].mxu1  ;;  %v4937_v25 = vpop.f32.mrb[60].mxu0 }
 0x9b5   : > { %v4865_v14 = vadd.f32 %v4864_v32, %v8451_v34  ;;  %v4938_v59 = vadd.f32 %v4937_v25, %v8454_v22  ;;  %v4866_v17 = vpop.f32.mrb[53].mxu1  ;;  %v4939_v19 = vpop.f32.mrb[61].mxu0 }
 0x9b6   : > { %v4867_v46 = vadd.f32 %v4866_v17, %v8457_v49  ;;  %v4940_v38 = vadd.f32 %v4939_v19, %v8460_v18  ;;  %v4868_v44 = vpop.f32.mrb[54].mxu1  ;;  %v4941_v23 = vpop.f32.mrb[62].mxu0 }
 0x9b7   : > { %5041 = vst [vmem:[%s8468_s7 + $0xf0] sm:$0xff] %v4865_v14  ;;  %5043 = vst [vmem:[%s8468_s7 + $0x100] sm:$0xff] %v4938_v59  ;;  %v4869_v39 = vadd.f32 %v4868_v44, %v8451_v34  ;;  %v4942_v26 = vadd.f32 %v4941_v23, %v8454_v22  ;;  %v4870_v33 = vpop.f32.mrb[55].mxu1  ;;  %v4943_v30 = vpop.f32.mrb[63].mxu0 }
 0x9b8   : > { %5042 = vst [vmem:[%s8468_s7 + $0xf8] sm:$0xff] %v4867_v46  ;;  %5044 = vst [vmem:[%s8468_s7 + $0x108] sm:$0xff] %v4940_v38  ;;  %v4871_v40 = vadd.f32 %v4870_v33, %v8457_v49  ;;  %v4944_v31 = vadd.f32 %v4943_v30, %v8460_v18 }
 0x9b9   : > { %5046 = vst [vmem:[%s8468_s7 + $0x118] sm:$0xff] %v4869_v39  ;;  %5048 = vst [vmem:[%s8468_s7 + $0x128] sm:$0xff] %v4942_v26 }
 0x9ba   : > { %5047 = vst [vmem:[%s8468_s7 + $0x120] sm:$0xff] %v4871_v40  ;;  %5049 = vst [vmem:[%s8468_s7 + $0x130] sm:$0xff] %v4944_v31 }
 0x9bc   : > { %v5813_v34 = vpop.f32.mrb[56].mxu1 }
 0x9bd   : > { %v4989_v22 = vadd.f32 %v5813_v34, %v4586_v0  ;;  %v4980_v10 = vpop.f32.mrb[57].mxu1 }
 0x9be   : > { %v4981_v53 = vadd.f32 %v4980_v10, %v4586_v0  ;;  %v5814_v62 = vpop.f32.mrb[58].mxu1 }
 0x9bf   : > { %5025 = vst [vmem:[%s8468_s7 + $0x70] sm:$0xff] %v4989_v22  ;;  %v4992_v49 = vadd.f32 %v5814_v62, %v4586_v0  ;;  %v4983_v11 = vpop.f32.mrb[59].mxu1 }
 0x9c0   : > { %5015 = vst [vmem:[%s8468_s7 + $0x20] sm:$0xff] %v4981_v53  ;;  %v4984_v18 = vadd.f32 %v4983_v11, %v4586_v0 }
 0x9c1   : > { %5030 = vst [vmem:[%s8468_s7 + $0x98] sm:$0xff] %v4992_v49 }
 0x9c2   : > { %5020 = vst [vmem:[%s8468_s7 + $0x48] sm:$0xff] %v4984_v18 }
 0x9c4   : > { %v5817_v13 = vpop.f32.mrb[60].mxu1 }
 0x9c5   : > { %v5005_v63 = vadd.f32 %v5817_v13, %v4586_v0  ;;  %v4996_v4 = vpop.f32.mrb[61].mxu1 }
 0x9c6   : > { %v4997_v58 = vadd.f32 %v4996_v4, %v4586_v0  ;;  %v5818_v20 = vpop.f32.mrb[62].mxu1 }
 0x9c7   : > { %5045 = vst [vmem:[%s8468_s7 + $0x110] sm:$0xff] %v5005_v63  ;;  %v5008_v27 = vadd.f32 %v5818_v20, %v4586_v0  ;;  %v4999_v36 = vpop.f32.mrb[63].mxu1 }
 0x9c8   : > { %5035 = vst [vmem:[%s8468_s7 + $0xc0] sm:$0xff] %v4997_v58  ;;  %v5000_v24 = vadd.f32 %v4999_v36, %v4586_v0 }
 0x9c9   : > { %5050 = vst [vmem:[%s8468_s7 + $0x138] sm:$0xff] %v5008_v27 }
 0x9ca   : > { %5040 = vst [vmem:[%s8468_s7 + $0xe8] sm:$0xff] %v5000_v24 }
 0x9cb   : > { %6554 = shalt.err (!%p6551_p6)
}
 0x9cc   : > { %s6555_s7 = scalar_lea.hbm %s8542_s3, 5120  ;;  %s6559_s8 = scalar_lea.hbm %s8693_s27, 10240 }
 0x9cd   : > { %p6556_p7 = scmp.ne.s32.totalorder %s8542_s3, %s6555_s7  ;;  %p6560_p4 = scmp.lt.u32.totalorder %s8542_s3, %s8693_s27 }
 0x9ce   : > { %p6561_p13 = scmp.lt.u32.totalorder %s6559_s8, %s6555_s7  ;;  %p6563_p2 = scmp.lt.u32.totalorder %s6555_s7, %s8542_s3 }
 0x9cf   : > { %p6557_p5 = pnand %p6556_p7, %p8689_p1 }
 0x9d0   : > { %p6562_p0 = por %p6561_p13, %p6560_p4 }
 0x9d1   : > { %p6558_p9 = pneg %p6557_p5 }
 0x9d2   : > { %p6564_p8 = por %p6563_p2, %p6562_p0 }
 0x9d4   : > { %p6565_p10 = pnand %p6564_p8, %p6558_p9 }
 0x9d6   : > { %6568 = shalt.err (!%p6565_p10)
}
 0x9d7   : > { %s6650_s28 = smov 640   ;;  %s6651_s9 = smov 40  }
 0x9d8   : > { %5941 = dma.vmem_to_hbm [thread:$0]  (%p8689_p1), %s8545_s21, 5120, %s8542_s3, %s5052_s26, %s6650_s28, %s6650_s28, %s6651_s9  }
 0x9d9 PF: > { %s5102_s14 = sand.u32 1, %s6615_s29   ;;  %p8694_p11 = scmp.ne.s32.totalorder %s8665_s4, 0 }
 0x9da   : > { %p8695_p12 = scmp.ge.s32.totalorder %s6627_s30, 2  ;;  %s5103_s7 = scalar_lea.sflag [#allocation4], %s5102_s14 }
 0x9dc   : > { %p5975_p3 = pnand %p8695_p12, %p8694_p11 }
 0x9de   : > { %6606 = dma.done.wait (!%p5975_p3), %s5103_s7, 5120  }
 0x9df   : > { %6608 = vsyncadd (!%p5975_p3), %s5103_s7, 4294962176  ;;  %s5112_s1 = scalar_lea.sflag [#allocation19], %s5102_s14 }
 0x9e0   : > { %6610 = dma.done.wait (!%p5975_p3), %s5112_s1, 1024  }
 0x9e1   : > { %6612 = vsyncadd (!%p5975_p3), %s5112_s1, 4294966272  ;;  %p46_p1 = scmp.ge.s32.totalorder %s7003_s20, 4   ;;  %s8696_s29 = smov %s6619_s2 }
 0x9e2   : > { %s8697_s2 = smov %s6623_s6  ;;  %s8698_s6 = smov %s7014_s5 }
 0x9e3   : > { %s8699_s30 = smov %s7003_s20  ;;  %48 = sbr.rel (!%p46_p1) target bundleno = 32 (0x20), region = 210 }
 0x9ea   :  { %5117 = vsyncpa [#allocation3], 1 }
 0x9eb   :  { %5119 = vsyncpa [#allocation3 + $0x1], 1 }
 0x9ec   :  { %5120 = vsyncpa [#allocation6], 1 }
 0x9ed   :  { %5121 = vsyncpa [#allocation9], 1 }
 0x9ee   :  { %5122 = vsyncpa [#allocation12], 1 }
 0x9ef   :  { %5123 = vsyncpa [#allocation15], 1 }
 0x9f0   :  { %5124 = vsyncpa [#allocation4], 1 }
 0x9f1   :  { %5126 = vsyncpa [#allocation4 + $0x1], 1 }
 0x9f2   :  { %5127 = vsyncpa [#allocation19], 1 }
 0x9f3   :  { %5129 = vsyncpa [#allocation19 + $0x1], 1 }

</bundles_post_ra>
